<compile_context>
chip_gen: v6e
topology: v6e:2x2x1
jax: 0.10.0
libtpu: 0.0.40
codegen_flags: <defaults>
</compile_context>

<pallas_src>
import functools
import math

import jax
import jax.numpy as jnp
from jax import lax
from jax.experimental import pallas as pl
from jax.experimental.pallas import tpu as pltpu

# ----------------------------------------------------------------------------
# Hyperparameters consistent with the module's constructor (small config)
# ----------------------------------------------------------------------------
D_MODEL = 48
N_HEADS = 3
D_QKV = D_MODEL // N_HEADS          # 16
NUM_LAYERS = 2
D_FF = 64
LATENT_DIM = 8
ACTION_DIM = 2
ACTION_EMBED = 10
STATE_DIM = 2
STATE_EMBED = 10
REWARD_SIZE = 1
REWARD_EMBED = 5
ENC_IN = ACTION_DIM + STATE_DIM + REWARD_SIZE            # 5
ENC_OUT = ACTION_EMBED + STATE_EMBED + REWARD_EMBED      # 25
MAX_SEQ_LEN = 32                    # must be >= ENC_OUT (25)
LN_EPS = 1e-5
NEG_INF = -1e30                     # finite "masked" value (no inf-inf NaN risk)


# ============================================================================
# The single fused Pallas kernel
# ============================================================================
def _encoder_fwd_kernel(
    x_ref, mask_ref,
    enc_w, enc_b, proj_w, proj_b,
    ln1w, ln1b, wqkv, wout, bout,
    ln2w, ln2b, ln3w, ln3b,
    wff1, bff1, ln4w, ln4b, wff2, bff2,
    norm_w, norm_b, head_w, head_b,
    h_out_ref, latent_ref,
    attn_buf,
    *, n_heads, d_qkv, n_layers):
    """Entire TransformerEncoder forward on a VMEM-resident (M, D) activation."""
    f32 = jnp.float32
    H, E = n_heads, d_qkv
    scale = 1.0 / math.sqrt(E)

    def ln(v, w, b):
        mu = jnp.mean(v, axis=-1, keepdims=True)
        var = jnp.mean((v - mu) ** 2, axis=-1, keepdims=True)
        return (v - mu) * lax.rsqrt(var + LN_EPS) * w + b

    # ---- feature encoders (block-diagonal fused) + ReLU -------------------
    h25 = jnp.dot(x_ref[...], enc_w[...], preferred_element_type=f32) + enc_b[...]
    h25 = jnp.maximum(h25, 0.0)
    # ---- input_projection + positional_embedding (folded into one matmul) --
    h = jnp.dot(h25, proj_w[...], preferred_element_type=f32) + proj_b[...]

    # block-diagonal causal additive mask, shared by both layers (hoisted)
    mask_bias = mask_ref[...]                                      # (M, M)

    for l in range(n_layers):                                      # unrolled
        # -------------- pre-norm causal self-attention (normformer) --------
        q1 = ln(h, ln1w[l], ln1b[l])                               # norm1
        qkv = jnp.dot(q1, wqkv[l], preferred_element_type=f32)     # (M, 3*H*E)
        for hh in range(H):
            qh = qkv[:, hh * E:(hh + 1) * E]                       # (M, E)
            kh = qkv[:, (H + hh) * E:(H + hh + 1) * E]
            vh = qkv[:, (2 * H + hh) * E:(2 * H + hh + 1) * E]
            s = lax.dot_general(qh, kh, (((1,), (1,)), ((), ())),
                                preferred_element_type=f32) * scale + mask_bias
            s = s - jnp.max(s, axis=-1, keepdims=True)
            p = jnp.exp(s)
            p = p / jnp.sum(p, axis=-1, keepdims=True)             # softmax (attn dropout = id)
            oh = jnp.dot(p, vh, preferred_element_type=f32)        # (M, E)
            attn_buf[:, hh * E:(hh + 1) * E] = oh                  # concat heads in VMEM
        # head_scaler is folded into wout at init; single fused out-projection
        attn = jnp.dot(attn_buf[...], wout[l], preferred_element_type=f32) + bout[l]
        attn = ln(attn, ln2w[l], ln2b[l])                          # norm2 (normformer)
        h = h + attn                                               # residual 1

        # -------------------------- feed-forward ---------------------------
        q2 = ln(h, ln3w[l], ln3b[l])                               # norm3
        f1 = jnp.dot(q2, wff1[l], preferred_element_type=f32) + bff1[l]
        f1 = jnp.maximum(f1, 0.0)                                  # relu
        f1 = ln(f1, ln4w[l], ln4b[l])                              # norm4
        f2 = jnp.dot(f1, wff2[l], preferred_element_type=f32) + bff2[l]
        h = h + f2                                                 # residual 2 (ff dropout = id)

    # final norm applied twice (matches reference: norm -> (no fc_after) -> norm)
    h = ln(h, norm_w[...], norm_b[...])
    h = ln(h, norm_w[...], norm_b[...])
    h_out_ref[...] = h
    # fused fc_mu | fc_logvar head
    latent_ref[...] = jnp.dot(h, head_w[...], preferred_element_type=f32) + head_b[...]


def _encoder_fused_call(x, mask_bias, p):
    M = x.shape[0]
    args = (x, mask_bias,
            p['enc_w'], p['enc_b'], p['proj_w'], p['proj_b'],
            p['ln1w'], p['ln1b'], p['wqkv'], p['wout'], p['bout'],
            p['ln2w'], p['ln2b'], p['ln3w'], p['ln3b'],
            p['wff1'], p['bff1'], p['ln4w'], p['ln4b'], p['wff2'], p['bff2'],
            p['norm_w'], p['norm_b'], p['head_w'], p['head_b'])
    vmem = lambda: pl.BlockSpec(memory_space=pltpu.MemorySpace.VMEM)
    return pl.pallas_call(
        functools.partial(_encoder_fwd_kernel, n_heads=N_HEADS, d_qkv=D_QKV,
                          n_layers=NUM_LAYERS),
        out_shape=(jax.ShapeDtypeStruct((M, D_MODEL), jnp.float32),
                   jax.ShapeDtypeStruct((M, 2 * LATENT_DIM), jnp.float32)),
        in_specs=[vmem() for _ in args],
        out_specs=(vmem(), vmem()),
        scratch_shapes=[pltpu.VMEM((M, N_HEADS * D_QKV), jnp.float32)],
    )(*args)


# ============================================================================
# Deterministic parameter initialisation (synthetic; mirrors module shapes),
# with all perf-motivated re-layouts done ONCE here (zero runtime cost).
# ============================================================================
def _uniform(key, shape, lim):
    return jax.random.uniform(key, shape, jnp.float32, -lim, lim)


def init_linear(key, d_in, d_out):
    kw, kb = jax.random.split(key)
    lim = 1.0 / math.sqrt(d_in)
    return {'W': _uniform(kw, (d_out, d_in), lim), 'b': _uniform(kb, (d_out,), lim)}


def init_sigma_reparam(key, d_in, d_out, bias=True):
    """SigmaReparam in eval mode: W_hat = gamma / (u^T W v) * W."""
    kw, kb, ku, kv = jax.random.split(key, 4)
    lim = 1.0 / math.sqrt(d_in)
    W = _uniform(kw, (d_out, d_in), lim)                  # kaiming_uniform(a=sqrt(5))
    u = jax.random.normal(ku, (d_out,), jnp.float32)
    u = u / jnp.linalg.norm(u)
    v = jax.random.normal(kv, (d_in,), jnp.float32)
    v = v / jnp.linalg.norm(v)
    gamma = jnp.ones((), jnp.float32)
    sigma = u @ W @ v                                     # einsum('d,dc,c->')
    W_hat = (gamma / sigma) * W
    # TODO(synk): training-mode power-iteration buffer update of u/v is skipped (eval).
    b = _uniform(kb, (d_out,), lim) if bias else None
    return W_hat, b


def init_transformer_layer(key):
    H, E, D, F = N_HEADS, D_QKV, D_MODEL, D_FF
    keys = jax.random.split(key, 4)
    # AttentionLayer: qkv_projection (no bias), out_projection (bias)
    Wqkv, _ = init_sigma_reparam(keys[0], D, 3 * E * H, bias=False)       # (144, 48)
    # PyTorch rearrange '(three d_qkv heads)' => flat col = t*E*H + e*H + h.
    # Re-pack rows to order (t, h, e) so head slices of the fused QKV output
    # are contiguous lane ranges (pure parameter re-layout, identical math).
    wqkv_k = jnp.transpose(Wqkv.reshape(3, E, H, D), (0, 2, 1, 3)).reshape(3 * H * E, D).T
    Wout, bout = init_sigma_reparam(keys[1], E * H, D, bias=True)         # (48, 48)
    hscale = jnp.ones((H,), jnp.float32)                                  # head_scaler init = 1
    col_scale = jnp.repeat(hscale, E)                                     # fold into wout
    wout_k = (Wout * col_scale[None, :]).T                                # (H*E, D)
    Wff1, bff1 = init_sigma_reparam(keys[2], D, F, bias=True)             # (F, D)
    Wff2, bff2 = init_sigma_reparam(keys[3], F, D, bias=True)             # (D, F)
    ones_d = jnp.ones((1, D), jnp.float32)
    zeros_d = jnp.zeros((1, D), jnp.float32)
    return dict(
        wqkv=wqkv_k, wout=wout_k, bout=bout.reshape(1, D),
        wff1=Wff1.T, bff1=bff1.reshape(1, F),
        wff2=Wff2.T, bff2=bff2.reshape(1, D),
        ln1w=ones_d, ln1b=zeros_d,
        ln2w=ones_d, ln2b=zeros_d,
        ln3w=ones_d, ln3b=zeros_d,
        ln4w=jnp.ones((1, F), jnp.float32), ln4b=jnp.zeros((1, F), jnp.float32),
    )


def init_params(key):
    ks = jax.random.split(key, 8)
    act = init_linear(ks[0], ACTION_DIM, ACTION_EMBED)
    st = init_linear(ks[1], STATE_DIM, STATE_EMBED)
    rw = init_linear(ks[2], REWARD_SIZE, REWARD_EMBED)
    pos = init_linear(ks[3], MAX_SEQ_LEN, D_MODEL)
    proj = init_linear(ks[4], ENC_OUT, D_MODEL)
    mu = init_linear(ks[5], D_MODEL, LATENT_DIM)
    lv = init_linear(ks[6], D_MODEL, LATENT_DIM)
    layer_keys = jax.random.split(ks[7], NUM_LAYERS)

    # Fused block-diagonal feature encoder: (M,5) -> (M,25), then ReLU.
    enc_w = jnp.zeros((ENC_IN, ENC_OUT), jnp.float32)
    enc_w = enc_w.at[0:ACTION_DIM, 0:ACTION_EMBED].set(act['W'].T)
    enc_w = enc_w.at[ACTION_DIM:ACTION_DIM + STATE_DIM,
                     ACTION_EMBED:ACTION_EMBED + STATE_EMBED].set(st['W'].T)
    enc_w = enc_w.at[ACTION_DIM + STATE_DIM:, ACTION_EMBED + STATE_EMBED:].set(rw['W'].T)
    enc_b = jnp.concatenate([act['b'], st['b'], rw['b']]).reshape(1, ENC_OUT)

    # Fold positional_embedding into input_projection:
    #   pos_emb = (pad(h,25->32) + arange(32)) @ Wp^T + bp
    #           =  h @ Wp^T[:25] + (arange(32) @ Wp^T + bp)
    #   h_in    =  h @ (Wi^T + Wp^T[:25]) + (bi + bp + arange(32) @ Wp^T)
    pos_wt = pos['W'].T                                                  # (32, 48)
    pos_const = jnp.arange(MAX_SEQ_LEN, dtype=jnp.float32) @ pos_wt      # (48,)
    proj_w = proj['W'].T + pos_wt[:ENC_OUT, :]                           # (25, 48)
    proj_b = (proj['b'] + pos['b'] + pos_const).reshape(1, D_MODEL)

    # Per-layer parameters stacked along a leading NUM_LAYERS axis.
    layers = [init_transformer_layer(k) for k in layer_keys]
    stacked = {name: jnp.stack([lp[name] for lp in layers]) for name in layers[0]}

    # Fused latent heads: fc_mu | fc_logvar -> one (48, 16) matmul.
    head_w = jnp.concatenate([mu['W'].T, lv['W'].T], axis=1)             # (48, 16)
    head_b = jnp.concatenate([mu['b'], lv['b']]).reshape(1, 2 * LATENT_DIM)

    return dict(
        enc_w=enc_w, enc_b=enc_b, proj_w=proj_w, proj_b=proj_b,
        norm_w=jnp.ones((1, D_MODEL), jnp.float32),
        norm_b=jnp.zeros((1, D_MODEL), jnp.float32),
        head_w=head_w, head_b=head_b,
        **stacked,
    )


# ============================================================================
# Forward pass (thin glue around the single fused kernel)
# ============================================================================
def transformer_encoder_forward(params, actions, states, rewards, hidden_state=None,
                                sample=True, sample_key=None,
                                norm_actions_post_sampling=False):
    del hidden_state  # unused by the PyTorch forward as well
    # utl.squash_action: identity unless args.norm_actions_post_sampling
    if norm_actions_post_sampling:
        actions = jnp.tanh(actions)
    actions = actions.reshape(-1, actions.shape[-2], actions.shape[-1])
    states = states.reshape(-1, states.shape[-2], states.shape[-1])
    rewards = rewards.reshape(-1, rewards.shape[-2], rewards.shape[-1])
    L, B = actions.shape[0], actions.shape[1]
    M = L * B

    # concatenated raw features (M, 5); fused encoder splits them block-diagonally
    x = jnp.concatenate([actions.reshape(M, -1), states.reshape(M, -1),
                         rewards.reshape(M, -1)], axis=-1).astype(jnp.float32)

    # Block-diagonal causal additive mask over the flat M axis:
    # attention "batch" = L (rows i//B), causal "len" = B (positions i%B).
    idx = jnp.arange(M, dtype=jnp.int32)
    same_group = (idx[:, None] // B) == (idx[None, :] // B)
    causal_ok = (idx[None, :] % B) <= (idx[:, None] % B)
    mask_bias = jnp.where(same_group & causal_ok, 0.0, NEG_INF).astype(jnp.float32)

    h, latent = _encoder_fused_call(x, mask_bias, params)

    latent_mean = latent[:, :LATENT_DIM].reshape(L, B, LATENT_DIM)
    latent_logvar = latent[:, LATENT_DIM:].reshape(L, B, LATENT_DIM)

    if sample:
        std = jnp.exp(0.5 * latent_logvar)
        eps = jax.random.normal(sample_key, std.shape, jnp.float32)
        latent_sample = eps * std + latent_mean
    else:
        latent_sample = latent_mean

    h_out = h.reshape(L, B, D_MODEL)
    # .squeeze(0) only removes the leading dim when L == 1 (no-op otherwise)
    if L == 1:
        latent_sample, latent_mean, latent_logvar = (
            latent_sample[0], latent_mean[0], latent_logvar[0])
    return latent_sample, latent_mean, latent_logvar, h_out


# ============================================================================
if __name__ == "__main__":
    L, B = 8, 4
    key = jax.random.PRNGKey(0)
    k_act, k_st, k_rw, k_par, k_sample = jax.random.split(key, 5)

    actions = jax.random.normal(k_act, (L, B, ACTION_DIM), jnp.float32)
    states = jax.random.normal(k_st, (L, B, STATE_DIM), jnp.float32)
    rewards = jax.random.normal(k_rw, (L, B, REWARD_SIZE), jnp.float32)

    params = init_params(k_par)

    @jax.jit
    def run(a, s, r, k):
        return transformer_encoder_forward(params, a, s, r, hidden_state=None,
                                           sample=True, sample_key=k)

    outs = run(actions, states, rewards, k_sample)
    jax.block_until_ready(outs)
    latent_sample, latent_mean, latent_logvar, h = outs
    assert latent_sample.shape == (L, B, LATENT_DIM)
    assert latent_mean.shape == (L, B, LATENT_DIM)
    assert latent_logvar.shape == (L, B, LATENT_DIM)
    assert h.shape == (L, B, D_MODEL)
    assert bool(jnp.all(jnp.isfinite(latent_mean)))
    assert bool(jnp.all(jnp.isfinite(h)))
    print("KERNEL_OK")
</pallas_src>

<mosaic_0001>
module attributes {stable_mosaic.version = 11 : i64} {
  func.func @_encoder_fwd_kernel(%arg0: memref<32x5xf32, #tpu.memory_space<vmem>>, %arg1: memref<32x32xf32, #tpu.memory_space<vmem>>, %arg2: memref<5x25xf32, #tpu.memory_space<vmem>>, %arg3: memref<1x25xf32, #tpu.memory_space<vmem>>, %arg4: memref<25x48xf32, #tpu.memory_space<vmem>>, %arg5: memref<1x48xf32, #tpu.memory_space<vmem>>, %arg6: memref<2x1x48xf32, #tpu.memory_space<vmem>>, %arg7: memref<2x1x48xf32, #tpu.memory_space<vmem>>, %arg8: memref<2x48x144xf32, #tpu.memory_space<vmem>>, %arg9: memref<2x48x48xf32, #tpu.memory_space<vmem>>, %arg10: memref<2x1x48xf32, #tpu.memory_space<vmem>>, %arg11: memref<2x1x48xf32, #tpu.memory_space<vmem>>, %arg12: memref<2x1x48xf32, #tpu.memory_space<vmem>>, %arg13: memref<2x1x48xf32, #tpu.memory_space<vmem>>, %arg14: memref<2x1x48xf32, #tpu.memory_space<vmem>>, %arg15: memref<2x48x64xf32, #tpu.memory_space<vmem>>, %arg16: memref<2x1x64xf32, #tpu.memory_space<vmem>>, %arg17: memref<2x1x64xf32, #tpu.memory_space<vmem>>, %arg18: memref<2x1x64xf32, #tpu.memory_space<vmem>>, %arg19: memref<2x64x48xf32, #tpu.memory_space<vmem>>, %arg20: memref<2x1x48xf32, #tpu.memory_space<vmem>>, %arg21: memref<1x48xf32, #tpu.memory_space<vmem>>, %arg22: memref<1x48xf32, #tpu.memory_space<vmem>>, %arg23: memref<48x16xf32, #tpu.memory_space<vmem>>, %arg24: memref<1x16xf32, #tpu.memory_space<vmem>>, %arg25: memref<32x48xf32, #tpu.memory_space<vmem>>, %arg26: memref<32x16xf32, #tpu.memory_space<vmem>>, %arg27: memref<32x48xf32, #tpu.memory_space<vmem>>) attributes {dimension_semantics = [], scalar_prefetch = 0 : i64, scratch_operands = 1 : i64, tpu.core_type = #tpu.core_type<tc>} {
    %c0 = arith.constant 0 : index
    %c0_0 = arith.constant 0 : index
    %0 = vector.load %arg0[%c0, %c0_0] : memref<32x5xf32, #tpu.memory_space<vmem>>, vector<32x5xf32>
    %c0_1 = arith.constant 0 : index
    %c0_2 = arith.constant 0 : index
    %1 = vector.load %arg2[%c0_1, %c0_2] : memref<5x25xf32, #tpu.memory_space<vmem>>, vector<5x25xf32>
    %cst = arith.constant dense<0.000000e+00> : vector<32x25xf32>
    %2 = tpu.matmul %0, %1, %cst {dimension_numbers = #tpu.dot_dimension_numbers<[1], [0], [0], [1], [0, 0, 1, 1], [], []>} : vector<32x5xf32>, vector<5x25xf32>, vector<32x25xf32> -> vector<32x25xf32>
    %c0_3 = arith.constant 0 : index
    %c0_4 = arith.constant 0 : index
    %3 = vector.load %arg3[%c0_3, %c0_4] : memref<1x25xf32, #tpu.memory_space<vmem>>, vector<1x25xf32>
    %4 = vector.broadcast %3 : vector<1x25xf32> to vector<32x25xf32>
    %5 = arith.addf %2, %4 : vector<32x25xf32>
    %cst_5 = arith.constant 0.000000e+00 : f32
    %6 = vector.broadcast %cst_5 : f32 to vector<32x25xf32>
    %7 = arith.maximumf %5, %6 : vector<32x25xf32>
    %c0_6 = arith.constant 0 : index
    %c0_7 = arith.constant 0 : index
    %8 = vector.load %arg4[%c0_6, %c0_7] : memref<25x48xf32, #tpu.memory_space<vmem>>, vector<25x48xf32>
    %cst_8 = arith.constant dense<0.000000e+00> : vector<32x48xf32>
    %9 = tpu.matmul %7, %8, %cst_8 {dimension_numbers = #tpu.dot_dimension_numbers<[1], [0], [0], [1], [0, 0, 1, 1], [], []>} : vector<32x25xf32>, vector<25x48xf32>, vector<32x48xf32> -> vector<32x48xf32>
    %c0_9 = arith.constant 0 : index
    %c0_10 = arith.constant 0 : index
    %10 = vector.load %arg5[%c0_9, %c0_10] : memref<1x48xf32, #tpu.memory_space<vmem>>, vector<1x48xf32>
    %11 = vector.broadcast %10 : vector<1x48xf32> to vector<32x48xf32>
    %12 = arith.addf %9, %11 : vector<32x48xf32>
    %c0_11 = arith.constant 0 : index
    %c0_12 = arith.constant 0 : index
    %13 = vector.load %arg1[%c0_11, %c0_12] : memref<32x32xf32, #tpu.memory_space<vmem>>, vector<32x32xf32>
    %c0_13 = arith.constant 0 : index
    %c0_14 = arith.constant 0 : index
    %c0_15 = arith.constant 0 : index
    %14 = vector.load %arg6[%c0_13, %c0_14, %c0_15] : memref<2x1x48xf32, #tpu.memory_space<vmem>>, vector<1x1x48xf32>
    %15 = vector.shape_cast %14 : vector<1x1x48xf32> to vector<1x48xf32>
    %c0_16 = arith.constant 0 : index
    %c0_17 = arith.constant 0 : index
    %c0_18 = arith.constant 0 : index
    %16 = vector.load %arg7[%c0_16, %c0_17, %c0_18] : memref<2x1x48xf32, #tpu.memory_space<vmem>>, vector<1x1x48xf32>
    %17 = vector.shape_cast %16 : vector<1x1x48xf32> to vector<1x48xf32>
    %cst_19 = arith.constant dense<0.000000e+00> : vector<32xf32>
    %18 = vector.multi_reduction <add>, %12, %cst_19 [1] : vector<32x48xf32> to vector<32xf32>
    %19 = vector.shape_cast %18 : vector<32xf32> to vector<32x1xf32>
    %cst_20 = arith.constant 4.800000e+01 : f32
    %20 = vector.broadcast %cst_20 : f32 to vector<32x1xf32>
    %21 = arith.divf %19, %20 : vector<32x1xf32>
    %22 = vector.broadcast %21 : vector<32x1xf32> to vector<32x48xf32>
    %23 = arith.subf %12, %22 : vector<32x48xf32>
    %24 = arith.mulf %23, %23 : vector<32x48xf32>
    %cst_21 = arith.constant dense<0.000000e+00> : vector<32xf32>
    %25 = vector.multi_reduction <add>, %24, %cst_21 [1] : vector<32x48xf32> to vector<32xf32>
    %26 = vector.shape_cast %25 : vector<32xf32> to vector<32x1xf32>
    %cst_22 = arith.constant 4.800000e+01 : f32
    %27 = vector.broadcast %cst_22 : f32 to vector<32x1xf32>
    %28 = arith.divf %26, %27 : vector<32x1xf32>
    %29 = vector.broadcast %21 : vector<32x1xf32> to vector<32x48xf32>
    %30 = arith.subf %12, %29 : vector<32x48xf32>
    %cst_23 = arith.constant 9.99999974E-6 : f32
    %31 = vector.broadcast %cst_23 : f32 to vector<32x1xf32>
    %32 = arith.addf %28, %31 : vector<32x1xf32>
    %33 = math.rsqrt %32 : vector<32x1xf32>
    %34 = vector.broadcast %33 : vector<32x1xf32> to vector<32x48xf32>
    %35 = arith.mulf %30, %34 : vector<32x48xf32>
    %36 = vector.broadcast %15 : vector<1x48xf32> to vector<32x48xf32>
    %37 = arith.mulf %35, %36 : vector<32x48xf32>
    %38 = vector.broadcast %17 : vector<1x48xf32> to vector<32x48xf32>
    %39 = arith.addf %37, %38 : vector<32x48xf32>
    %c0_24 = arith.constant 0 : index
    %c0_25 = arith.constant 0 : index
    %c0_26 = arith.constant 0 : index
    %40 = vector.load %arg8[%c0_24, %c0_25, %c0_26] : memref<2x48x144xf32, #tpu.memory_space<vmem>>, vector<1x48x144xf32>
    %41 = vector.shape_cast %40 : vector<1x48x144xf32> to vector<48x144xf32>
    %cst_27 = arith.constant dense<0.000000e+00> : vector<32x144xf32>
    %42 = tpu.matmul %39, %41, %cst_27 {dimension_numbers = #tpu.dot_dimension_numbers<[1], [0], [0], [1], [0, 0, 1, 1], [], []>} : vector<32x48xf32>, vector<48x144xf32>, vector<32x144xf32> -> vector<32x144xf32>
    %43 = vector.extract_strided_slice %42 {offsets = [0, 0], sizes = [32, 16], strides = [1, 1]} : vector<32x144xf32> to vector<32x16xf32>
    %44 = vector.extract_strided_slice %42 {offsets = [0, 48], sizes = [32, 16], strides = [1, 1]} : vector<32x144xf32> to vector<32x16xf32>
    %45 = vector.extract_strided_slice %42 {offsets = [0, 96], sizes = [32, 16], strides = [1, 1]} : vector<32x144xf32> to vector<32x16xf32>
    %cst_28 = arith.constant dense<0.000000e+00> : vector<32x32xf32>
    %46 = tpu.matmul %43, %44, %cst_28 {dimension_numbers = #tpu.dot_dimension_numbers<[1], [1], [0], [0], [0, 0, 1, 0], [], []>} : vector<32x16xf32>, vector<32x16xf32>, vector<32x32xf32> -> vector<32x32xf32>
    %cst_29 = arith.constant 2.500000e-01 : f32
    %47 = vector.broadcast %cst_29 : f32 to vector<32x32xf32>
    %48 = arith.mulf %46, %47 : vector<32x32xf32>
    %49 = arith.addf %48, %13 : vector<32x32xf32>
    %cst_30 = arith.constant dense<0xFF800000> : vector<32xf32>
    %50 = vector.multi_reduction <maximumf>, %49, %cst_30 [1] : vector<32x32xf32> to vector<32xf32>
    %51 = vector.shape_cast %50 : vector<32xf32> to vector<32x1xf32>
    %52 = vector.broadcast %51 : vector<32x1xf32> to vector<32x32xf32>
    %53 = arith.subf %49, %52 : vector<32x32xf32>
    %54 = math.exp %53 : vector<32x32xf32>
    %cst_31 = arith.constant dense<0.000000e+00> : vector<32xf32>
    %55 = vector.multi_reduction <add>, %54, %cst_31 [1] : vector<32x32xf32> to vector<32xf32>
    %56 = vector.shape_cast %55 : vector<32xf32> to vector<32x1xf32>
    %57 = vector.broadcast %56 : vector<32x1xf32> to vector<32x32xf32>
    %58 = arith.divf %54, %57 : vector<32x32xf32>
    %cst_32 = arith.constant dense<0.000000e+00> : vector<32x16xf32>
    %59 = tpu.matmul %58, %45, %cst_32 {dimension_numbers = #tpu.dot_dimension_numbers<[1], [0], [0], [1], [0, 0, 1, 1], [], []>} : vector<32x32xf32>, vector<32x16xf32>, vector<32x16xf32> -> vector<32x16xf32>
    %c0_33 = arith.constant 0 : index
    %c0_34 = arith.constant 0 : index
    %60 = vector.load %arg27[%c0_33, %c0_34] : memref<32x48xf32, #tpu.memory_space<vmem>>, vector<32x16xf32>
    tpu.vector_store %arg27[%c0_33, %c0_34], %59 {strides = array<i32>} : memref<32x48xf32, #tpu.memory_space<vmem>>, vector<32x16xf32>,
    %61 = vector.extract_strided_slice %42 {offsets = [0, 16], sizes = [32, 16], strides = [1, 1]} : vector<32x144xf32> to vector<32x16xf32>
    %62 = vector.extract_strided_slice %42 {offsets = [0, 64], sizes = [32, 16], strides = [1, 1]} : vector<32x144xf32> to vector<32x16xf32>
    %63 = vector.extract_strided_slice %42 {offsets = [0, 112], sizes = [32, 16], strides = [1, 1]} : vector<32x144xf32> to vector<32x16xf32>
    %cst_35 = arith.constant dense<0.000000e+00> : vector<32x32xf32>
    %64 = tpu.matmul %61, %62, %cst_35 {dimension_numbers = #tpu.dot_dimension_numbers<[1], [1], [0], [0], [0, 0, 1, 0], [], []>} : vector<32x16xf32>, vector<32x16xf32>, vector<32x32xf32> -> vector<32x32xf32>
    %cst_36 = arith.constant 2.500000e-01 : f32
    %65 = vector.broadcast %cst_36 : f32 to vector<32x32xf32>
    %66 = arith.mulf %64, %65 : vector<32x32xf32>
    %67 = arith.addf %66, %13 : vector<32x32xf32>
    %cst_37 = arith.constant dense<0xFF800000> : vector<32xf32>
    %68 = vector.multi_reduction <maximumf>, %67, %cst_37 [1] : vector<32x32xf32> to vector<32xf32>
    %69 = vector.shape_cast %68 : vector<32xf32> to vector<32x1xf32>
    %70 = vector.broadcast %69 : vector<32x1xf32> to vector<32x32xf32>
    %71 = arith.subf %67, %70 : vector<32x32xf32>
    %72 = math.exp %71 : vector<32x32xf32>
    %cst_38 = arith.constant dense<0.000000e+00> : vector<32xf32>
    %73 = vector.multi_reduction <add>, %72, %cst_38 [1] : vector<32x32xf32> to vector<32xf32>
    %74 = vector.shape_cast %73 : vector<32xf32> to vector<32x1xf32>
    %75 = vector.broadcast %74 : vector<32x1xf32> to vector<32x32xf32>
    %76 = arith.divf %72, %75 : vector<32x32xf32>
    %cst_39 = arith.constant dense<0.000000e+00> : vector<32x16xf32>
    %77 = tpu.matmul %76, %63, %cst_39 {dimension_numbers = #tpu.dot_dimension_numbers<[1], [0], [0], [1], [0, 0, 1, 1], [], []>} : vector<32x32xf32>, vector<32x16xf32>, vector<32x16xf32> -> vector<32x16xf32>
    %c0_40 = arith.constant 0 : index
    %c16 = arith.constant 16 : index
    %78 = vector.load %arg27[%c0_40, %c16] : memref<32x48xf32, #tpu.memory_space<vmem>>, vector<32x16xf32>
    tpu.vector_store %arg27[%c0_40, %c16], %77 {strides = array<i32>} : memref<32x48xf32, #tpu.memory_space<vmem>>, vector<32x16xf32>,
    %79 = vector.extract_strided_slice %42 {offsets = [0, 32], sizes = [32, 16], strides = [1, 1]} : vector<32x144xf32> to vector<32x16xf32>
    %80 = vector.extract_strided_slice %42 {offsets = [0, 80], sizes = [32, 16], strides = [1, 1]} : vector<32x144xf32> to vector<32x16xf32>
    %81 = vector.extract_strided_slice %42 {offsets = [0, 128], sizes = [32, 16], strides = [1, 1]} : vector<32x144xf32> to vector<32x16xf32>
    %cst_41 = arith.constant dense<0.000000e+00> : vector<32x32xf32>
    %82 = tpu.matmul %79, %80, %cst_41 {dimension_numbers = #tpu.dot_dimension_numbers<[1], [1], [0], [0], [0, 0, 1, 0], [], []>} : vector<32x16xf32>, vector<32x16xf32>, vector<32x32xf32> -> vector<32x32xf32>
    %cst_42 = arith.constant 2.500000e-01 : f32
    %83 = vector.broadcast %cst_42 : f32 to vector<32x32xf32>
    %84 = arith.mulf %82, %83 : vector<32x32xf32>
    %85 = arith.addf %84, %13 : vector<32x32xf32>
    %cst_43 = arith.constant dense<0xFF800000> : vector<32xf32>
    %86 = vector.multi_reduction <maximumf>, %85, %cst_43 [1] : vector<32x32xf32> to vector<32xf32>
    %87 = vector.shape_cast %86 : vector<32xf32> to vector<32x1xf32>
    %88 = vector.broadcast %87 : vector<32x1xf32> to vector<32x32xf32>
    %89 = arith.subf %85, %88 : vector<32x32xf32>
    %90 = math.exp %89 : vector<32x32xf32>
    %cst_44 = arith.constant dense<0.000000e+00> : vector<32xf32>
    %91 = vector.multi_reduction <add>, %90, %cst_44 [1] : vector<32x32xf32> to vector<32xf32>
    %92 = vector.shape_cast %91 : vector<32xf32> to vector<32x1xf32>
    %93 = vector.broadcast %92 : vector<32x1xf32> to vector<32x32xf32>
    %94 = arith.divf %90, %93 : vector<32x32xf32>
    %cst_45 = arith.constant dense<0.000000e+00> : vector<32x16xf32>
    %95 = tpu.matmul %94, %81, %cst_45 {dimension_numbers = #tpu.dot_dimension_numbers<[1], [0], [0], [1], [0, 0, 1, 1], [], []>} : vector<32x32xf32>, vector<32x16xf32>, vector<32x16xf32> -> vector<32x16xf32>
    %c0_46 = arith.constant 0 : index
    %c32 = arith.constant 32 : index
    %96 = vector.load %arg27[%c0_46, %c32] : memref<32x48xf32, #tpu.memory_space<vmem>>, vector<32x16xf32>
    tpu.vector_store %arg27[%c0_46, %c32], %95 {strides = array<i32>} : memref<32x48xf32, #tpu.memory_space<vmem>>, vector<32x16xf32>,
    %c0_47 = arith.constant 0 : index
    %c0_48 = arith.constant 0 : index
    %97 = vector.load %arg27[%c0_47, %c0_48] : memref<32x48xf32, #tpu.memory_space<vmem>>, vector<32x48xf32>
    %c0_49 = arith.constant 0 : index
    %c0_50 = arith.constant 0 : index
    %c0_51 = arith.constant 0 : index
    %98 = vector.load %arg9[%c0_49, %c0_50, %c0_51] : memref<2x48x48xf32, #tpu.memory_space<vmem>>, vector<1x48x48xf32>
    %99 = vector.shape_cast %98 : vector<1x48x48xf32> to vector<48x48xf32>
    %cst_52 = arith.constant dense<0.000000e+00> : vector<32x48xf32>
    %100 = tpu.matmul %97, %99, %cst_52 {dimension_numbers = #tpu.dot_dimension_numbers<[1], [0], [0], [1], [0, 0, 1, 1], [], []>} : vector<32x48xf32>, vector<48x48xf32>, vector<32x48xf32> -> vector<32x48xf32>
    %c0_53 = arith.constant 0 : index
    %c0_54 = arith.constant 0 : index
    %c0_55 = arith.constant 0 : index
    %101 = vector.load %arg10[%c0_53, %c0_54, %c0_55] : memref<2x1x48xf32, #tpu.memory_space<vmem>>, vector<1x1x48xf32>
    %102 = vector.shape_cast %101 : vector<1x1x48xf32> to vector<1x48xf32>
    %103 = vector.broadcast %102 : vector<1x48xf32> to vector<32x48xf32>
    %104 = arith.addf %100, %103 : vector<32x48xf32>
    %c0_56 = arith.constant 0 : index
    %c0_57 = arith.constant 0 : index
    %c0_58 = arith.constant 0 : index
    %105 = vector.load %arg11[%c0_56, %c0_57, %c0_58] : memref<2x1x48xf32, #tpu.memory_space<vmem>>, vector<1x1x48xf32>
    %106 = vector.shape_cast %105 : vector<1x1x48xf32> to vector<1x48xf32>
    %c0_59 = arith.constant 0 : index
    %c0_60 = arith.constant 0 : index
    %c0_61 = arith.constant 0 : index
    %107 = vector.load %arg12[%c0_59, %c0_60, %c0_61] : memref<2x1x48xf32, #tpu.memory_space<vmem>>, vector<1x1x48xf32>
    %108 = vector.shape_cast %107 : vector<1x1x48xf32> to vector<1x48xf32>
    %cst_62 = arith.constant dense<0.000000e+00> : vector<32xf32>
    %109 = vector.multi_reduction <add>, %104, %cst_62 [1] : vector<32x48xf32> to vector<32xf32>
    %110 = vector.shape_cast %109 : vector<32xf32> to vector<32x1xf32>
    %cst_63 = arith.constant 4.800000e+01 : f32
    %111 = vector.broadcast %cst_63 : f32 to vector<32x1xf32>
    %112 = arith.divf %110, %111 : vector<32x1xf32>
    %113 = vector.broadcast %112 : vector<32x1xf32> to vector<32x48xf32>
    %114 = arith.subf %104, %113 : vector<32x48xf32>
    %115 = arith.mulf %114, %114 : vector<32x48xf32>
    %cst_64 = arith.constant dense<0.000000e+00> : vector<32xf32>
    %116 = vector.multi_reduction <add>, %115, %cst_64 [1] : vector<32x48xf32> to vector<32xf32>
    %117 = vector.shape_cast %116 : vector<32xf32> to vector<32x1xf32>
    %cst_65 = arith.constant 4.800000e+01 : f32
    %118 = vector.broadcast %cst_65 : f32 to vector<32x1xf32>
    %119 = arith.divf %117, %118 : vector<32x1xf32>
    %120 = vector.broadcast %112 : vector<32x1xf32> to vector<32x48xf32>
    %121 = arith.subf %104, %120 : vector<32x48xf32>
    %cst_66 = arith.constant 9.99999974E-6 : f32
    %122 = vector.broadcast %cst_66 : f32 to vector<32x1xf32>
    %123 = arith.addf %119, %122 : vector<32x1xf32>
    %124 = math.rsqrt %123 : vector<32x1xf32>
    %125 = vector.broadcast %124 : vector<32x1xf32> to vector<32x48xf32>
    %126 = arith.mulf %121, %125 : vector<32x48xf32>
    %127 = vector.broadcast %106 : vector<1x48xf32> to vector<32x48xf32>
    %128 = arith.mulf %126, %127 : vector<32x48xf32>
    %129 = vector.broadcast %108 : vector<1x48xf32> to vector<32x48xf32>
    %130 = arith.addf %128, %129 : vector<32x48xf32>
    %131 = arith.addf %12, %130 : vector<32x48xf32>
    %c0_67 = arith.constant 0 : index
    %c0_68 = arith.constant 0 : index
    %c0_69 = arith.constant 0 : index
    %132 = vector.load %arg13[%c0_67, %c0_68, %c0_69] : memref<2x1x48xf32, #tpu.memory_space<vmem>>, vector<1x1x48xf32>
    %133 = vector.shape_cast %132 : vector<1x1x48xf32> to vector<1x48xf32>
    %c0_70 = arith.constant 0 : index
    %c0_71 = arith.constant 0 : index
    %c0_72 = arith.constant 0 : index
    %134 = vector.load %arg14[%c0_70, %c0_71, %c0_72] : memref<2x1x48xf32, #tpu.memory_space<vmem>>, vector<1x1x48xf32>
    %135 = vector.shape_cast %134 : vector<1x1x48xf32> to vector<1x48xf32>
    %cst_73 = arith.constant dense<0.000000e+00> : vector<32xf32>
    %136 = vector.multi_reduction <add>, %131, %cst_73 [1] : vector<32x48xf32> to vector<32xf32>
    %137 = vector.shape_cast %136 : vector<32xf32> to vector<32x1xf32>
    %cst_74 = arith.constant 4.800000e+01 : f32
    %138 = vector.broadcast %cst_74 : f32 to vector<32x1xf32>
    %139 = arith.divf %137, %138 : vector<32x1xf32>
    %140 = vector.broadcast %139 : vector<32x1xf32> to vector<32x48xf32>
    %141 = arith.subf %131, %140 : vector<32x48xf32>
    %142 = arith.mulf %141, %141 : vector<32x48xf32>
    %cst_75 = arith.constant dense<0.000000e+00> : vector<32xf32>
    %143 = vector.multi_reduction <add>, %142, %cst_75 [1] : vector<32x48xf32> to vector<32xf32>
    %144 = vector.shape_cast %143 : vector<32xf32> to vector<32x1xf32>
    %cst_76 = arith.constant 4.800000e+01 : f32
    %145 = vector.broadcast %cst_76 : f32 to vector<32x1xf32>
    %146 = arith.divf %144, %145 : vector<32x1xf32>
    %147 = vector.broadcast %139 : vector<32x1xf32> to vector<32x48xf32>
    %148 = arith.subf %131, %147 : vector<32x48xf32>
    %cst_77 = arith.constant 9.99999974E-6 : f32
    %149 = vector.broadcast %cst_77 : f32 to vector<32x1xf32>
    %150 = arith.addf %146, %149 : vector<32x1xf32>
    %151 = math.rsqrt %150 : vector<32x1xf32>
    %152 = vector.broadcast %151 : vector<32x1xf32> to vector<32x48xf32>
    %153 = arith.mulf %148, %152 : vector<32x48xf32>
    %154 = vector.broadcast %133 : vector<1x48xf32> to vector<32x48xf32>
    %155 = arith.mulf %153, %154 : vector<32x48xf32>
    %156 = vector.broadcast %135 : vector<1x48xf32> to vector<32x48xf32>
    %157 = arith.addf %155, %156 : vector<32x48xf32>
    %c0_78 = arith.constant 0 : index
    %c0_79 = arith.constant 0 : index
    %c0_80 = arith.constant 0 : index
    %158 = vector.load %arg15[%c0_78, %c0_79, %c0_80] : memref<2x48x64xf32, #tpu.memory_space<vmem>>, vector<1x48x64xf32>
    %159 = vector.shape_cast %158 : vector<1x48x64xf32> to vector<48x64xf32>
    %cst_81 = arith.constant dense<0.000000e+00> : vector<32x64xf32>
    %160 = tpu.matmul %157, %159, %cst_81 {dimension_numbers = #tpu.dot_dimension_numbers<[1], [0], [0], [1], [0, 0, 1, 1], [], []>} : vector<32x48xf32>, vector<48x64xf32>, vector<32x64xf32> -> vector<32x64xf32>
    %c0_82 = arith.constant 0 : index
    %c0_83 = arith.constant 0 : index
    %c0_84 = arith.constant 0 : index
    %161 = vector.load %arg16[%c0_82, %c0_83, %c0_84] : memref<2x1x64xf32, #tpu.memory_space<vmem>>, vector<1x1x64xf32>
    %162 = vector.shape_cast %161 : vector<1x1x64xf32> to vector<1x64xf32>
    %163 = vector.broadcast %162 : vector<1x64xf32> to vector<32x64xf32>
    %164 = arith.addf %160, %163 : vector<32x64xf32>
    %cst_85 = arith.constant 0.000000e+00 : f32
    %165 = vector.broadcast %cst_85 : f32 to vector<32x64xf32>
    %166 = arith.maximumf %164, %165 : vector<32x64xf32>
    %c0_86 = arith.constant 0 : index
    %c0_87 = arith.constant 0 : index
    %c0_88 = arith.constant 0 : index
    %167 = vector.load %arg17[%c0_86, %c0_87, %c0_88] : memref<2x1x64xf32, #tpu.memory_space<vmem>>, vector<1x1x64xf32>
    %168 = vector.shape_cast %167 : vector<1x1x64xf32> to vector<1x64xf32>
    %c0_89 = arith.constant 0 : index
    %c0_90 = arith.constant 0 : index
    %c0_91 = arith.constant 0 : index
    %169 = vector.load %arg18[%c0_89, %c0_90, %c0_91] : memref<2x1x64xf32, #tpu.memory_space<vmem>>, vector<1x1x64xf32>
    %170 = vector.shape_cast %169 : vector<1x1x64xf32> to vector<1x64xf32>
    %cst_92 = arith.constant dense<0.000000e+00> : vector<32xf32>
    %171 = vector.multi_reduction <add>, %166, %cst_92 [1] : vector<32x64xf32> to vector<32xf32>
    %172 = vector.shape_cast %171 : vector<32xf32> to vector<32x1xf32>
    %cst_93 = arith.constant 6.400000e+01 : f32
    %173 = vector.broadcast %cst_93 : f32 to vector<32x1xf32>
    %174 = arith.divf %172, %173 : vector<32x1xf32>
    %175 = vector.broadcast %174 : vector<32x1xf32> to vector<32x64xf32>
    %176 = arith.subf %166, %175 : vector<32x64xf32>
    %177 = arith.mulf %176, %176 : vector<32x64xf32>
    %cst_94 = arith.constant dense<0.000000e+00> : vector<32xf32>
    %178 = vector.multi_reduction <add>, %177, %cst_94 [1] : vector<32x64xf32> to vector<32xf32>
    %179 = vector.shape_cast %178 : vector<32xf32> to vector<32x1xf32>
    %cst_95 = arith.constant 6.400000e+01 : f32
    %180 = vector.broadcast %cst_95 : f32 to vector<32x1xf32>
    %181 = arith.divf %179, %180 : vector<32x1xf32>
    %182 = vector.broadcast %174 : vector<32x1xf32> to vector<32x64xf32>
    %183 = arith.subf %166, %182 : vector<32x64xf32>
    %cst_96 = arith.constant 9.99999974E-6 : f32
    %184 = vector.broadcast %cst_96 : f32 to vector<32x1xf32>
    %185 = arith.addf %181, %184 : vector<32x1xf32>
    %186 = math.rsqrt %185 : vector<32x1xf32>
    %187 = vector.broadcast %186 : vector<32x1xf32> to vector<32x64xf32>
    %188 = arith.mulf %183, %187 : vector<32x64xf32>
    %189 = vector.broadcast %168 : vector<1x64xf32> to vector<32x64xf32>
    %190 = arith.mulf %188, %189 : vector<32x64xf32>
    %191 = vector.broadcast %170 : vector<1x64xf32> to vector<32x64xf32>
    %192 = arith.addf %190, %191 : vector<32x64xf32>
    %c0_97 = arith.constant 0 : index
    %c0_98 = arith.constant 0 : index
    %c0_99 = arith.constant 0 : index
    %193 = vector.load %arg19[%c0_97, %c0_98, %c0_99] : memref<2x64x48xf32, #tpu.memory_space<vmem>>, vector<1x64x48xf32>
    %194 = vector.shape_cast %193 : vector<1x64x48xf32> to vector<64x48xf32>
    %cst_100 = arith.constant dense<0.000000e+00> : vector<32x48xf32>
    %195 = tpu.matmul %192, %194, %cst_100 {dimension_numbers = #tpu.dot_dimension_numbers<[1], [0], [0], [1], [0, 0, 1, 1], [], []>} : vector<32x64xf32>, vector<64x48xf32>, vector<32x48xf32> -> vector<32x48xf32>
    %c0_101 = arith.constant 0 : index
    %c0_102 = arith.constant 0 : index
    %c0_103 = arith.constant 0 : index
    %196 = vector.load %arg20[%c0_101, %c0_102, %c0_103] : memref<2x1x48xf32, #tpu.memory_space<vmem>>, vector<1x1x48xf32>
    %197 = vector.shape_cast %196 : vector<1x1x48xf32> to vector<1x48xf32>
    %198 = vector.broadcast %197 : vector<1x48xf32> to vector<32x48xf32>
    %199 = arith.addf %195, %198 : vector<32x48xf32>
    %200 = arith.addf %131, %199 : vector<32x48xf32>
    %c1 = arith.constant 1 : index
    %c0_104 = arith.constant 0 : index
    %c0_105 = arith.constant 0 : index
    %201 = vector.load %arg6[%c1, %c0_104, %c0_105] : memref<2x1x48xf32, #tpu.memory_space<vmem>>, vector<1x1x48xf32>
    %202 = vector.shape_cast %201 : vector<1x1x48xf32> to vector<1x48xf32>
    %c1_106 = arith.constant 1 : index
    %c0_107 = arith.constant 0 : index
    %c0_108 = arith.constant 0 : index
    %203 = vector.load %arg7[%c1_106, %c0_107, %c0_108] : memref<2x1x48xf32, #tpu.memory_space<vmem>>, vector<1x1x48xf32>
    %204 = vector.shape_cast %203 : vector<1x1x48xf32> to vector<1x48xf32>
    %cst_109 = arith.constant dense<0.000000e+00> : vector<32xf32>
    %205 = vector.multi_reduction <add>, %200, %cst_109 [1] : vector<32x48xf32> to vector<32xf32>
    %206 = vector.shape_cast %205 : vector<32xf32> to vector<32x1xf32>
    %cst_110 = arith.constant 4.800000e+01 : f32
    %207 = vector.broadcast %cst_110 : f32 to vector<32x1xf32>
    %208 = arith.divf %206, %207 : vector<32x1xf32>
    %209 = vector.broadcast %208 : vector<32x1xf32> to vector<32x48xf32>
    %210 = arith.subf %200, %209 : vector<32x48xf32>
    %211 = arith.mulf %210, %210 : vector<32x48xf32>
    %cst_111 = arith.constant dense<0.000000e+00> : vector<32xf32>
    %212 = vector.multi_reduction <add>, %211, %cst_111 [1] : vector<32x48xf32> to vector<32xf32>
    %213 = vector.shape_cast %212 : vector<32xf32> to vector<32x1xf32>
    %cst_112 = arith.constant 4.800000e+01 : f32
    %214 = vector.broadcast %cst_112 : f32 to vector<32x1xf32>
    %215 = arith.divf %213, %214 : vector<32x1xf32>
    %216 = vector.broadcast %208 : vector<32x1xf32> to vector<32x48xf32>
    %217 = arith.subf %200, %216 : vector<32x48xf32>
    %cst_113 = arith.constant 9.99999974E-6 : f32
    %218 = vector.broadcast %cst_113 : f32 to vector<32x1xf32>
    %219 = arith.addf %215, %218 : vector<32x1xf32>
    %220 = math.rsqrt %219 : vector<32x1xf32>
    %221 = vector.broadcast %220 : vector<32x1xf32> to vector<32x48xf32>
    %222 = arith.mulf %217, %221 : vector<32x48xf32>
    %223 = vector.broadcast %202 : vector<1x48xf32> to vector<32x48xf32>
    %224 = arith.mulf %222, %223 : vector<32x48xf32>
    %225 = vector.broadcast %204 : vector<1x48xf32> to vector<32x48xf32>
    %226 = arith.addf %224, %225 : vector<32x48xf32>
    %c1_114 = arith.constant 1 : index
    %c0_115 = arith.constant 0 : index
    %c0_116 = arith.constant 0 : index
    %227 = vector.load %arg8[%c1_114, %c0_115, %c0_116] : memref<2x48x144xf32, #tpu.memory_space<vmem>>, vector<1x48x144xf32>
    %228 = vector.shape_cast %227 : vector<1x48x144xf32> to vector<48x144xf32>
    %cst_117 = arith.constant dense<0.000000e+00> : vector<32x144xf32>
    %229 = tpu.matmul %226, %228, %cst_117 {dimension_numbers = #tpu.dot_dimension_numbers<[1], [0], [0], [1], [0, 0, 1, 1], [], []>} : vector<32x48xf32>, vector<48x144xf32>, vector<32x144xf32> -> vector<32x144xf32>
    %230 = vector.extract_strided_slice %229 {offsets = [0, 0], sizes = [32, 16], strides = [1, 1]} : vector<32x144xf32> to vector<32x16xf32>
    %231 = vector.extract_strided_slice %229 {offsets = [0, 48], sizes = [32, 16], strides = [1, 1]} : vector<32x144xf32> to vector<32x16xf32>
    %232 = vector.extract_strided_slice %229 {offsets = [0, 96], sizes = [32, 16], strides = [1, 1]} : vector<32x144xf32> to vector<32x16xf32>
    %cst_118 = arith.constant dense<0.000000e+00> : vector<32x32xf32>
    %233 = tpu.matmul %230, %231, %cst_118 {dimension_numbers = #tpu.dot_dimension_numbers<[1], [1], [0], [0], [0, 0, 1, 0], [], []>} : vector<32x16xf32>, vector<32x16xf32>, vector<32x32xf32> -> vector<32x32xf32>
    %cst_119 = arith.constant 2.500000e-01 : f32
    %234 = vector.broadcast %cst_119 : f32 to vector<32x32xf32>
    %235 = arith.mulf %233, %234 : vector<32x32xf32>
    %236 = arith.addf %235, %13 : vector<32x32xf32>
    %cst_120 = arith.constant dense<0xFF800000> : vector<32xf32>
    %237 = vector.multi_reduction <maximumf>, %236, %cst_120 [1] : vector<32x32xf32> to vector<32xf32>
    %238 = vector.shape_cast %237 : vector<32xf32> to vector<32x1xf32>
    %239 = vector.broadcast %238 : vector<32x1xf32> to vector<32x32xf32>
    %240 = arith.subf %236, %239 : vector<32x32xf32>
    %241 = math.exp %240 : vector<32x32xf32>
    %cst_121 = arith.constant dense<0.000000e+00> : vector<32xf32>
    %242 = vector.multi_reduction <add>, %241, %cst_121 [1] : vector<32x32xf32> to vector<32xf32>
    %243 = vector.shape_cast %242 : vector<32xf32> to vector<32x1xf32>
    %244 = vector.broadcast %243 : vector<32x1xf32> to vector<32x32xf32>
    %245 = arith.divf %241, %244 : vector<32x32xf32>
    %cst_122 = arith.constant dense<0.000000e+00> : vector<32x16xf32>
    %246 = tpu.matmul %245, %232, %cst_122 {dimension_numbers = #tpu.dot_dimension_numbers<[1], [0], [0], [1], [0, 0, 1, 1], [], []>} : vector<32x32xf32>, vector<32x16xf32>, vector<32x16xf32> -> vector<32x16xf32>
    %c0_123 = arith.constant 0 : index
    %c0_124 = arith.constant 0 : index
    %247 = vector.load %arg27[%c0_123, %c0_124] : memref<32x48xf32, #tpu.memory_space<vmem>>, vector<32x16xf32>
    tpu.vector_store %arg27[%c0_123, %c0_124], %246 {strides = array<i32>} : memref<32x48xf32, #tpu.memory_space<vmem>>, vector<32x16xf32>,
    %248 = vector.extract_strided_slice %229 {offsets = [0, 16], sizes = [32, 16], strides = [1, 1]} : vector<32x144xf32> to vector<32x16xf32>
    %249 = vector.extract_strided_slice %229 {offsets = [0, 64], sizes = [32, 16], strides = [1, 1]} : vector<32x144xf32> to vector<32x16xf32>
    %250 = vector.extract_strided_slice %229 {offsets = [0, 112], sizes = [32, 16], strides = [1, 1]} : vector<32x144xf32> to vector<32x16xf32>
    %cst_125 = arith.constant dense<0.000000e+00> : vector<32x32xf32>
    %251 = tpu.matmul %248, %249, %cst_125 {dimension_numbers = #tpu.dot_dimension_numbers<[1], [1], [0], [0], [0, 0, 1, 0], [], []>} : vector<32x16xf32>, vector<32x16xf32>, vector<32x32xf32> -> vector<32x32xf32>
    %cst_126 = arith.constant 2.500000e-01 : f32
    %252 = vector.broadcast %cst_126 : f32 to vector<32x32xf32>
    %253 = arith.mulf %251, %252 : vector<32x32xf32>
    %254 = arith.addf %253, %13 : vector<32x32xf32>
    %cst_127 = arith.constant dense<0xFF800000> : vector<32xf32>
    %255 = vector.multi_reduction <maximumf>, %254, %cst_127 [1] : vector<32x32xf32> to vector<32xf32>
    %256 = vector.shape_cast %255 : vector<32xf32> to vector<32x1xf32>
    %257 = vector.broadcast %256 : vector<32x1xf32> to vector<32x32xf32>
    %258 = arith.subf %254, %257 : vector<32x32xf32>
    %259 = math.exp %258 : vector<32x32xf32>
    %cst_128 = arith.constant dense<0.000000e+00> : vector<32xf32>
    %260 = vector.multi_reduction <add>, %259, %cst_128 [1] : vector<32x32xf32> to vector<32xf32>
    %261 = vector.shape_cast %260 : vector<32xf32> to vector<32x1xf32>
    %262 = vector.broadcast %261 : vector<32x1xf32> to vector<32x32xf32>
    %263 = arith.divf %259, %262 : vector<32x32xf32>
    %cst_129 = arith.constant dense<0.000000e+00> : vector<32x16xf32>
    %264 = tpu.matmul %263, %250, %cst_129 {dimension_numbers = #tpu.dot_dimension_numbers<[1], [0], [0], [1], [0, 0, 1, 1], [], []>} : vector<32x32xf32>, vector<32x16xf32>, vector<32x16xf32> -> vector<32x16xf32>
    %c0_130 = arith.constant 0 : index
    %c16_131 = arith.constant 16 : index
    %265 = vector.load %arg27[%c0_130, %c16_131] : memref<32x48xf32, #tpu.memory_space<vmem>>, vector<32x16xf32>
    tpu.vector_store %arg27[%c0_130, %c16_131], %264 {strides = array<i32>} : memref<32x48xf32, #tpu.memory_space<vmem>>, vector<32x16xf32>,
    %266 = vector.extract_strided_slice %229 {offsets = [0, 32], sizes = [32, 16], strides = [1, 1]} : vector<32x144xf32> to vector<32x16xf32>
    %267 = vector.extract_strided_slice %229 {offsets = [0, 80], sizes = [32, 16], strides = [1, 1]} : vector<32x144xf32> to vector<32x16xf32>
    %268 = vector.extract_strided_slice %229 {offsets = [0, 128], sizes = [32, 16], strides = [1, 1]} : vector<32x144xf32> to vector<32x16xf32>
    %cst_132 = arith.constant dense<0.000000e+00> : vector<32x32xf32>
    %269 = tpu.matmul %266, %267, %cst_132 {dimension_numbers = #tpu.dot_dimension_numbers<[1], [1], [0], [0], [0, 0, 1, 0], [], []>} : vector<32x16xf32>, vector<32x16xf32>, vector<32x32xf32> -> vector<32x32xf32>
    %cst_133 = arith.constant 2.500000e-01 : f32
    %270 = vector.broadcast %cst_133 : f32 to vector<32x32xf32>
    %271 = arith.mulf %269, %270 : vector<32x32xf32>
    %272 = arith.addf %271, %13 : vector<32x32xf32>
    %cst_134 = arith.constant dense<0xFF800000> : vector<32xf32>
    %273 = vector.multi_reduction <maximumf>, %272, %cst_134 [1] : vector<32x32xf32> to vector<32xf32>
    %274 = vector.shape_cast %273 : vector<32xf32> to vector<32x1xf32>
    %275 = vector.broadcast %274 : vector<32x1xf32> to vector<32x32xf32>
    %276 = arith.subf %272, %275 : vector<32x32xf32>
    %277 = math.exp %276 : vector<32x32xf32>
    %cst_135 = arith.constant dense<0.000000e+00> : vector<32xf32>
    %278 = vector.multi_reduction <add>, %277, %cst_135 [1] : vector<32x32xf32> to vector<32xf32>
    %279 = vector.shape_cast %278 : vector<32xf32> to vector<32x1xf32>
    %280 = vector.broadcast %279 : vector<32x1xf32> to vector<32x32xf32>
    %281 = arith.divf %277, %280 : vector<32x32xf32>
    %cst_136 = arith.constant dense<0.000000e+00> : vector<32x16xf32>
    %282 = tpu.matmul %281, %268, %cst_136 {dimension_numbers = #tpu.dot_dimension_numbers<[1], [0], [0], [1], [0, 0, 1, 1], [], []>} : vector<32x32xf32>, vector<32x16xf32>, vector<32x16xf32> -> vector<32x16xf32>
    %c0_137 = arith.constant 0 : index
    %c32_138 = arith.constant 32 : index
    %283 = vector.load %arg27[%c0_137, %c32_138] : memref<32x48xf32, #tpu.memory_space<vmem>>, vector<32x16xf32>
    tpu.vector_store %arg27[%c0_137, %c32_138], %282 {strides = array<i32>} : memref<32x48xf32, #tpu.memory_space<vmem>>, vector<32x16xf32>,
    %c0_139 = arith.constant 0 : index
    %c0_140 = arith.constant 0 : index
    %284 = vector.load %arg27[%c0_139, %c0_140] : memref<32x48xf32, #tpu.memory_space<vmem>>, vector<32x48xf32>
    %c1_141 = arith.constant 1 : index
    %c0_142 = arith.constant 0 : index
    %c0_143 = arith.constant 0 : index
    %285 = vector.load %arg9[%c1_141, %c0_142, %c0_143] : memref<2x48x48xf32, #tpu.memory_space<vmem>>, vector<1x48x48xf32>
    %286 = vector.shape_cast %285 : vector<1x48x48xf32> to vector<48x48xf32>
    %cst_144 = arith.constant dense<0.000000e+00> : vector<32x48xf32>
    %287 = tpu.matmul %284, %286, %cst_144 {dimension_numbers = #tpu.dot_dimension_numbers<[1], [0], [0], [1], [0, 0, 1, 1], [], []>} : vector<32x48xf32>, vector<48x48xf32>, vector<32x48xf32> -> vector<32x48xf32>
    %c1_145 = arith.constant 1 : index
    %c0_146 = arith.constant 0 : index
    %c0_147 = arith.constant 0 : index
    %288 = vector.load %arg10[%c1_145, %c0_146, %c0_147] : memref<2x1x48xf32, #tpu.memory_space<vmem>>, vector<1x1x48xf32>
    %289 = vector.shape_cast %288 : vector<1x1x48xf32> to vector<1x48xf32>
    %290 = vector.broadcast %289 : vector<1x48xf32> to vector<32x48xf32>
    %291 = arith.addf %287, %290 : vector<32x48xf32>
    %c1_148 = arith.constant 1 : index
    %c0_149 = arith.constant 0 : index
    %c0_150 = arith.constant 0 : index
    %292 = vector.load %arg11[%c1_148, %c0_149, %c0_150] : memref<2x1x48xf32, #tpu.memory_space<vmem>>, vector<1x1x48xf32>
    %293 = vector.shape_cast %292 : vector<1x1x48xf32> to vector<1x48xf32>
    %c1_151 = arith.constant 1 : index
    %c0_152 = arith.constant 0 : index
    %c0_153 = arith.constant 0 : index
    %294 = vector.load %arg12[%c1_151, %c0_152, %c0_153] : memref<2x1x48xf32, #tpu.memory_space<vmem>>, vector<1x1x48xf32>
    %295 = vector.shape_cast %294 : vector<1x1x48xf32> to vector<1x48xf32>
    %cst_154 = arith.constant dense<0.000000e+00> : vector<32xf32>
    %296 = vector.multi_reduction <add>, %291, %cst_154 [1] : vector<32x48xf32> to vector<32xf32>
    %297 = vector.shape_cast %296 : vector<32xf32> to vector<32x1xf32>
    %cst_155 = arith.constant 4.800000e+01 : f32
    %298 = vector.broadcast %cst_155 : f32 to vector<32x1xf32>
    %299 = arith.divf %297, %298 : vector<32x1xf32>
    %300 = vector.broadcast %299 : vector<32x1xf32> to vector<32x48xf32>
    %301 = arith.subf %291, %300 : vector<32x48xf32>
    %302 = arith.mulf %301, %301 : vector<32x48xf32>
    %cst_156 = arith.constant dense<0.000000e+00> : vector<32xf32>
    %303 = vector.multi_reduction <add>, %302, %cst_156 [1] : vector<32x48xf32> to vector<32xf32>
    %304 = vector.shape_cast %303 : vector<32xf32> to vector<32x1xf32>
    %cst_157 = arith.constant 4.800000e+01 : f32
    %305 = vector.broadcast %cst_157 : f32 to vector<32x1xf32>
    %306 = arith.divf %304, %305 : vector<32x1xf32>
    %307 = vector.broadcast %299 : vector<32x1xf32> to vector<32x48xf32>
    %308 = arith.subf %291, %307 : vector<32x48xf32>
    %cst_158 = arith.constant 9.99999974E-6 : f32
    %309 = vector.broadcast %cst_158 : f32 to vector<32x1xf32>
    %310 = arith.addf %306, %309 : vector<32x1xf32>
    %311 = math.rsqrt %310 : vector<32x1xf32>
    %312 = vector.broadcast %311 : vector<32x1xf32> to vector<32x48xf32>
    %313 = arith.mulf %308, %312 : vector<32x48xf32>
    %314 = vector.broadcast %293 : vector<1x48xf32> to vector<32x48xf32>
    %315 = arith.mulf %313, %314 : vector<32x48xf32>
    %316 = vector.broadcast %295 : vector<1x48xf32> to vector<32x48xf32>
    %317 = arith.addf %315, %316 : vector<32x48xf32>
    %318 = arith.addf %200, %317 : vector<32x48xf32>
    %c1_159 = arith.constant 1 : index
    %c0_160 = arith.constant 0 : index
    %c0_161 = arith.constant 0 : index
    %319 = vector.load %arg13[%c1_159, %c0_160, %c0_161] : memref<2x1x48xf32, #tpu.memory_space<vmem>>, vector<1x1x48xf32>
    %320 = vector.shape_cast %319 : vector<1x1x48xf32> to vector<1x48xf32>
    %c1_162 = arith.constant 1 : index
    %c0_163 = arith.constant 0 : index
    %c0_164 = arith.constant 0 : index
    %321 = vector.load %arg14[%c1_162, %c0_163, %c0_164] : memref<2x1x48xf32, #tpu.memory_space<vmem>>, vector<1x1x48xf32>
    %322 = vector.shape_cast %321 : vector<1x1x48xf32> to vector<1x48xf32>
    %cst_165 = arith.constant dense<0.000000e+00> : vector<32xf32>
    %323 = vector.multi_reduction <add>, %318, %cst_165 [1] : vector<32x48xf32> to vector<32xf32>
    %324 = vector.shape_cast %323 : vector<32xf32> to vector<32x1xf32>
    %cst_166 = arith.constant 4.800000e+01 : f32
    %325 = vector.broadcast %cst_166 : f32 to vector<32x1xf32>
    %326 = arith.divf %324, %325 : vector<32x1xf32>
    %327 = vector.broadcast %326 : vector<32x1xf32> to vector<32x48xf32>
    %328 = arith.subf %318, %327 : vector<32x48xf32>
    %329 = arith.mulf %328, %328 : vector<32x48xf32>
    %cst_167 = arith.constant dense<0.000000e+00> : vector<32xf32>
    %330 = vector.multi_reduction <add>, %329, %cst_167 [1] : vector<32x48xf32> to vector<32xf32>
    %331 = vector.shape_cast %330 : vector<32xf32> to vector<32x1xf32>
    %cst_168 = arith.constant 4.800000e+01 : f32
    %332 = vector.broadcast %cst_168 : f32 to vector<32x1xf32>
    %333 = arith.divf %331, %332 : vector<32x1xf32>
    %334 = vector.broadcast %326 : vector<32x1xf32> to vector<32x48xf32>
    %335 = arith.subf %318, %334 : vector<32x48xf32>
    %cst_169 = arith.constant 9.99999974E-6 : f32
    %336 = vector.broadcast %cst_169 : f32 to vector<32x1xf32>
    %337 = arith.addf %333, %336 : vector<32x1xf32>
    %338 = math.rsqrt %337 : vector<32x1xf32>
    %339 = vector.broadcast %338 : vector<32x1xf32> to vector<32x48xf32>
    %340 = arith.mulf %335, %339 : vector<32x48xf32>
    %341 = vector.broadcast %320 : vector<1x48xf32> to vector<32x48xf32>
    %342 = arith.mulf %340, %341 : vector<32x48xf32>
    %343 = vector.broadcast %322 : vector<1x48xf32> to vector<32x48xf32>
    %344 = arith.addf %342, %343 : vector<32x48xf32>
    %c1_170 = arith.constant 1 : index
    %c0_171 = arith.constant 0 : index
    %c0_172 = arith.constant 0 : index
    %345 = vector.load %arg15[%c1_170, %c0_171, %c0_172] : memref<2x48x64xf32, #tpu.memory_space<vmem>>, vector<1x48x64xf32>
    %346 = vector.shape_cast %345 : vector<1x48x64xf32> to vector<48x64xf32>
    %cst_173 = arith.constant dense<0.000000e+00> : vector<32x64xf32>
    %347 = tpu.matmul %344, %346, %cst_173 {dimension_numbers = #tpu.dot_dimension_numbers<[1], [0], [0], [1], [0, 0, 1, 1], [], []>} : vector<32x48xf32>, vector<48x64xf32>, vector<32x64xf32> -> vector<32x64xf32>
    %c1_174 = arith.constant 1 : index
    %c0_175 = arith.constant 0 : index
    %c0_176 = arith.constant 0 : index
    %348 = vector.load %arg16[%c1_174, %c0_175, %c0_176] : memref<2x1x64xf32, #tpu.memory_space<vmem>>, vector<1x1x64xf32>
    %349 = vector.shape_cast %348 : vector<1x1x64xf32> to vector<1x64xf32>
    %350 = vector.broadcast %349 : vector<1x64xf32> to vector<32x64xf32>
    %351 = arith.addf %347, %350 : vector<32x64xf32>
    %cst_177 = arith.constant 0.000000e+00 : f32
    %352 = vector.broadcast %cst_177 : f32 to vector<32x64xf32>
    %353 = arith.maximumf %351, %352 : vector<32x64xf32>
    %c1_178 = arith.constant 1 : index
    %c0_179 = arith.constant 0 : index
    %c0_180 = arith.constant 0 : index
    %354 = vector.load %arg17[%c1_178, %c0_179, %c0_180] : memref<2x1x64xf32, #tpu.memory_space<vmem>>, vector<1x1x64xf32>
    %355 = vector.shape_cast %354 : vector<1x1x64xf32> to vector<1x64xf32>
    %c1_181 = arith.constant 1 : index
    %c0_182 = arith.constant 0 : index
    %c0_183 = arith.constant 0 : index
    %356 = vector.load %arg18[%c1_181, %c0_182, %c0_183] : memref<2x1x64xf32, #tpu.memory_space<vmem>>, vector<1x1x64xf32>
    %357 = vector.shape_cast %356 : vector<1x1x64xf32> to vector<1x64xf32>
    %cst_184 = arith.constant dense<0.000000e+00> : vector<32xf32>
    %358 = vector.multi_reduction <add>, %353, %cst_184 [1] : vector<32x64xf32> to vector<32xf32>
    %359 = vector.shape_cast %358 : vector<32xf32> to vector<32x1xf32>
    %cst_185 = arith.constant 6.400000e+01 : f32
    %360 = vector.broadcast %cst_185 : f32 to vector<32x1xf32>
    %361 = arith.divf %359, %360 : vector<32x1xf32>
    %362 = vector.broadcast %361 : vector<32x1xf32> to vector<32x64xf32>
    %363 = arith.subf %353, %362 : vector<32x64xf32>
    %364 = arith.mulf %363, %363 : vector<32x64xf32>
    %cst_186 = arith.constant dense<0.000000e+00> : vector<32xf32>
    %365 = vector.multi_reduction <add>, %364, %cst_186 [1] : vector<32x64xf32> to vector<32xf32>
    %366 = vector.shape_cast %365 : vector<32xf32> to vector<32x1xf32>
    %cst_187 = arith.constant 6.400000e+01 : f32
    %367 = vector.broadcast %cst_187 : f32 to vector<32x1xf32>
    %368 = arith.divf %366, %367 : vector<32x1xf32>
    %369 = vector.broadcast %361 : vector<32x1xf32> to vector<32x64xf32>
    %370 = arith.subf %353, %369 : vector<32x64xf32>
    %cst_188 = arith.constant 9.99999974E-6 : f32
    %371 = vector.broadcast %cst_188 : f32 to vector<32x1xf32>
    %372 = arith.addf %368, %371 : vector<32x1xf32>
    %373 = math.rsqrt %372 : vector<32x1xf32>
    %374 = vector.broadcast %373 : vector<32x1xf32> to vector<32x64xf32>
    %375 = arith.mulf %370, %374 : vector<32x64xf32>
    %376 = vector.broadcast %355 : vector<1x64xf32> to vector<32x64xf32>
    %377 = arith.mulf %375, %376 : vector<32x64xf32>
    %378 = vector.broadcast %357 : vector<1x64xf32> to vector<32x64xf32>
    %379 = arith.addf %377, %378 : vector<32x64xf32>
    %c1_189 = arith.constant 1 : index
    %c0_190 = arith.constant 0 : index
    %c0_191 = arith.constant 0 : index
    %380 = vector.load %arg19[%c1_189, %c0_190, %c0_191] : memref<2x64x48xf32, #tpu.memory_space<vmem>>, vector<1x64x48xf32>
    %381 = vector.shape_cast %380 : vector<1x64x48xf32> to vector<64x48xf32>
    %cst_192 = arith.constant dense<0.000000e+00> : vector<32x48xf32>
    %382 = tpu.matmul %379, %381, %cst_192 {dimension_numbers = #tpu.dot_dimension_numbers<[1], [0], [0], [1], [0, 0, 1, 1], [], []>} : vector<32x64xf32>, vector<64x48xf32>, vector<32x48xf32> -> vector<32x48xf32>
    %c1_193 = arith.constant 1 : index
    %c0_194 = arith.constant 0 : index
    %c0_195 = arith.constant 0 : index
    %383 = vector.load %arg20[%c1_193, %c0_194, %c0_195] : memref<2x1x48xf32, #tpu.memory_space<vmem>>, vector<1x1x48xf32>
    %384 = vector.shape_cast %383 : vector<1x1x48xf32> to vector<1x48xf32>
    %385 = vector.broadcast %384 : vector<1x48xf32> to vector<32x48xf32>
    %386 = arith.addf %382, %385 : vector<32x48xf32>
    %387 = arith.addf %318, %386 : vector<32x48xf32>
    %c0_196 = arith.constant 0 : index
    %c0_197 = arith.constant 0 : index
    %388 = vector.load %arg21[%c0_196, %c0_197] : memref<1x48xf32, #tpu.memory_space<vmem>>, vector<1x48xf32>
    %c0_198 = arith.constant 0 : index
    %c0_199 = arith.constant 0 : index
    %389 = vector.load %arg22[%c0_198, %c0_199] : memref<1x48xf32, #tpu.memory_space<vmem>>, vector<1x48xf32>
    %cst_200 = arith.constant dense<0.000000e+00> : vector<32xf32>
    %390 = vector.multi_reduction <add>, %387, %cst_200 [1] : vector<32x48xf32> to vector<32xf32>
    %391 = vector.shape_cast %390 : vector<32xf32> to vector<32x1xf32>
    %cst_201 = arith.constant 4.800000e+01 : f32
    %392 = vector.broadcast %cst_201 : f32 to vector<32x1xf32>
    %393 = arith.divf %391, %392 : vector<32x1xf32>
    %394 = vector.broadcast %393 : vector<32x1xf32> to vector<32x48xf32>
    %395 = arith.subf %387, %394 : vector<32x48xf32>
    %396 = arith.mulf %395, %395 : vector<32x48xf32>
    %cst_202 = arith.constant dense<0.000000e+00> : vector<32xf32>
    %397 = vector.multi_reduction <add>, %396, %cst_202 [1] : vector<32x48xf32> to vector<32xf32>
    %398 = vector.shape_cast %397 : vector<32xf32> to vector<32x1xf32>
    %cst_203 = arith.constant 4.800000e+01 : f32
    %399 = vector.broadcast %cst_203 : f32 to vector<32x1xf32>
    %400 = arith.divf %398, %399 : vector<32x1xf32>
    %401 = vector.broadcast %393 : vector<32x1xf32> to vector<32x48xf32>
    %402 = arith.subf %387, %401 : vector<32x48xf32>
    %cst_204 = arith.constant 9.99999974E-6 : f32
    %403 = vector.broadcast %cst_204 : f32 to vector<32x1xf32>
    %404 = arith.addf %400, %403 : vector<32x1xf32>
    %405 = math.rsqrt %404 : vector<32x1xf32>
    %406 = vector.broadcast %405 : vector<32x1xf32> to vector<32x48xf32>
    %407 = arith.mulf %402, %406 : vector<32x48xf32>
    %408 = vector.broadcast %388 : vector<1x48xf32> to vector<32x48xf32>
    %409 = arith.mulf %407, %408 : vector<32x48xf32>
    %410 = vector.broadcast %389 : vector<1x48xf32> to vector<32x48xf32>
    %411 = arith.addf %409, %410 : vector<32x48xf32>
    %c0_205 = arith.constant 0 : index
    %c0_206 = arith.constant 0 : index
    %412 = vector.load %arg21[%c0_205, %c0_206] : memref<1x48xf32, #tpu.memory_space<vmem>>, vector<1x48xf32>
    %c0_207 = arith.constant 0 : index
    %c0_208 = arith.constant 0 : index
    %413 = vector.load %arg22[%c0_207, %c0_208] : memref<1x48xf32, #tpu.memory_space<vmem>>, vector<1x48xf32>
    %cst_209 = arith.constant dense<0.000000e+00> : vector<32xf32>
    %414 = vector.multi_reduction <add>, %411, %cst_209 [1] : vector<32x48xf32> to vector<32xf32>
    %415 = vector.shape_cast %414 : vector<32xf32> to vector<32x1xf32>
    %cst_210 = arith.constant 4.800000e+01 : f32
    %416 = vector.broadcast %cst_210 : f32 to vector<32x1xf32>
    %417 = arith.divf %415, %416 : vector<32x1xf32>
    %418 = vector.broadcast %417 : vector<32x1xf32> to vector<32x48xf32>
    %419 = arith.subf %411, %418 : vector<32x48xf32>
    %420 = arith.mulf %419, %419 : vector<32x48xf32>
    %cst_211 = arith.constant dense<0.000000e+00> : vector<32xf32>
    %421 = vector.multi_reduction <add>, %420, %cst_211 [1] : vector<32x48xf32> to vector<32xf32>
    %422 = vector.shape_cast %421 : vector<32xf32> to vector<32x1xf32>
    %cst_212 = arith.constant 4.800000e+01 : f32
    %423 = vector.broadcast %cst_212 : f32 to vector<32x1xf32>
    %424 = arith.divf %422, %423 : vector<32x1xf32>
    %425 = vector.broadcast %417 : vector<32x1xf32> to vector<32x48xf32>
    %426 = arith.subf %411, %425 : vector<32x48xf32>
    %cst_213 = arith.constant 9.99999974E-6 : f32
    %427 = vector.broadcast %cst_213 : f32 to vector<32x1xf32>
    %428 = arith.addf %424, %427 : vector<32x1xf32>
    %429 = math.rsqrt %428 : vector<32x1xf32>
    %430 = vector.broadcast %429 : vector<32x1xf32> to vector<32x48xf32>
    %431 = arith.mulf %426, %430 : vector<32x48xf32>
    %432 = vector.broadcast %412 : vector<1x48xf32> to vector<32x48xf32>
    %433 = arith.mulf %431, %432 : vector<32x48xf32>
    %434 = vector.broadcast %413 : vector<1x48xf32> to vector<32x48xf32>
    %435 = arith.addf %433, %434 : vector<32x48xf32>
    %c0_214 = arith.constant 0 : index
    %c0_215 = arith.constant 0 : index
    %436 = vector.load %arg25[%c0_214, %c0_215] : memref<32x48xf32, #tpu.memory_space<vmem>>, vector<32x48xf32>
    tpu.vector_store %arg25[%c0_214, %c0_215], %435 {strides = array<i32>} : memref<32x48xf32, #tpu.memory_space<vmem>>, vector<32x48xf32>,
    %c0_216 = arith.constant 0 : index
    %c0_217 = arith.constant 0 : index
    %437 = vector.load %arg23[%c0_216, %c0_217] : memref<48x16xf32, #tpu.memory_space<vmem>>, vector<48x16xf32>
    %cst_218 = arith.constant dense<0.000000e+00> : vector<32x16xf32>
    %438 = tpu.matmul %435, %437, %cst_218 {dimension_numbers = #tpu.dot_dimension_numbers<[1], [0], [0], [1], [0, 0, 1, 1], [], []>} : vector<32x48xf32>, vector<48x16xf32>, vector<32x16xf32> -> vector<32x16xf32>
    %c0_219 = arith.constant 0 : index
    %c0_220 = arith.constant 0 : index
    %439 = vector.load %arg24[%c0_219, %c0_220] : memref<1x16xf32, #tpu.memory_space<vmem>>, vector<1x16xf32>
    %440 = vector.broadcast %439 : vector<1x16xf32> to vector<32x16xf32>
    %441 = arith.addf %438, %440 : vector<32x16xf32>
    %c0_221 = arith.constant 0 : index
    %c0_222 = arith.constant 0 : index
    %442 = vector.load %arg26[%c0_221, %c0_222] : memref<32x16xf32, #tpu.memory_space<vmem>>, vector<32x16xf32>
    tpu.vector_store %arg26[%c0_221, %c0_222], %441 {strides = array<i32>} : memref<32x16xf32, #tpu.memory_space<vmem>>, vector<32x16xf32>,
    return
  }
}

</mosaic_0001>

<bundles_post_ra>
// kernel: run.1
= control target key start
LH: loop header
LB: loop body
LE: loop exit
PB: predicated region body
PF: predicated region fallthrough
CT: control target
= control target key end

     0   :  { %s6052_s0 = inlined_call_operand.vmem [shape: f32[32,5], index: 0, kind: input, shape index: {}]   ;;  %s6053_s1 = inlined_call_operand.vmem [shape: f32[32,32], index: 1, kind: input, shape index: {}]   ;;  %s6054_s2 = inlined_call_operand.vmem [shape: f32[5,25], index: 2, kind: input, shape index: {}]   ;;  %s6055_s3 = inlined_call_operand.vmem [shape: f32[1,25], index: 3, kind: input, shape index: {}]   ;;  %s6056_s4 = inlined_call_operand.vmem [shape: f32[25,48], index: 4, kind: input, shape index: {}]   ;;  %s6057_s5 = inlined_call_operand.hbm [shape: f32[1,48], index: 5, kind: input, shape index: {}]   ;;  %s6058_s6 = inlined_call_operand.vmem [shape: f32[2,1,48], index: 6, kind: input, shape index: {}, may-alias: {6,11,13}]   ;;  %s6059_s7 = inlined_call_operand.vmem [shape: f32[2,1,48], index: 7, kind: input, shape index: {}, may-alias: {7,12,14}]   ;;  %s6060_s8 = inlined_call_operand.vmem [shape: f32[2,48,144], index: 8, kind: input, shape index: {}]   ;;  %s6061_s9 = inlined_call_operand.hbm [shape: f32[2,48,48], index: 9, kind: input, shape index: {}]   ;;  %s6062_s10 = inlined_call_operand.vmem [shape: f32[2,1,48], index: 10, kind: input, shape index: {}]   ;;  %s6063_s11 = inlined_call_operand.vmem [shape: f32[2,1,48], index: 11, kind: input, shape index: {}, may-alias: {6,11,13}]   ;;  %s6064_s12 = inlined_call_operand.vmem [shape: f32[2,1,48], index: 12, kind: input, shape index: {}, may-alias: {7,12,14}]   ;;  %s6065_s13 = inlined_call_operand.vmem [shape: f32[2,1,48], index: 13, kind: input, shape index: {}, may-alias: {6,11,13}]   ;;  %s6066_s14 = inlined_call_operand.vmem [shape: f32[2,1,48], index: 14, kind: input, shape index: {}, may-alias: {7,12,14}]   ;;  %s6067_s15 = inlined_call_operand.hbm [shape: f32[2,48,64], index: 15, kind: input, shape index: {}]   ;;  %s6068_s16 = inlined_call_operand.vmem [shape: f32[2,1,64], index: 16, kind: input, shape index: {}]   ;;  %s6069_s17 = inlined_call_operand.vmem [shape: f32[2,1,64], index: 17, kind: input, shape index: {}]   ;;  %s6070_s18 = inlined_call_operand.vmem [shape: f32[2,1,64], index: 18, kind: input, shape index: {}]   ;;  %s6071_s19 = inlined_call_operand.hbm [shape: f32[2,64,48], index: 19, kind: input, shape index: {}]   ;;  %s6072_s20 = inlined_call_operand.vmem [shape: f32[2,1,48], index: 20, kind: input, shape index: {}]   ;;  %s6073_s21 = inlined_call_operand.vmem [shape: f32[1,48], index: 21, kind: input, shape index: {}]   ;;  %s6074_s22 = inlined_call_operand.vmem [shape: f32[1,48], index: 22, kind: input, shape index: {}]   ;;  %s6075_s23 = inlined_call_operand.hbm [shape: f32[48,16], index: 23, kind: input, shape index: {}]   ;;  %s6076_s24 = inlined_call_operand.hbm [shape: f32[1,16], index: 24, kind: input, shape index: {}]   ;;  %s6077_s25 = inlined_call_operand.hbm [shape: f32[32,48], index: 25, kind: output, shape index: {0}]   ;;  %s6078_s26 = inlined_call_operand.vmem [shape: f32[32,16], index: 26, kind: output, shape index: {1}]  }
   0x1   :  { %6094 = sst [smem:[#allocation20_spill]] %s6052_s0 }
   0x2   :  { %6095 = sst [smem:[#allocation21_spill]] %s6053_s1 }
   0x3   :  { %6096 = sst [smem:[#allocation22_spill]] %s6054_s2 }
   0x4   :  { %6097 = sst [smem:[#allocation23_spill]] %s6055_s3 }
   0x5   :  { %6098 = sst [smem:[#allocation24_spill]] %s6056_s4 }
   0x6   :  { %6099 = sst [smem:[#allocation25_spill]] %s6057_s5 }
   0x7   :  { %6100 = sst [smem:[#allocation26_spill]] %s6058_s6 }
   0x8   :  { %6101 = sst [smem:[#allocation27_spill]] %s6059_s7 }
   0x9   :  { %6102 = sst [smem:[#allocation28_spill]] %s6060_s8 }
   0xa   :  { %6103 = sst [smem:[#allocation29_spill]] %s6061_s9 }
   0xb   :  { %6104 = sst [smem:[#allocation30_spill]] %s6062_s10 }
   0xc   :  { %32 = vsyncpa [#allocation4], 0 }
   0xd   :  { %33 = vsyncpa [#allocation7], 0 }
   0xe   :  { %34 = vsyncpa [#allocation10], 0 }
   0xf   :  { %35 = vsyncpa [#allocation13], 0 }
  0x10   :  { %36 = vsyncpa [#allocation5], 0  ;;  %s4955_s27 = smov [#allocation6]  }
  0x11   :  { %s68_s3 = sshll.u32 %s4955_s27, 4  ;;  %s69_s3 = int_to_ptr.vmem [resolvable:$true] %s68_s3 }
  0x12   :  { %s4813_s7 = scalar_lea.vmem %s69_s3, 1536  ;;  %p4818_p1 = scmp.lt.s32.totalorder %s69_s3, %s69_s3 }
  0x13   :  { %p4814_p0 = scmp.ne.s32.totalorder %s69_s3, %s4813_s7  ;;  %p4819_p2 = scmp.lt.s32.totalorder %s4813_s7, %s4813_s7 }
  0x15   :  { %p4820_p3 = por %p4819_p2, %p4818_p1 }
  0x17   :  { %p4821_p4 = pnand %p4820_p3, %p4814_p0 }
  0x19   :  { %4824 = shalt.err (!%p4821_p4)
}
  0x1a   :  { %s6086_s28 = smov 128   ;;  %s6087_s8 = smov 8  }
  0x1b   :  { %s6105_s0 = sld [smem:[#allocation29_spill]]  ;;  %s4958_s9 = smov [#allocation9]  }
  0x1c   :  { %s108_s30 = sshll.u32 %s4958_s9, 4  ;;  %s4959_s2 = smov [#allocation3]   ;;  %s109_s30 = int_to_ptr.vmem [resolvable:$true] %s108_s30 }
  0x1d   :  { %s53_s5 = sshll.u32 %s4959_s2, 4  ;;  %s4833_s10 = scalar_lea.vmem %s109_s30, 2048  ;;  %s54_s5 = int_to_ptr.vmem [resolvable:$true] %s53_s5 }
  0x1e   :  { %p4834_p5 = scmp.ne.s32.totalorder %s109_s30, %s4833_s10  ;;  %p4838_p6 = scmp.lt.s32.totalorder %s109_s30, %s109_s30 }
  0x1f   :  { %p4839_p7 = scmp.lt.s32.totalorder %s4833_s10, %s4833_s10 }
  0x21   :  { %74 = dma.hbm_to_vmem [thread:$0]  %s6105_s0, 1536, %s69_s3, [#allocation7], %s6086_s28, %s6086_s28, %s6087_s8  }
  0x22   :  { %p4840_p8 = por %p4839_p7, %p4838_p6 }
  0x24   :  { %p4841_p9 = pnand %p4840_p8, %p4834_p5 }
  0x26   :  { %4844 = shalt.err (!%p4841_p9)
}
  0x27   :  { %114 = dma.hbm_to_vmem [thread:$0]  %s6071_s19, 2048, %s109_s30, [#allocation10], %s6086_s28, %s6086_s28, %s6087_s8  }
  0x28   :  { %s4853_s27 = scalar_lea.vmem %s54_s5, 16  ;;  %s4857_s3 = scalar_lea.vmem %s54_s5, 32 }
  0x29   :  { %p4854_p10 = scmp.ne.s32.totalorder %s54_s5, %s4853_s27  ;;  %p4858_p11 = scmp.lt.s32.totalorder %s54_s5, %s54_s5 }
  0x2a   :  { %p4859_p12 = scmp.lt.s32.totalorder %s4857_s3, %s4853_s27 }
  0x2c   :  { %p4860_p13 = por %p4859_p12, %p4858_p11 }
  0x2e   :  { %p4861_p0 = pnand %p4860_p13, %p4854_p10 }
  0x30   :  { %4864 = shalt.err (!%p4861_p0)
}
  0x31   :  { %s6106_s29 = sld [smem:[#allocation25_spill]]  ;;  %s4960_s0 = smov [#allocation8]  }
  0x32   :  { %s90_s9 = sshll.u32 %s4960_s0, 4  ;;  %s4961_s2 = smov [#allocation11]   ;;  %s91_s9 = int_to_ptr.vmem [resolvable:$true] %s90_s9 }
  0x33   :  { %s126_s10 = sshll.u32 %s4961_s2, 4  ;;  %s4873_s6 = scalar_lea.vmem %s91_s9, 1536  ;;  %s127_s10 = int_to_ptr.vmem [resolvable:$true] %s126_s10 }
  0x34   :  { %p4874_p1 = scmp.ne.s32.totalorder %s91_s9, %s4873_s6  ;;  %p4878_p2 = scmp.lt.s32.totalorder %s91_s9, %s91_s9 }
  0x35   :  { %p4879_p3 = scmp.lt.s32.totalorder %s4873_s6, %s4873_s6 }
  0x37   :  { %56 = dma.hbm_to_vmem [thread:$0]  %s6106_s29, 16, %s54_s5, [#allocation4]  }
  0x38   :  { %p4880_p4 = por %p4879_p3, %p4878_p2 }
  0x3a   :  { %p4881_p5 = pnand %p4880_p4, %p4874_p1 }
  0x3c   :  { %4884 = shalt.err (!%p4881_p5)
}
  0x3d   :  { %96 = dma.hbm_to_vmem [thread:$0]  %s6067_s15, 1536, %s91_s9, [#allocation7], %s6086_s28, %s6086_s28, %s6087_s8  }
  0x3e   :  { %s4893_s5 = scalar_lea.vmem %s127_s10, 768  ;;  %p4898_p7 = scmp.lt.s32.totalorder %s127_s10, %s127_s10 }
  0x3f   :  { %p4894_p6 = scmp.ne.s32.totalorder %s127_s10, %s4893_s5  ;;  %p4899_p8 = scmp.lt.s32.totalorder %s4893_s5, %s4893_s5 }
  0x41   :  { %p4900_p9 = por %p4899_p8, %p4898_p7 }
  0x43   :  { %p4901_p10 = pnand %p4900_p9, %p4894_p6 }
  0x45   :  { %4904 = shalt.err (!%p4901_p10)
}
  0x46   :  { %132 = dma.hbm_to_vmem [thread:$0]  %s6075_s23, 768, %s127_s10, [#allocation10], %s6086_s28, %s6086_s28, %s6087_s8  }
  0x47   :  { %s4962_s3 = smov [#allocation12]  }
  0x48   :  { %s139_s7 = sshll.u32 %s4962_s3, 4  ;;  %s140_s7 = int_to_ptr.vmem [resolvable:$true] %s139_s7 }
  0x49   :  { %s4913_s4 = scalar_lea.vmem %s140_s7, 16  ;;  %s4917_s15 = scalar_lea.vmem %s140_s7, 32 }
  0x4a   :  { %p4914_p11 = scmp.ne.s32.totalorder %s140_s7, %s4913_s4  ;;  %p4918_p12 = scmp.lt.s32.totalorder %s140_s7, %s140_s7 }
  0x4b   :  { %p4919_p13 = scmp.lt.s32.totalorder %s4917_s15, %s4913_s4 }
  0x4d   :  { %p4920_p0 = por %p4919_p13, %p4918_p12 }
  0x4f   :  { %p4921_p1 = pnand %p4920_p0, %p4914_p11 }
  0x51   :  { %4924 = shalt.err (!%p4921_p1)
}
  0x52   :  { %142 = dma.hbm_to_vmem [thread:$0]  %s6076_s24, 16, %s140_s7, [#allocation13]  }
  0x53   :  { %4945 = dma.done.wait [#allocation4], 16  }
  0x54   :  { %4946 = vsyncadd [#allocation4], 4294967280 }
  0x55   :  { %4947 = dma.done.wait [#allocation7], 3072  }
  0x56   :  { %4948 = vsyncadd [#allocation7], 4294964224 }
  0x57   :  { %4949 = dma.done.wait [#allocation10], 2816  }
  0x58   :  { %4950 = vsyncadd [#allocation10], 4294964480 }
  0x59   :  { %4951 = dma.done.wait [#allocation13], 16  }
  0x5a   :  { %4952 = vsyncadd [#allocation13], 4294967280  ;;  %vm186_vm0 = vcmask 1044480   ;;  %vm173_vm1 = vcmask 39936   ;;  %s6107_s2 = sld [smem:[#allocation22_spill]]  ;;  %vm303_vm2 = vcmask 1040384  }
  0x5b   :  { %s6108_s19 = sld [smem:[#allocation20_spill]]  ;;  %vm290_vm3 = vcmask 203776   ;;  %v3939_v23 = vld [vmem:[#allocation3] ss:$0 sm:$0xff]  ;;  %vm398_vm4 = vcmask 392192   ;;  %vm597_vm5 = vcmask 130048  }
  0x5c   :  { %s6109_s15 = sld [smem:[#allocation24_spill]]  ;;  %s4966_s24 = smov 112   ;;  %vm707_vm6 = vcmask 261120   ;;  %vm1159_vm7 = vcmask 261248   ;;  %vm1446_vm8 = vcmask 392448   ;;  %vm1833_vm9 = vcmask 523264  }
  0x5d   :  { %s6110_s30 = sld [smem:[#allocation23_spill]]  ;;  %s6092_s10 = smov 16  }
  0x5e   :  { %s6111_s1 = sld [smem:[#allocation28_spill]]  ;;  %s6090_s5 = smov 48  }
  0x5f   :  { %s6112_s9 = sld [smem:[#allocation26_spill]]  ;;  %s6088_s27 = smov 96  }
  0x60   :  { %v165_v0 = vld [vmem:[%s6107_s2] sm:$0x1f]  ;;  %s6113_s6 = sld [smem:[#allocation27_spill]]  ;;  %s4967_s2 = smov 32  }
  0x61   :  { %v161_v1 = vld [vmem:[%s6108_s19] sm:$0xff]  ;;  %v162_v2 = vld [vmem:[%s6108_s19 + $0x8] sm:$0xff]  ;;  %4284 = vmatprep.subr.msk.mxu0 %vm186_vm0, %v165_v0  ;;  %v163_v3 = vld [vmem:[%s6108_s19 + $0x10] sm:$0xff]  ;;  %s6114_s3 = sld [smem:[#allocation21_spill]]  ;;  %s6117_s0 = smov 48  }
  0x62   :  { %4286 = vmatprep.mubr.msk.f32.mxu0 %vm173_vm1, %v161_v1  ;;  %4285 = vmatpush3.msk.msra.mxu0 %vm186_vm0, %v165_v0  ;;  %v164_v4 = vld [vmem:[%s6108_s19 + $0x18] sm:$0xff]  ;;  %v281_v6 = vld [vmem:[%s6109_s15 + $0x10] sm:$0xff]  ;;  %v280_v7 = vld [vmem:[%s6109_s15 + $0x8] sm:$0xff]  ;;  %s4964_s19 = smov 80   ;;  %s6118_s23 = smov 96  }
  0x63   :  { %4287 = vmatmul.mubr.msk.f32.vlgmr.msra.gmra.mxu0 %vm173_vm1, %v162_v2  ;;  %v282_v5 = vld [vmem:[%s6109_s15 + $0x18] sm:$0x1]  ;;  %v279_v8 = vld [vmem:[%s6109_s15] sm:$0xff]  ;;  %s6115_s15 = sld [smem:[#allocation30_spill]] }
  0x64   :  { %4289 = vmatprep.mubr.msk.f32.mxu0 %vm173_vm1, %v163_v3  ;;  %4292 = vmatprep.subr.msk.mxu1 %vm303_vm2, %v282_v5  ;;  %v3933_v9 = vld [vmem:[%s6110_s30] ss:$0 sm:$0xff]  ;;  %v483_v55 = vld [vmem:[%s6111_s1 + $0x58] sm:$0xff]  ;;  %v482_v56 = vld [vmem:[%s6111_s1 + $0x50] sm:$0xff]  ;;  %v4963_v3 = vmov 0.0   ;;  %s4965_s30 = smov 64  }
  0x65   :  { %4293 = vmatpush3.msk.msra.mxu1 %vm303_vm2, %v282_v5  ;;  %516 = vmatprep.subr.mxu0 %v483_v55  ;;  %v481_v57 = vld [vmem:[%s6111_s1 + $0x48] sm:$0xff]  ;;  %v480_v58 = vld [vmem:[%s6111_s1 + $0x40] sm:$0xff]  ;;  %v479_v59 = vld [vmem:[%s6111_s1 + $0x38] sm:$0xff] }
  0x66   :  { %4294 = vmatprep.subr.mxu1 %v281_v6  ;;  %517 = vmatpush1.msra.mxu0 %v482_v56  ;;  %v478_v60 = vld [vmem:[%s6111_s1 + $0x30] sm:$0xff]  ;;  %v477_v61 = vld [vmem:[%s6111_s1 + $0x28] sm:$0xff]  ;;  %v476_v62 = vld [vmem:[%s6111_s1 + $0x20] sm:$0xff] }
  0x67   :  { %4290 = vmatmul.mubr.msk.f32.gmra.mxu0 %vm173_vm1, %v164_v4  ;;  %4295 = vmatpush3.msra.mxu1 %v281_v6  ;;  %v475_v63 = vld [vmem:[%s6111_s1 + $0x18] sm:$0xff]  ;;  %v474_v0 = vld [vmem:[%s6111_s1 + $0x10] sm:$0xff]  ;;  %v473_v1 = vld [vmem:[%s6111_s1 + $0x8] sm:$0xff] }
  0x68   :  { %4296 = vmatprep.subr.mxu1 %v280_v7  ;;  %518 = vmatprep.subr.mxu0 %v481_v57  ;;  %v472_v2 = vld [vmem:[%s6111_s1] sm:$0xff] }
  0x69   :  { %4297 = vmatpush3.msra.mxu1 %v280_v7  ;;  %519 = vmatpush1.msra.mxu0 %v480_v58 }
  0x6a   :  { %4298 = vmatprep.subr.mxu1 %v279_v8  ;;  %520 = vmatprep.subr.mxu0 %v479_v59  ;;  %v5328_v59 = vld [vmem:[%s6114_s3 + $0x8] sm:$0xff] }
  0x6b   :  { %4299 = vmatpush3.msra.mxu1 %v279_v8  ;;  %521 = vmatpush1.msra.mxu0 %v478_v60 }
  0x6c   :  { %522 = vmatprep.subr.mxu0 %v477_v61  ;;  %560 = vmatprep.mubr.f32.mxu0 %v4963_v3 }
  0x6d   :  { %523 = vmatpush1.msra.mxu0 %v476_v62  ;;  %v5333_v62 = vld [vmem:[%s6114_s3] sm:$0xff] }
  0x6e   :  { %524 = vmatprep.subr.mxu0 %v475_v63 }
  0x6f   :  { %525 = vmatpush1.msra.mxu0 %v474_v0 }
  0x70   :  { %526 = vmatprep.subr.mxu0 %v473_v1 }
  0x71   :  { %527 = vmatpush1.msra.mxu0 %v472_v2  ;;  %v5339_v2 = vld [vmem:[%s6114_s3 + $0x18] sm:$0xff] }
 0x123   :  { %v4288_v10 = vpop.f32.mrf.mxu0 }
 0x124   :  { %v262_v11 = vadd.f32 %v4288_v10, %v3933_v9 }
 0x125   :  { %v256_v12 = vpop.f32.mrf.mxu0 }
 0x126   :  { %v257_v13 = vadd.f32 %v3933_v9, %v256_v12  ;;  %v276_v17 = vmax.f32 %v262_v11, 0.0 }
 0x127   :  { %v4291_v14 = vpop.f32.mrf.mxu0 }
 0x128   :  { %v275_v15 = vmax.f32 %v257_v13, 0.0  ;;  %v272_v16 = vadd.f32 %v4291_v14, %v3933_v9 }
 0x129   :  { %v266_v18 = vpop.f32.mrf.mxu0 }
 0x12a   :  { %v267_v19 = vadd.f32 %v3933_v9, %v266_v18  ;;  %4300 = vmatprep.mubr.msk.f32.mxu1 %vm290_vm3, %v275_v15  ;;  %v278_v20 = vmax.f32 %v272_v16, 0.0 }
 0x12b   :  { %4301 = vmatmul.mubr.msk.f32.vlgmr.msra.gmra.mxu1 %vm290_vm3, %v276_v17  ;;  %v3945_v17 = vld [vmem:[%s6112_s9] ss:$0 sm:$0xff] }
 0x12c   :  { %v277_v21 = vmax.f32 %v267_v19, 0.0  ;;  %v3946_v19 = vld [vmem:[%s6113_s6] ss:$0 sm:$0xff] }
 0x12e   :  { %4303 = vmatprep.mubr.msk.f32.mxu1 %vm290_vm3, %v277_v21 }
 0x12f   :  { %4304 = vmatmul.mubr.msk.f32.gmra.mxu1 %vm290_vm3, %v278_v20 }
 0x1eb   :  { %v4302_v22 = vpop.f32.mrf.mxu1 }
 0x1ec   :  { %v5169_v27 = vadd.f32 %v4302_v22, %v3939_v23 }
 0x1ed   :  { %v373_v24 = vpop.f32.mrf.mxu1 }
 0x1ee   :  { %v5167_v25 = vadd.f32 %v3939_v23, %v373_v24  ;;  %v402_v33 = vsel %vm398_vm4, %v5169_v27, 0.0 }
 0x1ef   :  { %v4305_v26 = vpop.f32.mrf.mxu1 }
 0x1f0   :  { %v399_v28 = vsel %vm398_vm4, %v5167_v25, 0.0  ;;  %v5175_v31 = vadd.f32 %v4305_v26, %v3939_v23 }
 0x1f1   :  { %v383_v29 = vpop.f32.mrf.mxu1  ;;  %400 = vadd.xlane.f32.xlu0 %v399_v28 }
 0x1f2   :  { %v5173_v30 = vadd.f32 %v3939_v23, %v383_v29  ;;  %v408_v34 = vsel %vm398_vm4, %v5175_v31, 0.0 }
 0x1f4   :  { %v405_v32 = vsel %vm398_vm4, %v5173_v30, 0.0 }
 0x1f5   :  { %406 = vadd.xlane.f32.xlu1 %v405_v32  ;;  %403 = vadd.xlane.f32.xlu0 %v402_v33 }
 0x1f9   :  { %409 = vadd.xlane.f32.xlu1 %v408_v34 }
 0x27a   :  { %v401_v35 = vpop.xlane.xlu0 %400 }
 0x27b   :  { %v412_v36 = vmul.f32 0.020833334, %v401_v35 }
 0x27d   :  { %v5184_v37 = vsub.f32 %v5167_v25, %v412_v36 }
 0x27e   :  { %v407_v38 = vpop.xlane.xlu1 %406  ;;  %v404_v39 = vpop.xlane.xlu0 %403 }
 0x27f   :  { %v414_v40 = vmul.f32 0.020833334, %v407_v38  ;;  %v413_v41 = vmul.f32 0.020833334, %v404_v39  ;;  %v420_v42 = vmul.f32 %v5184_v37, %v5184_v37 }
 0x281   :  { %v5189_v43 = vsub.f32 %v5173_v30, %v414_v40  ;;  %v5192_v44 = vsub.f32 %v5169_v27, %v413_v41  ;;  %v424_v45 = vsel %vm398_vm4, %v420_v42, 0.0 }
 0x282   :  { %v410_v46 = vpop.xlane.xlu1 %409  ;;  %425 = vadd.xlane.f32.xlu0 %v424_v45 }
 0x283   :  { %v415_v47 = vmul.f32 0.020833334, %v410_v46  ;;  %v422_v48 = vmul.f32 %v5189_v43, %v5189_v43  ;;  %v421_v49 = vmul.f32 %v5192_v44, %v5192_v44 }
 0x285   :  { %v5200_v50 = vsub.f32 %v5175_v31, %v415_v47  ;;  %v430_v51 = vsel %vm398_vm4, %v422_v48, 0.0  ;;  %v427_v52 = vsel %vm398_vm4, %v421_v49, 0.0 }
 0x286   :  { %431 = vadd.xlane.f32.xlu0 %v430_v51  ;;  %428 = vadd.xlane.f32.xlu1 %v427_v52 }
 0x287   :  { %v423_v53 = vmul.f32 %v5200_v50, %v5200_v50 }
 0x289   :  { %v433_v54 = vsel %vm398_vm4, %v423_v53, 0.0 }
 0x28a   :  { %434 = vadd.xlane.f32.xlu1 %v433_v54 }
 0x30b   :  { %v426_v4 = vpop.xlane.xlu0 %425 }
 0x30c   :  { %v436_v5 = vmul.f32 0.020833334, %v426_v4 }
 0x30e   :  { %v440_v6 = vadd.f32 1e-05, %v436_v5 }
 0x30f   :  { %v429_v7 = vpop.xlane.xlu1 %428  ;;  %v432_v8 = vpop.xlane.xlu0 %431 }
 0x310   :  { %4625 = vrsqrt.f32 %v440_v6  ;;  %v437_v9 = vmul.f32 0.020833334, %v429_v7  ;;  %v438_v10 = vmul.f32 0.020833334, %v432_v8 }
 0x312   :  { %v441_v11 = vadd.f32 1e-05, %v437_v9  ;;  %v442_v12 = vadd.f32 1e-05, %v438_v10 }
 0x313   :  { %v435_v13 = vpop.xlane.xlu1 %434 }
 0x314   :  { %4627 = vrsqrt.f32 %v441_v11  ;;  %v439_v14 = vmul.f32 0.020833334, %v435_v13  ;;  %v5348_v11 = vld [vmem:[%s6114_s3 + $0x10] sm:$0xff] }
 0x315   :  { %4629 = vrsqrt.f32 %v442_v12 }
 0x316   :  { %v443_v15 = vadd.f32 1e-05, %v439_v14 }
 0x318   :  { %4631 = vrsqrt.f32 %v443_v15 }
 0x31d   :  { %v4626_v16 = vpop.eup %4625 }
 0x31e   :  { %v448_v18 = vmul.f32 %v4626_v16, %v5184_v37 }
 0x320   :  { %v458_v20 = vmul.f32 %v3945_v17, %v448_v18 }
 0x321   :  { %v4628_v21 = vpop.eup %4627 }
 0x322   :  { %v4630_v22 = vpop.eup %4629  ;;  %v468_v23 = vadd.f32 %v3946_v19, %v458_v20  ;;  %v449_v24 = vmul.f32 %v4628_v21, %v5192_v44 }
 0x323   :  { %v450_v26 = vmul.f32 %v4630_v22, %v5189_v43 }
 0x324   :  { %3947 = vmatmul.mubr.msk.f32.vlgmr.msra.gmra.mxu0 %vm398_vm4, %v468_v23  ;;  %v459_v28 = vmul.f32 %v3945_v17, %v449_v24 }
 0x325   :  { %v4632_v29 = vpop.eup %4631  ;;  %566 = vmatprep.mubr.f32.mxu0 %v4963_v3  ;;  %v460_v33 = vmul.f32 %v3945_v17, %v450_v26 }
 0x326   :  { %v469_v32 = vadd.f32 %v3946_v19, %v459_v28  ;;  %v451_v34 = vmul.f32 %v4632_v29, %v5200_v50 }
 0x327   :  { %v470_v35 = vadd.f32 %v3946_v19, %v460_v33 }
 0x328   :  { %3948 = vmatmul.mubr.msk.f32.gmra.mxu0 %vm398_vm4, %v469_v32  ;;  %v461_v36 = vmul.f32 %v3945_v17, %v451_v34 }
 0x329   :  { %572 = vmatprep.mubr.f32.mxu0 %v4963_v3 }
 0x32a   :  { %v471_v37 = vadd.f32 %v3946_v19, %v461_v36 }
 0x32c   :  { %3949 = vmatmul.mubr.msk.f32.gmra.mxu0 %vm398_vm4, %v470_v35 }
 0x32d   :  { %578 = vmatprep.mubr.f32.mxu0 %v4963_v3 }
 0x330   :  { %3950 = vmatmul.mubr.msk.f32.gmra.mxu0 %vm398_vm4, %v471_v37 }
 0x3e4   :  { %v5261_v38 = vpop.f32.mrf.mxu0 }
 0x3e5   :  { %4314 = vmatprep.mubr.msk.f32.mxu1 %vm597_vm5, %v5261_v38 }
 0x3e6   :  { %v5265_v39 = vpop.f32.mrf.mxu0 }
 0x3e8   :  { %v5267_v40 = vpop.f32.mrf.mxu0 }
 0x3ea   :  { %v570_v41 = vpop.f32.mrf.mxu0 }
 0x3ec   :  { %v5269_v42 = vpop.f32.mrf.mxu0 }
 0x3ed   :  { %593 = vrot.lane.b32.xlu1 %v5269_v42, %s4964_s19 }
 0x3ee   :  { %v576_v43 = vpop.f32.mrf.mxu0 }
 0x3f0   :  { %v5273_v44 = vpop.f32.mrf.mxu0 }
 0x3f1   :  { %591 = vrot.lane.b32.xlu1 %v5267_v40, %s4964_s19  ;;  %595 = vrot.lane.b32.xlu0 %v5273_v44, %s4964_s19 }
 0x3f2   :  { %v582_v54 = vpop.f32.mrf.mxu0 }
 0x3f5   :  { %589 = vrot.lane.b32.xlu1 %v5261_v38, %s4964_s19  ;;  %879 = vrot.lane.b32.xlu0 %v5273_v44, %s4965_s30 }
 0x3f9   :  { %877 = vrot.lane.b32.xlu1 %v5269_v42, %s4965_s30  ;;  %875 = vrot.lane.b32.xlu0 %v5267_v40, %s4965_s30 }
 0x3fd   :  { %873 = vrot.lane.b32.xlu1 %v5261_v38, %s4965_s30  ;;  %865 = vrot.lane.b32.xlu0 %v5261_v38, %s4966_s24 }
 0x401   :  { %867 = vrot.lane.b32.xlu1 %v5267_v40, %s4966_s24  ;;  %869 = vrot.lane.b32.xlu0 %v5269_v42, %s4966_s24 }
 0x405   :  { %871 = vrot.lane.b32.xlu1 %v5273_v44, %s4966_s24 }
 0x45f   :  { %v594_v45 = vpop.permute.xlu1 %593 }
 0x463   :  { %v596_v46 = vpop.permute.xlu0 %595  ;;  %v592_v47 = vpop.permute.xlu1 %591 }
 0x464   :  { %4306 = vmatprep.subr.msk.mxu1 %vm597_vm5, %v596_v46 }
 0x465   :  { %4307 = vmatpush3.xpose.msk.msra.mxu1 %vm597_vm5, %v596_v46 }
 0x466   :  { %4308 = vmatprep.subr.msk.mxu1 %vm597_vm5, %v594_v45 }
 0x467   :  { %v880_v48 = vpop.permute.xlu0 %879  ;;  %v590_v49 = vpop.permute.xlu1 %589 }
 0x469   :  { %4309 = vmatpush3.xpose.msk.msra.mxu1 %vm597_vm5, %v594_v45 }
 0x46a   :  { %4310 = vmatprep.subr.msk.mxu1 %vm597_vm5, %v592_v47 }
 0x46b   :  { %v876_v50 = vpop.permute.xlu0 %875  ;;  %v878_v51 = vpop.permute.xlu1 %877 }
 0x46d   :  { %4311 = vmatpush3.xpose.msk.msra.mxu1 %vm597_vm5, %v592_v47 }
 0x46e   :  { %4312 = vmatprep.subr.msk.mxu1 %vm597_vm5, %v590_v49 }
 0x46f   :  { %v866_v52 = vpop.permute.xlu0 %865  ;;  %v874_v53 = vpop.permute.xlu1 %873 }
 0x471   :  { %4313 = vmatpush3.xpose.msk.msra.mxu1 %vm597_vm5, %v590_v49 }
 0x472   :  { %4334 = vmatprep.subr.msk.mxu1 %vm597_vm5, %v880_v48 }
 0x473   :  { %v868_v55 = vpop.permute.xlu1 %867  ;;  %v870_v56 = vpop.permute.xlu0 %869 }
 0x474   :  { %4315 = vmatmul.mubr.msk.f32.vlgmr.msra.gmra.mxu1 %vm597_vm5, %v5267_v40 }
 0x475   :  { %4317 = vmatprep.mubr.msk.f32.mxu1 %vm597_vm5, %v5269_v42  ;;  %4335 = vmatpush3.xpose.msk.msra.mxu1 %vm597_vm5, %v880_v48 }
 0x476   :  { %4336 = vmatprep.subr.msk.mxu1 %vm597_vm5, %v878_v51 }
 0x477   :  { %v872_v57 = vpop.permute.xlu1 %871 }
 0x478   :  { %4318 = vmatmul.mubr.msk.f32.gmra.mxu1 %vm597_vm5, %v5273_v44 }
 0x479   :  { %4337 = vmatpush3.xpose.msk.msra.mxu1 %vm597_vm5, %v878_v51  ;;  %4342 = vmatprep.mubr.msk.f32.mxu1 %vm597_vm5, %v866_v52 }
 0x47a   :  { %4338 = vmatprep.subr.msk.mxu1 %vm597_vm5, %v876_v50 }
 0x47d   :  { %4339 = vmatpush3.xpose.msk.msra.mxu1 %vm597_vm5, %v876_v50 }
 0x47e   :  { %4340 = vmatprep.subr.msk.mxu1 %vm597_vm5, %v874_v53 }
 0x481   :  { %4341 = vmatpush3.xpose.msk.msra.mxu1 %vm597_vm5, %v874_v53 }
 0x482   :  { %4376 = vmatprep.subr.mxu1 %v582_v54 }
 0x484   :  { %4343 = vmatmul.mubr.msk.f32.vlgmr.msra.gmra.mxu1 %vm597_vm5, %v868_v55 }
 0x485   :  { %4345 = vmatprep.mubr.msk.f32.mxu1 %vm597_vm5, %v870_v56  ;;  %4377 = vmatpush3.msra.mxu1 %v582_v54 }
 0x486   :  { %4378 = vmatprep.subr.mxu1 %v576_v43 }
 0x487   :  { %4379 = vmatpush3.msra.mxu1 %v576_v43 }
 0x488   :  { %4346 = vmatmul.mubr.msk.f32.gmra.mxu1 %vm597_vm5, %v872_v57  ;;  %4380 = vmatprep.subr.mxu1 %v570_v41 }
 0x489   :  { %4381 = vmatpush3.msra.mxu1 %v570_v41 }
 0x48a   :  { %4382 = vmatprep.subr.mxu1 %v5265_v39 }
 0x48b   :  { %4383 = vmatpush3.msra.mxu1 %v5265_v39 }
 0x534   :  { %v4316_v58 = vpop.f32.mrf.mxu1 }
 0x535   :  { %v700_v60 = vmul.f32 0.25, %v4316_v58 }
 0x536   :  { %v680_v61 = vpop.f32.mrf.mxu1 }
 0x537   :  { %v699_v63 = vmul.f32 0.25, %v680_v61  ;;  %v704_v0 = vadd.f32 %v700_v60, %v5328_v59 }
 0x538   :  { %v4319_v1 = vpop.f32.mrf.mxu1 }
 0x539   :  { %v702_v4 = vmul.f32 0.25, %v4319_v1  ;;  %v711_v5 = vsel %vm707_vm6, %v704_v0, -inf  ;;  %v703_v6 = vadd.f32 %v699_v63, %v5333_v62 }
 0x53a   :  { %712 = vmax.xlane.f32.xlu1 %v711_v5  ;;  %v690_v7 = vpop.f32.mrf.mxu1 }
 0x53b   :  { %v701_v8 = vmul.f32 0.25, %v690_v7  ;;  %v708_v9 = vsel %vm707_vm6, %v703_v6, -inf  ;;  %v706_v10 = vadd.f32 %v702_v4, %v5339_v2 }
 0x53c   :  { %709 = vmax.xlane.f32.xlu0 %v708_v9 }
 0x53d   :  { %v717_v12 = vsel %vm707_vm6, %v706_v10, -inf  ;;  %v705_v13 = vadd.f32 %v701_v8, %v5348_v11 }
 0x53f   :  { %v714_v14 = vsel %vm707_vm6, %v705_v13, -inf }
 0x540   :  { %718 = vmax.xlane.f32.xlu0 %v717_v12 }
 0x544   :  { %715 = vmax.xlane.f32.xlu0 %v714_v14  ;;  %v4344_v15 = vpop.f32.mrf.mxu1 }
 0x545   :  { %v983_v16 = vmul.f32 0.25, %v4344_v15 }
 0x546   :  { %v963_v17 = vpop.f32.mrf.mxu1 }
 0x547   :  { %v982_v18 = vmul.f32 0.25, %v963_v17  ;;  %v987_v19 = vadd.f32 %v983_v16, %v5328_v59 }
 0x548   :  { %v4347_v20 = vpop.f32.mrf.mxu1 }
 0x549   :  { %v985_v21 = vmul.f32 0.25, %v4347_v20  ;;  %v993_v22 = vsel %vm707_vm6, %v987_v19, -inf  ;;  %v986_v23 = vadd.f32 %v982_v18, %v5333_v62 }
 0x54a   :  { %994 = vmax.xlane.f32.xlu1 %v993_v22  ;;  %v973_v24 = vpop.f32.mrf.mxu1 }
 0x54b   :  { %v984_v26 = vmul.f32 0.25, %v973_v24  ;;  %v990_v28 = vsel %vm707_vm6, %v986_v23, -inf  ;;  %v989_v29 = vadd.f32 %v985_v21, %v5339_v2 }
 0x54c   :  { %991 = vmax.xlane.f32.xlu0 %v990_v28 }
 0x54d   :  { %v999_v32 = vsel %vm707_vm6, %v989_v29, -inf  ;;  %v988_v33 = vadd.f32 %v984_v26, %v5348_v11 }
 0x54e   :  { %1000 = vmax.xlane.f32.xlu1 %v999_v32 }
 0x54f   :  { %v996_v34 = vsel %vm707_vm6, %v988_v33, -inf }
 0x550   :  { %997 = vmax.xlane.f32.xlu0 %v996_v34 }
 0x55f   :  { %758 = vrot.lane.b32.xlu1 %v5273_v44, %s4967_s2 }
 0x563   :  { %754 = vrot.lane.b32.xlu1 %v5267_v40, %s4967_s2 }
 0x566   :  { %756 = vrot.lane.b32.xlu0 %v5269_v42, %s4967_s2 }
 0x567   :  { %752 = vrot.lane.b32.xlu1 %v5261_v38, %s4967_s2 }
 0x56a   :  { %1036 = vrot.lane.b32.xlu0 %v5267_v40, %s6092_s10 }
 0x56b   :  { %1040 = vrot.lane.b32.xlu1 %v5273_v44, %s6092_s10 }
 0x56e   :  { %1178 = vrot.lane.b32.xlu0 %v5273_v44, %s6090_s5 }
 0x56f   :  { %1038 = vrot.lane.b32.xlu1 %v5269_v42, %s6092_s10 }
 0x573   :  { %1034 = vrot.lane.b32.xlu1 %v5261_v38, %s6092_s10 }
 0x5c3   :  { %v713_v35 = vpop.xlane.xlu1 %712 }
 0x5c4   :  { %v721_v36 = vsub.f32 %v704_v0, %v713_v35 }
 0x5c5   :  { %v710_v37 = vpop.xlane.xlu0 %709 }
 0x5c6   :  { %v726_v39 = vmul.f32 1.442695, %v721_v36  ;;  %v720_v41 = vsub.f32 %v703_v6, %v710_v37 }
 0x5c8   :  { %4633 = vpow2.f32 %v726_v39  ;;  %v724_v43 = vmul.f32 1.442695, %v720_v41 }
 0x5c9   :  { %v719_v45 = vpop.xlane.xlu0 %718 }
 0x5ca   :  { %4635 = vpow2.f32 %v724_v43  ;;  %v723_v46 = vsub.f32 %v706_v10, %v719_v45 }
 0x5cc   :  { %v730_v47 = vmul.f32 1.442695, %v723_v46 }
 0x5cd   :  { %v716_v48 = vpop.xlane.xlu0 %715 }
 0x5ce   :  { %4637 = vpow2.f32 %v730_v47  ;;  %v722_v49 = vsub.f32 %v705_v13, %v716_v48 }
 0x5d0   :  { %v728_v50 = vmul.f32 1.442695, %v722_v49 }
 0x5d2   :  { %4639 = vpow2.f32 %v728_v50 }
 0x5d3   :  { %v995_v51 = vpop.xlane.xlu1 %994 }
 0x5d4   :  { %v1003_v52 = vsub.f32 %v987_v19, %v995_v51 }
 0x5d5   :  { %v5379_v53 = vpop.eup %4633  ;;  %v992_v54 = vpop.xlane.xlu0 %991 }
 0x5d6   :  { %v1008_v55 = vmul.f32 1.442695, %v1003_v52  ;;  %v1002_v56 = vsub.f32 %v986_v23, %v992_v54  ;;  %v735_v57 = vsel %vm707_vm6, %v5379_v53, 0.0 }
 0x5d7   :  { %v5383_v58 = vpop.eup %4635  ;;  %736 = vadd.xlane.f32.xlu1 %v735_v57  ;;  %v1001_v60 = vpop.xlane.xlu1 %1000 }
 0x5d8   :  { %4641 = vpow2.f32 %v1008_v55  ;;  %v1006_v61 = vmul.f32 1.442695, %v1002_v56  ;;  %v1005_v63 = vsub.f32 %v989_v29, %v1001_v60  ;;  %v732_v0 = vsel %vm707_vm6, %v5383_v58, 0.0 }
 0x5d9   :  { %733 = vadd.xlane.f32.xlu0 %v732_v0  ;;  %v998_v1 = vpop.xlane.xlu0 %997 }
 0x5da   :  { %4643 = vpow2.f32 %v1006_v61  ;;  %v1012_v4 = vmul.f32 1.442695, %v1005_v63  ;;  %v1004_v5 = vsub.f32 %v988_v33, %v998_v1 }
 0x5db   :  { %v5387_v6 = vpop.eup %4637  ;;  %v759_v7 = vpop.permute.xlu1 %758 }
 0x5dc   :  { %4645 = vpow2.f32 %v1012_v4  ;;  %v1010_v8 = vmul.f32 1.442695, %v1004_v5  ;;  %4320 = vmatprep.subr.mxu0 %v759_v7  ;;  %v741_v9 = vsel %vm707_vm6, %v5387_v6, 0.0 }
 0x5dd   :  { %4321 = vmatpush3.msra.mxu0 %v759_v7  ;;  %742 = vadd.xlane.f32.xlu1 %v741_v9  ;;  %v757_v10 = vpop.permute.xlu0 %756 }
 0x5de   :  { %4322 = vmatprep.subr.mxu0 %v757_v10  ;;  %4647 = vpow2.f32 %v1010_v8 }
 0x5df   :  { %v5391_v12 = vpop.eup %4639  ;;  %v755_v13 = vpop.permute.xlu1 %754  ;;  %4323 = vmatpush3.msra.mxu0 %v757_v10 }
 0x5e0   :  { %4324 = vmatprep.subr.mxu0 %v755_v13  ;;  %v738_v14 = vsel %vm707_vm6, %v5391_v12, 0.0 }
 0x5e1   :  { %739 = vadd.xlane.f32.xlu0 %v738_v14  ;;  %4325 = vmatpush3.msra.mxu0 %v755_v13  ;;  %v1037_v28 = vpop.permute.xlu0 %1036 }
 0x5e3   :  { %v753_v15 = vpop.permute.xlu1 %752 }
 0x5e4   :  { %4326 = vmatprep.subr.mxu0 %v753_v15 }
 0x5e5   :  { %v5395_v16 = vpop.eup %4641  ;;  %4327 = vmatpush3.msra.mxu0 %v753_v15  ;;  %v1179_v32 = vpop.permute.xlu0 %1178 }
 0x5e6   :  { %v1017_v17 = vsel %vm707_vm6, %v5395_v16, 0.0 }
 0x5e7   :  { %v4644_v18 = vpop.eup %4643  ;;  %v1041_v19 = vpop.permute.xlu1 %1040  ;;  %1018 = vadd.xlane.f32.xlu1 %v1017_v17 }
 0x5e8   :  { %4348 = vmatprep.subr.mxu0 %v1041_v19  ;;  %v1014_v20 = vsel %vm707_vm6, %v4644_v18, 0.0 }
 0x5e9   :  { %v5400_v21 = vpop.eup %4645  ;;  %1015 = vadd.xlane.f32.xlu0 %v1014_v20 }
 0x5ea   :  { %v1023_v22 = vsel %vm707_vm6, %v5400_v21, 0.0 }
 0x5eb   :  { %v5404_v23 = vpop.eup %4647  ;;  %v1039_v26 = vpop.permute.xlu1 %1038 }
 0x5ec   :  { %v1020_v24 = vsel %vm707_vm6, %v5404_v23, 0.0 }
 0x5ed   :  { %1024 = vadd.xlane.f32.xlu0 %v1023_v22 }
 0x5ef   :  { %v1035_v29 = vpop.permute.xlu1 %1034 }
 0x5f1   :  { %1021 = vadd.xlane.f32.xlu0 %v1020_v24 }
 0x5f8   :  { %1176 = vrot.lane.b32.xlu1 %v5269_v42, %s6090_s5 }
 0x5fc   :  { %1172 = vrot.lane.b32.xlu1 %v5261_v38, %s6090_s5 }
 0x600   :  { %1166 = vrot.lane.b32.xlu1 %v5267_v40, %s6088_s27 }
 0x604   :  { %1170 = vrot.lane.b32.xlu1 %v5273_v44, %s6088_s27 }
 0x607   :  { %1174 = vrot.lane.b32.xlu0 %v5267_v40, %s6090_s5 }
 0x60b   :  { %1164 = vrot.lane.b32.xlu0 %v5261_v38, %s6088_s27 }
 0x60f   :  { %1168 = vrot.lane.b32.xlu0 %v5269_v42, %s6088_s27 }
 0x660   :  { %v737_v33 = vpop.xlane.xlu1 %736 }
 0x661   :  { %4649 = vrcp.f32 %v737_v33 }
 0x662   :  { %v734_v34 = vpop.xlane.xlu0 %733 }
 0x663   :  { %4651 = vrcp.f32 %v734_v34 }
 0x666   :  { %v743_v35 = vpop.xlane.xlu1 %742 }
 0x667   :  { %4653 = vrcp.f32 %v743_v35 }
 0x66a   :  { %v740_v44 = vpop.xlane.xlu0 %739 }
 0x66b   :  { %4655 = vrcp.f32 %v740_v44 }
 0x66e   :  { %v4650_v36 = vpop.eup %4649 }
 0x66f   :  { %v747_v39 = vmul.f32 %v4650_v36, %v5379_v53 }
 0x670   :  { %v4652_v40 = vpop.eup %4651  ;;  %v1019_v37 = vpop.xlane.xlu1 %1018 }
 0x671   :  { %v745_v38 = vmul.f32 %v4652_v40, %v5383_v58  ;;  %4657 = vrcp.f32 %v1019_v37 }
 0x672   :  { %v1016_v42 = vpop.xlane.xlu0 %1015 }
 0x673   :  { %4659 = vrcp.f32 %v1016_v42  ;;  %4328 = vmatprep.mubr.msk.f32.mxu0 %vm707_vm6, %v745_v38 }
 0x674   :  { %4329 = vmatmul.mubr.msk.f32.vlgmr.msra.gmra.mxu0 %vm707_vm6, %v747_v39  ;;  %v4654_v43 = vpop.eup %4653  ;;  %v1177_v53 = vpop.permute.xlu1 %1176 }
 0x675   :  { %4349 = vmatpush3.msra.mxu0 %v1041_v19  ;;  %v751_v48 = vmul.f32 %v4654_v43, %v5387_v6 }
 0x676   :  { %4350 = vmatprep.subr.mxu0 %v1039_v26  ;;  %v1025_v41 = vpop.xlane.xlu0 %1024 }
 0x677   :  { %4351 = vmatpush3.msra.mxu0 %v1039_v26  ;;  %4661 = vrcp.f32 %v1025_v41 }
 0x678   :  { %v4656_v45 = vpop.eup %4655  ;;  %4352 = vmatprep.subr.mxu0 %v1037_v28  ;;  %v1173_v60 = vpop.permute.xlu1 %1172 }
 0x679   :  { %4353 = vmatpush3.msra.mxu0 %v1037_v28  ;;  %v749_v46 = vmul.f32 %v4656_v45, %v5391_v12 }
 0x67a   :  { %4354 = vmatprep.subr.mxu0 %v1035_v29  ;;  %v1022_v47 = vpop.xlane.xlu0 %1021 }
 0x67b   :  { %4355 = vmatpush3.msra.mxu0 %v1035_v29  ;;  %4663 = vrcp.f32 %v1022_v47  ;;  %4331 = vmatprep.mubr.msk.f32.mxu0 %vm707_vm6, %v749_v46 }
 0x67c   :  { %4362 = vmatprep.subr.msk.mxu0 %vm597_vm5, %v1179_v32  ;;  %4332 = vmatmul.mubr.msk.f32.gmra.mxu0 %vm707_vm6, %v751_v48  ;;  %v1167_v63 = vpop.permute.xlu1 %1166 }
 0x67e   :  { %v4658_v49 = vpop.eup %4657  ;;  %v1175_v54 = vpop.permute.xlu0 %1174 }
 0x67f   :  { %v1029_v52 = vmul.f32 %v4658_v49, %v5395_v16 }
 0x680   :  { %v4660_v50 = vpop.eup %4659  ;;  %v1171_v1 = vpop.permute.xlu1 %1170 }
 0x681   :  { %v1027_v51 = vmul.f32 %v4660_v50, %v4644_v18 }
 0x682   :  { %v1165_v61 = vpop.permute.xlu0 %1164 }
 0x683   :  { %4356 = vmatprep.mubr.msk.f32.mxu0 %vm707_vm6, %v1027_v51 }
 0x684   :  { %4357 = vmatmul.mubr.msk.f32.vlgmr.msra.gmra.mxu0 %vm707_vm6, %v1029_v52  ;;  %v4662_v55 = vpop.eup %4661 }
 0x685   :  { %4363 = vmatpush3.xpose.msk.msra.mxu0 %vm597_vm5, %v1179_v32  ;;  %v1033_v58 = vmul.f32 %v4662_v55, %v5400_v21 }
 0x686   :  { %4364 = vmatprep.subr.msk.mxu0 %vm597_vm5, %v1177_v53  ;;  %v1169_v0 = vpop.permute.xlu0 %1168 }
 0x688   :  { %v4664_v56 = vpop.eup %4663 }
 0x689   :  { %4365 = vmatpush3.xpose.msk.msra.mxu0 %vm597_vm5, %v1177_v53  ;;  %v1031_v57 = vmul.f32 %v4664_v56, %v5404_v23 }
 0x68a   :  { %4366 = vmatprep.subr.msk.mxu0 %vm597_vm5, %v1175_v54 }
 0x68b   :  { %4359 = vmatprep.mubr.msk.f32.mxu0 %vm707_vm6, %v1031_v57 }
 0x68c   :  { %4360 = vmatmul.mubr.msk.f32.gmra.mxu0 %vm707_vm6, %v1033_v58 }
 0x68d   :  { %4367 = vmatpush3.xpose.msk.msra.mxu0 %vm597_vm5, %v1175_v54  ;;  %4370 = vmatprep.mubr.msk.f32.mxu0 %vm597_vm5, %v1165_v61 }
 0x68e   :  { %4368 = vmatprep.subr.msk.mxu0 %vm597_vm5, %v1173_v60 }
 0x691   :  { %4369 = vmatpush3.xpose.msk.msra.mxu0 %vm597_vm5, %v1173_v60 }
 0x694   :  { %4371 = vmatmul.mubr.msk.f32.vlgmr.msra.gmra.mxu0 %vm597_vm5, %v1167_v63 }
 0x695   :  { %4373 = vmatprep.mubr.msk.f32.mxu0 %vm597_vm5, %v1169_v0 }
 0x698   :  { %4374 = vmatmul.mubr.msk.f32.gmra.mxu0 %vm597_vm5, %v1171_v1 }
 0x734   :  { %v4330_v4 = vpop.f32.mrf.mxu0 }
 0x735   :  { %862 = vst.msk [vmem:[#allocation2 + $0x8] sm:$0xff] %vm597_vm5, %v4330_v4  ;;  %v1460_v4 = vld [vmem:[#allocation6 + $0x28] sm:$0xff] }
 0x736   :  { %v842_v5 = vpop.f32.mrf.mxu0  ;;  %4390 = vmatprep.subr.mxu1 %v1460_v4 }
 0x737   :  { %861 = vst.msk [vmem:[#allocation2] sm:$0xff] %vm597_vm5, %v842_v5  ;;  %v1459_v5 = vld [vmem:[#allocation6 + $0x20] sm:$0xff] }
 0x73c   :  { %v4333_v6 = vpop.f32.mrf.mxu0 }
 0x73d   :  { %864 = vst.msk [vmem:[#allocation2 + $0x18] sm:$0xff] %vm597_vm5, %v4333_v6  ;;  %v1458_v6 = vld [vmem:[#allocation6 + $0x18] sm:$0xff] }
 0x73e   :  { %v852_v7 = vpop.f32.mrf.mxu0 }
 0x73f   :  { %863 = vst.msk [vmem:[#allocation2 + $0x10] sm:$0xff] %vm597_vm5, %v852_v7  ;;  %v1457_v7 = vld [vmem:[#allocation6 + $0x10] sm:$0xff] }
 0x744   :  { %v4358_v8 = vpop.f32.mrf.mxu0 }
 0x746   :  { %v1124_v9 = vpop.f32.mrf.mxu0 }
 0x74c   :  { %v5453_v10 = vpop.f32.mrf.mxu0 }
 0x74e   :  { %v1134_v12 = vpop.f32.mrf.mxu0 }
 0x754   :  { %v4372_v13 = vpop.f32.mrf.mxu0 }
 0x755   :  { %v1282_v14 = vmul.f32 0.25, %v4372_v13 }
 0x756   :  { %v1262_v15 = vpop.f32.mrf.mxu0 }
 0x757   :  { %v1281_v16 = vmul.f32 0.25, %v1262_v15  ;;  %v1286_v17 = vadd.f32 %v1282_v14, %v5328_v59 }
 0x758   :  { %v4375_v18 = vpop.f32.mrf.mxu0 }
 0x759   :  { %v1292_v19 = vsel %vm707_vm6, %v1286_v17, -inf  ;;  %v1285_v20 = vadd.f32 %v1281_v16, %v5333_v62  ;;  %v1284_v22 = vmul.f32 0.25, %v4375_v18 }
 0x75a   :  { %1293 = vmax.xlane.f32.xlu1 %v1292_v19  ;;  %v1272_v21 = vpop.f32.mrf.mxu0 }
 0x75b   :  { %v1283_v23 = vmul.f32 0.25, %v1272_v21  ;;  %v1289_v24 = vsel %vm707_vm6, %v1285_v20, -inf  ;;  %v1288_v29 = vadd.f32 %v1284_v22, %v5339_v2 }
 0x75c   :  { %1290 = vmax.xlane.f32.xlu0 %v1289_v24  ;;  %v3987_v24 = vld [vmem:[%s6115_s15] ss:$0 sm:$0xff] }
 0x75d   :  { %v1287_v26 = vadd.f32 %v1283_v23, %v5348_v11  ;;  %v1298_v59 = vsel %vm707_vm6, %v1288_v29, -inf }
 0x75f   :  { %v1295_v28 = vsel %vm707_vm6, %v1287_v26, -inf }
 0x760   :  { %1296 = vmax.xlane.f32.xlu0 %v1295_v28 }
 0x764   :  { %1299 = vmax.xlane.f32.xlu0 %v1298_v59 }
 0x7e3   :  { %v1294_v32 = vpop.xlane.xlu1 %1293 }
 0x7e4   :  { %v1302_v33 = vsub.f32 %v1286_v17, %v1294_v32 }
 0x7e5   :  { %v1291_v62 = vpop.xlane.xlu0 %1290 }
 0x7e6   :  { %v1307_v34 = vmul.f32 1.442695, %v1302_v33  ;;  %v1301_v35 = vsub.f32 %v1285_v20, %v1291_v62 }
 0x7e8   :  { %4665 = vpow2.f32 %v1307_v34  ;;  %v1305_v44 = vmul.f32 1.442695, %v1301_v35 }
 0x7e9   :  { %v1297_v36 = vpop.xlane.xlu0 %1296 }
 0x7ea   :  { %4667 = vpow2.f32 %v1305_v44  ;;  %v1303_v40 = vsub.f32 %v1287_v26, %v1297_v36 }
 0x7ec   :  { %v1309_v37 = vmul.f32 1.442695, %v1303_v40 }
 0x7ed   :  { %v1300_v11 = vpop.xlane.xlu0 %1299 }
 0x7ee   :  { %4669 = vpow2.f32 %v1309_v37  ;;  %v1304_v38 = vsub.f32 %v1288_v29, %v1300_v11 }
 0x7f0   :  { %v1311_v39 = vmul.f32 1.442695, %v1304_v38 }
 0x7f2   :  { %4671 = vpow2.f32 %v1311_v39 }
 0x7f5   :  { %v4666_v2 = vpop.eup %4665 }
 0x7f6   :  { %v1316_v42 = vsel %vm707_vm6, %v4666_v2, 0.0 }
 0x7f7   :  { %v4668_v41 = vpop.eup %4667  ;;  %1317 = vadd.xlane.f32.xlu1 %v1316_v42 }
 0x7f8   :  { %v1313_v43 = vsel %vm707_vm6, %v4668_v41, 0.0 }
 0x7f9   :  { %1314 = vadd.xlane.f32.xlu0 %v1313_v43 }
 0x7fb   :  { %v4670_v45 = vpop.eup %4669 }
 0x7fc   :  { %v1319_v46 = vsel %vm707_vm6, %v4670_v45, 0.0 }
 0x7fd   :  { %1320 = vadd.xlane.f32.xlu0 %v1319_v46 }
 0x7ff   :  { %v4672_v47 = vpop.eup %4671 }
 0x800   :  { %v1322_v48 = vsel %vm707_vm6, %v4672_v47, 0.0 }
 0x801   :  { %1323 = vadd.xlane.f32.xlu1 %v1322_v48 }
 0x812   :  { %1149 = vrot.lane.b32.xlu1 %v4358_v8, %s6092_s10  ;;  %v1456_v8 = vld [vmem:[#allocation6 + $0x8] sm:$0xff] }
 0x813   :  { %1147 = vrot.lane.b32.xlu0 %v1124_v9, %s6092_s10  ;;  %v1455_v9 = vld [vmem:[#allocation6] sm:$0xff] }
 0x817   :  { %1151 = vrot.lane.b32.xlu0 %v1134_v12, %s6092_s10 }
 0x880   :  { %v1318_v49 = vpop.xlane.xlu1 %1317 }
 0x881   :  { %4673 = vrcp.f32 %v1318_v49 }
 0x882   :  { %v1315_v50 = vpop.xlane.xlu0 %1314 }
 0x883   :  { %4675 = vrcp.f32 %v1315_v50 }
 0x886   :  { %v1321_v51 = vpop.xlane.xlu0 %1320 }
 0x887   :  { %4677 = vrcp.f32 %v1321_v51 }
 0x88a   :  { %v1324_v52 = vpop.xlane.xlu1 %1323  ;;  %v1148_v53 = vpop.permute.xlu0 %1147 }
 0x88b   :  { %4679 = vrcp.f32 %v1324_v52  ;;  %1160 = vst.msk [vmem:[#allocation2] sm:$0xff] %vm1159_vm7, %v1148_v53 }
 0x88e   :  { %v1150_v54 = vpop.permute.xlu1 %1149  ;;  %v1152_v55 = vpop.permute.xlu0 %1151 }
 0x88f   :  { %v4674_v56 = vpop.eup %4673  ;;  %1161 = vst.msk [vmem:[#allocation2 + $0x8] sm:$0xff] %vm1159_vm7, %v1150_v54  ;;  %1162 = vst.msk [vmem:[#allocation2 + $0x10] sm:$0xff] %vm1159_vm7, %v1152_v55 }
 0x890   :  { %v4676_v57 = vpop.eup %4675  ;;  %v1328_v60 = vmul.f32 %v4674_v56, %v4666_v2 }
 0x891   :  { %v1326_v58 = vmul.f32 %v4676_v57, %v4668_v41 }
 0x893   :  { %4384 = vmatprep.mubr.msk.f32.mxu1 %vm707_vm6, %v1326_v58 }
 0x894   :  { %v4678_v61 = vpop.eup %4677  ;;  %4385 = vmatmul.mubr.msk.f32.vlgmr.msra.gmra.mxu1 %vm707_vm6, %v1328_v60 }
 0x895   :  { %v1330_v63 = vmul.f32 %v4678_v61, %v4670_v45  ;;  %4391 = vmatpush3.msra.mxu1 %v1460_v4 }
 0x896   :  { %4392 = vmatprep.subr.mxu1 %v1459_v5 }
 0x897   :  { %4387 = vmatprep.mubr.msk.f32.mxu1 %vm707_vm6, %v1330_v63  ;;  %4393 = vmatpush3.msra.mxu1 %v1459_v5 }
 0x898   :  { %v4680_v0 = vpop.eup %4679  ;;  %4394 = vmatprep.subr.mxu1 %v1458_v6 }
 0x899   :  { %v1332_v1 = vmul.f32 %v4680_v0, %v4672_v47  ;;  %4395 = vmatpush3.msra.mxu1 %v1458_v6 }
 0x89a   :  { %4396 = vmatprep.subr.mxu1 %v1457_v7 }
 0x89b   :  { %4388 = vmatmul.mubr.msk.f32.gmra.mxu1 %vm707_vm6, %v1332_v1 }
 0x89c   :  { %4397 = vmatpush3.msra.mxu1 %v1457_v7 }
 0x89d   :  { %4398 = vmatprep.subr.mxu1 %v1456_v8 }
 0x89e   :  { %4399 = vmatpush3.msra.mxu1 %v1456_v8 }
 0x89f   :  { %4400 = vmatprep.subr.mxu1 %v1455_v9 }
 0x8a0   :  { %4401 = vmatpush3.msra.mxu1 %v1455_v9 }
 0x954   :  { %v4386_v12 = vpop.f32.mrf.mxu1 }
 0x956   :  { %v1411_v13 = vpop.f32.mrf.mxu1 }
 0x957   :  { %1434 = vrot.lane.b32.xlu1 %v1411_v13, %s4967_s2 }
 0x95b   :  { %1436 = vrot.lane.b32.xlu1 %v4386_v12, %s4967_s2  ;;  %v4389_v14 = vpop.f32.mrf.mxu1  ;;  %v3992_v12 = vld [vmem:[%s6063_s11] ss:$0 sm:$0xff] }
 0x95d   :  { %v1421_v15 = vpop.f32.mrf.mxu1 }
 0x95e   :  { %1438 = vrot.lane.b32.xlu0 %v1421_v15, %s4967_s2  ;;  %v3993_v15 = vld [vmem:[%s6064_s12] ss:$0 sm:$0xff] }
 0x95f   :  { %1153 = vrot.lane.b32.xlu1 %v5453_v10, %s6092_s10 }
 0x963   :  { %1440 = vrot.lane.b32.xlu1 %v4389_v14, %s4967_s2 }
 0x9c9   :  { %v1435_v16 = vpop.permute.xlu1 %1434 }
 0x9ca   :  { %1447 = vst.msk [vmem:[#allocation2] sm:$0xff] %vm1446_vm8, %v1435_v16 }
 0x9cd   :  { %v1437_v17 = vpop.permute.xlu1 %1436 }
 0x9ce   :  { %1448 = vst.msk [vmem:[#allocation2 + $0x8] sm:$0xff] %vm1446_vm8, %v1437_v17 }
 0x9d0   :  { %v1439_v18 = vpop.permute.xlu0 %1438 }
 0x9d1   :  { %1449 = vst.msk [vmem:[#allocation2 + $0x10] sm:$0xff] %vm1446_vm8, %v1439_v18  ;;  %v1154_v19 = vpop.permute.xlu1 %1153  ;;  %v1451_v20 = vld [vmem:[#allocation2] sm:$0xff] }
 0x9d2   :  { %1163 = vst.msk [vmem:[#allocation2 + $0x18] sm:$0xff] %vm1159_vm7, %v1154_v19  ;;  %4402 = vmatprep.mubr.msk.f32.mxu1 %vm398_vm4, %v1451_v20 }
 0x9d5   :  { %v1441_v21 = vpop.permute.xlu1 %1440  ;;  %v1452_v10 = vld [vmem:[#allocation2 + $0x8] sm:$0xff] }
 0x9d6   :  { %1450 = vst.msk [vmem:[#allocation2 + $0x18] sm:$0xff] %vm1446_vm8, %v1441_v21  ;;  %4403 = vmatmul.mubr.msk.f32.vlgmr.msra.gmra.mxu1 %vm398_vm4, %v1452_v10 }
 0x9d8   :  { %v1453_v22 = vld [vmem:[#allocation2 + $0x10] sm:$0xff] }
 0x9d9   :  { %4405 = vmatprep.mubr.msk.f32.mxu1 %vm398_vm4, %v1453_v22 }
 0x9dd   :  { %v1454_v23 = vld [vmem:[#allocation2 + $0x18] sm:$0xff] }
 0x9de   :  { %4406 = vmatmul.mubr.msk.f32.gmra.mxu1 %vm398_vm4, %v1454_v23 }
 0xa96   :  { %v4404_v26 = vpop.f32.mrf.mxu1 }
 0xa97   :  { %v1552_v28 = vadd.f32 %v4404_v26, %v3987_v24 }
 0xa98   :  { %v1546_v29 = vpop.f32.mrf.mxu1 }
 0xa99   :  { %v1547_v59 = vadd.f32 %v3987_v24, %v1546_v29  ;;  %v1570_v32 = vsel %vm398_vm4, %v1552_v28, 0.0 }
 0xa9a   :  { %1571 = vadd.xlane.f32.xlu1 %v1570_v32 }
 0xa9b   :  { %v1567_v33 = vsel %vm398_vm4, %v1547_v59, 0.0 }
 0xa9c   :  { %1568 = vadd.xlane.f32.xlu0 %v1567_v33 }
 0xa9e   :  { %v4407_v62 = vpop.f32.mrf.mxu1 }
 0xa9f   :  { %v1562_v44 = vadd.f32 %v4407_v62, %v3987_v24 }
 0xaa0   :  { %v1556_v34 = vpop.f32.mrf.mxu1 }
 0xaa1   :  { %v1557_v35 = vadd.f32 %v3987_v24, %v1556_v34  ;;  %v1576_v40 = vsel %vm398_vm4, %v1562_v44, 0.0 }
 0xaa3   :  { %v1573_v36 = vsel %vm398_vm4, %v1557_v35, 0.0 }
 0xaa4   :  { %1574 = vadd.xlane.f32.xlu0 %v1573_v36 }
 0xaa8   :  { %1577 = vadd.xlane.f32.xlu0 %v1576_v40 }
 0xb23   :  { %v1572_v37 = vpop.xlane.xlu1 %1571 }
 0xb24   :  { %v1580_v11 = vmul.f32 0.020833334, %v1572_v37 }
 0xb25   :  { %v1569_v38 = vpop.xlane.xlu0 %1568 }
 0xb26   :  { %v1584_v39 = vsub.f32 %v1552_v28, %v1580_v11  ;;  %v1579_v2 = vmul.f32 0.020833334, %v1569_v38 }
 0xb28   :  { %v1583_v42 = vsub.f32 %v1547_v59, %v1579_v2  ;;  %v1588_v41 = vmul.f32 %v1584_v39, %v1584_v39 }
 0xb2a   :  { %v1594_v43 = vsel %vm398_vm4, %v1588_v41, 0.0  ;;  %v1587_v45 = vmul.f32 %v1583_v42, %v1583_v42 }
 0xb2b   :  { %1595 = vadd.xlane.f32.xlu1 %v1594_v43 }
 0xb2c   :  { %v1591_v46 = vsel %vm398_vm4, %v1587_v45, 0.0 }
 0xb2d   :  { %1592 = vadd.xlane.f32.xlu0 %v1591_v46  ;;  %v1575_v47 = vpop.xlane.xlu0 %1574 }
 0xb2e   :  { %v1581_v48 = vmul.f32 0.020833334, %v1575_v47 }
 0xb30   :  { %v1585_v49 = vsub.f32 %v1557_v35, %v1581_v48 }
 0xb31   :  { %v1578_v50 = vpop.xlane.xlu0 %1577 }
 0xb32   :  { %v1582_v51 = vmul.f32 0.020833334, %v1578_v50  ;;  %v1589_v52 = vmul.f32 %v1585_v49, %v1585_v49 }
 0xb34   :  { %v1586_v53 = vsub.f32 %v1562_v44, %v1582_v51  ;;  %v1597_v54 = vsel %vm398_vm4, %v1589_v52, 0.0  ;;  %v1722_v52 = vld [vmem:[#allocation8 + $0x28] sm:$0xff] }
 0xb35   :  { %1598 = vadd.xlane.f32.xlu0 %v1597_v54  ;;  %4408 = vmatprep.subr.mxu0 %v1722_v52  ;;  %v1720_v54 = vld [vmem:[#allocation8 + $0x18] sm:$0xff] }
 0xb36   :  { %v1590_v55 = vmul.f32 %v1586_v53, %v1586_v53  ;;  %4409 = vmatpush3.msra.mxu0 %v1722_v52 }
 0xb38   :  { %v1600_v56 = vsel %vm398_vm4, %v1590_v55, 0.0  ;;  %v1719_v55 = vld [vmem:[#allocation8 + $0x10] sm:$0xff] }
 0xb39   :  { %1601 = vadd.xlane.f32.xlu1 %v1600_v56  ;;  %v1718_v56 = vld [vmem:[#allocation8 + $0x8] sm:$0xff] }
 0xbb4   :  { %v1596_v57 = vpop.xlane.xlu1 %1595 }
 0xbb5   :  { %v1604_v58 = vmul.f32 0.020833334, %v1596_v57  ;;  %v1717_v57 = vld [vmem:[#allocation8] sm:$0xff] }
 0xbb6   :  { %v1593_v60 = vpop.xlane.xlu0 %1592 }
 0xbb7   :  { %v1608_v61 = vadd.f32 1e-05, %v1604_v58  ;;  %v1603_v63 = vmul.f32 0.020833334, %v1593_v60 }
 0xbb9   :  { %4681 = vrsqrt.f32 %v1608_v61  ;;  %v1607_v0 = vadd.f32 1e-05, %v1603_v63 }
 0xbbb   :  { %4683 = vrsqrt.f32 %v1607_v0 }
 0xbbe   :  { %v1599_v1 = vpop.xlane.xlu0 %1598 }
 0xbbf   :  { %v1605_v4 = vmul.f32 0.020833334, %v1599_v1 }
 0xbc1   :  { %v1609_v5 = vadd.f32 1e-05, %v1605_v4 }
 0xbc2   :  { %v1602_v6 = vpop.xlane.xlu1 %1601 }
 0xbc3   :  { %4685 = vrsqrt.f32 %v1609_v5  ;;  %v1606_v7 = vmul.f32 0.020833334, %v1602_v6 }
 0xbc5   :  { %v1610_v8 = vadd.f32 1e-05, %v1606_v7 }
 0xbc6   :  { %v4682_v9 = vpop.eup %4681 }
 0xbc7   :  { %4687 = vrsqrt.f32 %v1610_v8  ;;  %v1616_v13 = vmul.f32 %v4682_v9, %v1584_v39 }
 0xbc8   :  { %v4684_v14 = vpop.eup %4683 }
 0xbc9   :  { %v1626_v16 = vmul.f32 %v3992_v12, %v1616_v13  ;;  %v1615_v17 = vmul.f32 %v4684_v14, %v1583_v42  ;;  %v3994_v14 = vld [vmem:[%s6065_s13] ss:$0 sm:$0xff] }
 0xbcb   :  { %v1636_v18 = vadd.f32 %v3993_v15, %v1626_v16  ;;  %v1625_v19 = vmul.f32 %v3992_v12, %v1615_v17 }
 0xbcd   :  { %v5510_v20 = vadd.f32 %v1636_v18, %v5169_v27  ;;  %v1635_v21 = vadd.f32 %v3993_v15, %v1625_v19  ;;  %v3995_v18 = vld [vmem:[%s6066_s14] ss:$0 sm:$0xff] }
 0xbcf   :  { %v1648_v10 = vsel %vm398_vm4, %v5510_v20, 0.0  ;;  %v5515_v22 = vadd.f32 %v1635_v21, %v5167_v25 }
 0xbd0   :  { %v4686_v23 = vpop.eup %4685  ;;  %1649 = vadd.xlane.f32.xlu1 %v1648_v10 }
 0xbd1   :  { %v1645_v24 = vsel %vm398_vm4, %v5515_v22, 0.0  ;;  %v1617_v26 = vmul.f32 %v4686_v23, %v1585_v49 }
 0xbd2   :  { %1646 = vadd.xlane.f32.xlu0 %v1645_v24 }
 0xbd3   :  { %v1627_v28 = vmul.f32 %v3992_v12, %v1617_v26 }
 0xbd4   :  { %v4688_v29 = vpop.eup %4687 }
 0xbd5   :  { %v1637_v59 = vadd.f32 %v3993_v15, %v1627_v28  ;;  %v1618_v32 = vmul.f32 %v4688_v29, %v1586_v53  ;;  %v1721_v53 = vld [vmem:[#allocation8 + $0x20] sm:$0xff] }
 0xbd6   :  { %4410 = vmatprep.subr.mxu0 %v1721_v53 }
 0xbd7   :  { %v5520_v27 = vadd.f32 %v1637_v59, %v5173_v30  ;;  %v1628_v33 = vmul.f32 %v3992_v12, %v1618_v32  ;;  %4411 = vmatpush3.msra.mxu0 %v1721_v53 }
 0xbd8   :  { %4412 = vmatprep.subr.mxu0 %v1720_v54 }
 0xbd9   :  { %v1651_v62 = vsel %vm398_vm4, %v5520_v27, 0.0  ;;  %v1638_v25 = vadd.f32 %v3993_v15, %v1628_v33  ;;  %4413 = vmatpush3.msra.mxu0 %v1720_v54 }
 0xbda   :  { %1652 = vadd.xlane.f32.xlu0 %v1651_v62  ;;  %4414 = vmatprep.subr.mxu0 %v1719_v55  ;;  %v3996_v62 = vld [vmem:[%s6068_s16] ss:$0 sm:$0xff] }
 0xbdb   :  { %v5525_v34 = vadd.f32 %v1638_v25, %v5175_v31  ;;  %4415 = vmatpush3.msra.mxu0 %v1719_v55 }
 0xbdc   :  { %4416 = vmatprep.subr.mxu0 %v1718_v56 }
 0xbdd   :  { %v1654_v35 = vsel %vm398_vm4, %v5525_v34, 0.0  ;;  %4417 = vmatpush3.msra.mxu0 %v1718_v56 }
 0xbde   :  { %1655 = vadd.xlane.f32.xlu1 %v1654_v35  ;;  %4418 = vmatprep.subr.mxu0 %v1717_v57 }
 0xbdf   :  { %4419 = vmatpush3.msra.mxu0 %v1717_v57 }
 0xc59   :  { %v1650_v44 = vpop.xlane.xlu1 %1649 }
 0xc5a   :  { %v1658_v36 = vmul.f32 0.020833334, %v1650_v44 }
 0xc5b   :  { %v1647_v40 = vpop.xlane.xlu0 %1646 }
 0xc5c   :  { %v1662_v37 = vsub.f32 %v5510_v20, %v1658_v36  ;;  %v1657_v30 = vmul.f32 0.020833334, %v1647_v40 }
 0xc5e   :  { %v1661_v11 = vsub.f32 %v5515_v22, %v1657_v30  ;;  %v1666_v38 = vmul.f32 %v1662_v37, %v1662_v37 }
 0xc60   :  { %v1672_v39 = vsel %vm398_vm4, %v1666_v38, 0.0  ;;  %v1665_v2 = vmul.f32 %v1661_v11, %v1661_v11 }
 0xc61   :  { %1673 = vadd.xlane.f32.xlu1 %v1672_v39 }
 0xc62   :  { %v1669_v31 = vsel %vm398_vm4, %v1665_v2, 0.0 }
 0xc63   :  { %1670 = vadd.xlane.f32.xlu0 %v1669_v31  ;;  %v1653_v42 = vpop.xlane.xlu0 %1652 }
 0xc64   :  { %v1659_v41 = vmul.f32 0.020833334, %v1653_v42 }
 0xc66   :  { %v1663_v43 = vsub.f32 %v5520_v27, %v1659_v41 }
 0xc67   :  { %v1656_v45 = vpop.xlane.xlu1 %1655 }
 0xc68   :  { %v1660_v46 = vmul.f32 0.020833334, %v1656_v45  ;;  %v1667_v47 = vmul.f32 %v1663_v43, %v1663_v43 }
 0xc6a   :  { %v1664_v48 = vsub.f32 %v5525_v34, %v1660_v46  ;;  %v1675_v49 = vsel %vm398_vm4, %v1667_v47, 0.0 }
 0xc6b   :  { %1676 = vadd.xlane.f32.xlu0 %v1675_v49 }
 0xc6c   :  { %v1668_v50 = vmul.f32 %v1664_v48, %v1664_v48 }
 0xc6e   :  { %v1678_v51 = vsel %vm398_vm4, %v1668_v50, 0.0 }
 0xc6f   :  { %1679 = vadd.xlane.f32.xlu1 %v1678_v51 }
 0xcea   :  { %v1674_v58 = vpop.xlane.xlu1 %1673 }
 0xceb   :  { %v1682_v60 = vmul.f32 0.020833334, %v1674_v58 }
 0xcec   :  { %v1671_v61 = vpop.xlane.xlu0 %1670 }
 0xced   :  { %v1686_v63 = vadd.f32 1e-05, %v1682_v60  ;;  %v1681_v0 = vmul.f32 0.020833334, %v1671_v61 }
 0xcef   :  { %4689 = vrsqrt.f32 %v1686_v63  ;;  %v1685_v1 = vadd.f32 1e-05, %v1681_v0 }
 0xcf1   :  { %4691 = vrsqrt.f32 %v1685_v1 }
 0xcf4   :  { %v1677_v4 = vpop.xlane.xlu0 %1676 }
 0xcf5   :  { %v1683_v5 = vmul.f32 0.020833334, %v1677_v4 }
 0xcf7   :  { %v1687_v6 = vadd.f32 1e-05, %v1683_v5 }
 0xcf8   :  { %v1680_v7 = vpop.xlane.xlu1 %1679 }
 0xcf9   :  { %4693 = vrsqrt.f32 %v1687_v6  ;;  %v1684_v8 = vmul.f32 0.020833334, %v1680_v7  ;;  %v1914_v6 = vld [vmem:[#allocation9 + $0x38] sm:$0xff]  ;;  %v1913_v7 = vld [vmem:[#allocation9 + $0x30] sm:$0xff] }
 0xcfa   :  { %4426 = vmatprep.subr.mxu1 %v1914_v6 }
 0xcfb   :  { %v1688_v9 = vadd.f32 1e-05, %v1684_v8  ;;  %4427 = vmatpush3.msra.mxu1 %v1914_v6  ;;  %v1912_v8 = vld [vmem:[#allocation9 + $0x28] sm:$0xff] }
 0xcfc   :  { %v4690_v12 = vpop.eup %4689  ;;  %4428 = vmatprep.subr.mxu1 %v1913_v7 }
 0xcfd   :  { %v1694_v13 = vmul.f32 %v4690_v12, %v1662_v37  ;;  %4695 = vrsqrt.f32 %v1688_v9  ;;  %4429 = vmatpush3.msra.mxu1 %v1913_v7  ;;  %v1911_v9 = vld [vmem:[#allocation9 + $0x20] sm:$0xff]  ;;  %v1910_v12 = vld [vmem:[#allocation9 + $0x18] sm:$0xff] }
 0xcfe   :  { %v4692_v15 = vpop.eup %4691  ;;  %4430 = vmatprep.subr.mxu1 %v1912_v8 }
 0xcff   :  { %v1693_v16 = vmul.f32 %v4692_v15, %v1661_v11  ;;  %v1704_v17 = vmul.f32 %v3994_v14, %v1694_v13  ;;  %4431 = vmatpush3.msra.mxu1 %v1912_v8  ;;  %v1909_v13 = vld [vmem:[#allocation9 + $0x10] sm:$0xff]  ;;  %v1907_v15 = vld [vmem:[#allocation9] sm:$0xff] }
 0xd00   :  { %4432 = vmatprep.subr.mxu1 %v1911_v9 }
 0xd01   :  { %v1703_v19 = vmul.f32 %v3994_v14, %v1693_v16  ;;  %v1714_v10 = vadd.f32 %v3995_v18, %v1704_v17  ;;  %4433 = vmatpush3.msra.mxu1 %v1911_v9 }
 0xd02   :  { %4434 = vmatprep.subr.mxu1 %v1910_v12 }
 0xd03   :  { %v1713_v21 = vadd.f32 %v3995_v18, %v1703_v19  ;;  %4435 = vmatpush3.msra.mxu1 %v1910_v12 }
 0xd04   :  { %4436 = vmatprep.subr.mxu1 %v1909_v13 }
 0xd05   :  { %4420 = vmatprep.mubr.msk.f32.mxu0 %vm398_vm4, %v1713_v21  ;;  %4437 = vmatpush3.msra.mxu1 %v1909_v13 }
 0xd06   :  { %v4694_v23 = vpop.eup %4693  ;;  %4421 = vmatmul.mubr.msk.f32.vlgmr.msra.gmra.mxu0 %vm398_vm4, %v1714_v10 }
 0xd07   :  { %v1695_v24 = vmul.f32 %v4694_v23, %v1663_v43 }
 0xd09   :  { %v1705_v26 = vmul.f32 %v3994_v14, %v1695_v24 }
 0xd0a   :  { %v4696_v28 = vpop.eup %4695 }
 0xd0b   :  { %v1715_v29 = vadd.f32 %v3995_v18, %v1705_v26  ;;  %v1696_v59 = vmul.f32 %v4696_v28, %v1664_v48 }
 0xd0d   :  { %4423 = vmatprep.mubr.msk.f32.mxu0 %vm398_vm4, %v1715_v29  ;;  %v1706_v32 = vmul.f32 %v3994_v14, %v1696_v59  ;;  %v1908_v14 = vld [vmem:[#allocation9 + $0x8] sm:$0xff] }
 0xd0e   :  { %4438 = vmatprep.subr.mxu1 %v1908_v14 }
 0xd0f   :  { %v1716_v33 = vadd.f32 %v3995_v18, %v1706_v32  ;;  %4439 = vmatpush3.msra.mxu1 %v1908_v14 }
 0xd10   :  { %4440 = vmatprep.subr.mxu1 %v1907_v15 }
 0xd11   :  { %4424 = vmatmul.mubr.msk.f32.gmra.mxu0 %vm398_vm4, %v1716_v33  ;;  %4441 = vmatpush3.msra.mxu1 %v1907_v15 }
 0xd12   :  { %2188 = vmatprep.mubr.f32.mxu0 %v4963_v3 }
 0xdc6   :  { %v4422_v25 = vpop.f32.mrf.mxu0 }
 0xdc7   :  { %v1814_v35 = vadd.f32 %v4422_v25, %v3996_v62 }
 0xdc8   :  { %v1808_v44 = vpop.f32.mrf.mxu0 }
 0xdc9   :  { %v1828_v36 = vmax.f32 %v1814_v35, 0.0  ;;  %v1809_v40 = vadd.f32 %v3996_v62, %v1808_v44 }
 0xdcb   :  { %v1827_v37 = vmax.f32 %v1809_v40, 0.0  ;;  %v1837_v30 = vsel %vm1833_vm9, %v1828_v36, 0.0 }
 0xdcc   :  { %1838 = vadd.xlane.f32.xlu1 %v1837_v30 }
 0xdcd   :  { %v1834_v11 = vsel %vm1833_vm9, %v1827_v37, 0.0 }
 0xdce   :  { %1835 = vadd.xlane.f32.xlu0 %v1834_v11 }
 0xdd1   :  { %v4425_v38 = vpop.f32.mrf.mxu0 }
 0xdd2   :  { %v1824_v39 = vadd.f32 %v4425_v38, %v3996_v62 }
 0xdd3   :  { %v1818_v2 = vpop.f32.mrf.mxu0 }
 0xdd4   :  { %v1830_v31 = vmax.f32 %v1824_v39, 0.0  ;;  %v1819_v42 = vadd.f32 %v3996_v62, %v1818_v2  ;;  %v4001_v62 = vld [vmem:[%s6069_s17] ss:$0 sm:$0xff] }
 0xdd6   :  { %v1829_v41 = vmax.f32 %v1819_v42, 0.0  ;;  %v1843_v43 = vsel %vm1833_vm9, %v1830_v31, 0.0 }
 0xdd7   :  { %1844 = vadd.xlane.f32.xlu1 %v1843_v43 }
 0xdd8   :  { %v1840_v45 = vsel %vm1833_vm9, %v1829_v41, 0.0 }
 0xdd9   :  { %1841 = vadd.xlane.f32.xlu0 %v1840_v45  ;;  %v4003_v45 = vld [vmem:[%s6072_s20] ss:$0 sm:$0xff] }
 0xe55   :  { %v1839_v46 = vpop.xlane.xlu1 %1838 }
 0xe56   :  { %v1848_v47 = vmul.f32 0.015625, %v1839_v46 }
 0xe57   :  { %v1836_v48 = vpop.xlane.xlu0 %1835 }
 0xe58   :  { %v1852_v49 = vsub.f32 %v1828_v36, %v1848_v47  ;;  %v1847_v50 = vmul.f32 0.015625, %v1836_v48  ;;  %v4002_v36 = vld [vmem:[%s6070_s18] ss:$0 sm:$0xff] }
 0xe5a   :  { %v5555_v51 = vsub.f32 %v1827_v37, %v1847_v50  ;;  %v1856_v52 = vmul.f32 %v1852_v49, %v1852_v49 }
 0xe5c   :  { %v1862_v53 = vsel %vm1833_vm9, %v1856_v52, 0.0  ;;  %v1855_v54 = vmul.f32 %v5555_v51, %v5555_v51 }
 0xe5d   :  { %1863 = vadd.xlane.f32.xlu1 %v1862_v53 }
 0xe5e   :  { %v1859_v55 = vsel %vm1833_vm9, %v1855_v54, 0.0 }
 0xe5f   :  { %1860 = vadd.xlane.f32.xlu0 %v1859_v55 }
 0xe60   :  { %v1845_v56 = vpop.xlane.xlu1 %1844 }
 0xe61   :  { %v1850_v57 = vmul.f32 0.015625, %v1845_v56 }
 0xe62   :  { %v1842_v58 = vpop.xlane.xlu0 %1841 }
 0xe63   :  { %v1854_v60 = vsub.f32 %v1830_v31, %v1850_v57  ;;  %v1849_v61 = vmul.f32 0.015625, %v1842_v58 }
 0xe65   :  { %v1853_v63 = vsub.f32 %v1829_v41, %v1849_v61  ;;  %v1858_v0 = vmul.f32 %v1854_v60, %v1854_v60 }
 0xe67   :  { %v1868_v1 = vsel %vm1833_vm9, %v1858_v0, 0.0  ;;  %v1857_v4 = vmul.f32 %v1853_v63, %v1853_v63 }
 0xe68   :  { %1869 = vadd.xlane.f32.xlu1 %v1868_v1 }
 0xe69   :  { %v1865_v5 = vsel %vm1833_vm9, %v1857_v4, 0.0 }
 0xe6a   :  { %1866 = vadd.xlane.f32.xlu0 %v1865_v5 }
 0xee6   :  { %v1864_v16 = vpop.xlane.xlu1 %1863 }
 0xee7   :  { %v1872_v17 = vmul.f32 0.015625, %v1864_v16 }
 0xee8   :  { %v1861_v18 = vpop.xlane.xlu0 %1860 }
 0xee9   :  { %v1876_v19 = vadd.f32 1e-05, %v1872_v17  ;;  %v1871_v21 = vmul.f32 0.015625, %v1861_v18 }
 0xeeb   :  { %4697 = vrsqrt.f32 %v1876_v19  ;;  %v1875_v10 = vadd.f32 1e-05, %v1871_v21  ;;  %v4023_v21 = vld [vmem:[%s6111_s1 + $0xb8] sm:$0xff] }
 0xeec   :  { %2144 = vmatprep.subr.mxu0 %v4023_v21 }
 0xeed   :  { %4699 = vrsqrt.f32 %v1875_v10  ;;  %v4022_v10 = vld [vmem:[%s6111_s1 + $0xb0] sm:$0xff] }
 0xeee   :  { %2145 = vmatpush1.msra.mxu0 %v4022_v10 }
 0xef1   :  { %v1870_v23 = vpop.xlane.xlu1 %1869 }
 0xef2   :  { %v1874_v24 = vmul.f32 0.015625, %v1870_v23  ;;  %v4021_v23 = vld [vmem:[%s6111_s1 + $0xa8] sm:$0xff] }
 0xef3   :  { %v1867_v26 = vpop.xlane.xlu0 %1866  ;;  %2146 = vmatprep.subr.mxu0 %v4021_v23 }
 0xef4   :  { %v1878_v28 = vadd.f32 1e-05, %v1874_v24  ;;  %v1873_v29 = vmul.f32 0.015625, %v1867_v26  ;;  %v4020_v24 = vld [vmem:[%s6111_s1 + $0xa0] sm:$0xff]  ;;  %v4019_v26 = vld [vmem:[%s6111_s1 + $0x98] sm:$0xff] }
 0xef5   :  { %2147 = vmatpush1.msra.mxu0 %v4020_v24 }
 0xef6   :  { %4701 = vrsqrt.f32 %v1878_v28  ;;  %v1877_v59 = vadd.f32 1e-05, %v1873_v29  ;;  %2148 = vmatprep.subr.mxu0 %v4019_v26  ;;  %v4018_v28 = vld [vmem:[%s6111_s1 + $0x90] sm:$0xff]  ;;  %v4017_v29 = vld [vmem:[%s6111_s1 + $0x88] sm:$0xff] }
 0xef7   :  { %2149 = vmatpush1.msra.mxu0 %v4018_v28  ;;  %v5732_v28 = vld [vmem:[%s6114_s3 + $0x8] sm:$0xff] }
 0xef8   :  { %v4698_v32 = vpop.eup %4697  ;;  %4703 = vrsqrt.f32 %v1877_v59  ;;  %2150 = vmatprep.subr.mxu0 %v4017_v29  ;;  %v4016_v59 = vld [vmem:[%s6111_s1 + $0x80] sm:$0xff] }
 0xef9   :  { %v1884_v33 = vmul.f32 %v4698_v32, %v1852_v49  ;;  %2151 = vmatpush1.msra.mxu0 %v4016_v59  ;;  %v4015_v32 = vld [vmem:[%s6111_s1 + $0x78] sm:$0xff] }
 0xefa   :  { %v4700_v25 = vpop.eup %4699  ;;  %2152 = vmatprep.subr.mxu0 %v4015_v32 }
 0xefb   :  { %v1883_v35 = vmul.f32 %v4700_v25, %v5555_v51  ;;  %v1894_v44 = vmul.f32 %v4001_v62, %v1884_v33  ;;  %v4014_v33 = vld [vmem:[%s6111_s1 + $0x70] sm:$0xff]  ;;  %v4012_v25 = vld [vmem:[%s6111_s1 + $0x60] sm:$0xff] }
 0xefc   :  { %2153 = vmatpush1.msra.mxu0 %v4014_v33  ;;  %v5738_v33 = vld [vmem:[%s6114_s3] sm:$0xff] }
 0xefd   :  { %v1893_v40 = vmul.f32 %v4001_v62, %v1883_v35  ;;  %v1904_v30 = vadd.f32 %v4002_v36, %v1894_v44 }
 0xeff   :  { %v1903_v37 = vadd.f32 %v4002_v36, %v1893_v40 }
 0xf01   :  { %4442 = vmatprep.mubr.msk.f32.mxu1 %vm1833_vm9, %v1903_v37 }
 0xf02   :  { %4443 = vmatmul.mubr.msk.f32.vlgmr.msra.gmra.mxu1 %vm1833_vm9, %v1904_v30 }
 0xf03   :  { %v4702_v11 = vpop.eup %4701 }
 0xf04   :  { %v1886_v38 = vmul.f32 %v4702_v11, %v1854_v60 }
 0xf05   :  { %v4704_v39 = vpop.eup %4703 }
 0xf06   :  { %v1885_v2 = vmul.f32 %v4704_v39, %v1853_v63  ;;  %v1896_v31 = vmul.f32 %v4001_v62, %v1886_v38 }
 0xf08   :  { %v1895_v42 = vmul.f32 %v4001_v62, %v1885_v2  ;;  %v1906_v43 = vadd.f32 %v4002_v36, %v1896_v31  ;;  %v4013_v62 = vld [vmem:[%s6111_s1 + $0x68] sm:$0xff] }
 0xf09   :  { %2154 = vmatprep.subr.mxu0 %v4013_v62 }
 0xf0a   :  { %v1905_v41 = vadd.f32 %v4002_v36, %v1895_v42  ;;  %2155 = vmatpush1.msra.mxu0 %v4012_v25 }
 0xf0c   :  { %4445 = vmatprep.mubr.msk.f32.mxu1 %vm1833_vm9, %v1905_v41 }
 0xf0d   :  { %4446 = vmatmul.mubr.msk.f32.gmra.mxu1 %vm1833_vm9, %v1906_v43 }
 0xfc2   :  { %v4444_v46 = vpop.f32.mrf.mxu1 }
 0xfc3   :  { %v2006_v47 = vadd.f32 %v4444_v46, %v4003_v45 }
 0xfc4   :  { %v2000_v48 = vpop.f32.mrf.mxu1 }
 0xfc5   :  { %v5578_v49 = vadd.f32 %v2006_v47, %v5510_v20  ;;  %v2001_v50 = vadd.f32 %v4003_v45, %v2000_v48  ;;  %v4010_v47 = vld [vmem:[%s6112_s9 + $0x1] ss:$0 sm:$0xff] }
 0xfc7   :  { %v5581_v51 = vadd.f32 %v2001_v50, %v5515_v22  ;;  %v2030_v52 = vsel %vm398_vm4, %v5578_v49, 0.0  ;;  %v4011_v50 = vld [vmem:[%s6113_s6 + $0x1] ss:$0 sm:$0xff] }
 0xfc8   :  { %2031 = vadd.xlane.f32.xlu1 %v2030_v52 }
 0xfc9   :  { %v2027_v53 = vsel %vm398_vm4, %v5581_v51, 0.0 }
 0xfca   :  { %2028 = vadd.xlane.f32.xlu0 %v2027_v53 }
 0xfcd   :  { %v4447_v54 = vpop.f32.mrf.mxu1 }
 0xfce   :  { %v2016_v55 = vadd.f32 %v4447_v54, %v4003_v45 }
 0xfcf   :  { %v2010_v56 = vpop.f32.mrf.mxu1 }
 0xfd0   :  { %v5588_v57 = vadd.f32 %v2016_v55, %v5525_v34  ;;  %v2011_v20 = vadd.f32 %v4003_v45, %v2010_v56 }
 0xfd2   :  { %v5591_v58 = vadd.f32 %v2011_v20, %v5520_v27  ;;  %v2036_v22 = vsel %vm398_vm4, %v5588_v57, 0.0 }
 0xfd3   :  { %2037 = vadd.xlane.f32.xlu1 %v2036_v22 }
 0xfd4   :  { %v2033_v60 = vsel %vm398_vm4, %v5591_v58, 0.0 }
 0xfd5   :  { %2034 = vadd.xlane.f32.xlu0 %v2033_v60 }
0x1051   :  { %v2032_v61 = vpop.xlane.xlu1 %2031 }
0x1052   :  { %v2040_v63 = vmul.f32 0.020833334, %v2032_v61 }
0x1053   :  { %v2029_v0 = vpop.xlane.xlu0 %2028 }
0x1054   :  { %v5598_v1 = vsub.f32 %v5578_v49, %v2040_v63  ;;  %v2039_v34 = vmul.f32 0.020833334, %v2029_v0 }
0x1056   :  { %v2043_v4 = vsub.f32 %v5581_v51, %v2039_v34  ;;  %v2048_v27 = vmul.f32 %v5598_v1, %v5598_v1 }
0x1058   :  { %v2054_v5 = vsel %vm398_vm4, %v2048_v27, 0.0  ;;  %v2047_v6 = vmul.f32 %v2043_v4, %v2043_v4 }
0x1059   :  { %2055 = vadd.xlane.f32.xlu1 %v2054_v5 }
0x105a   :  { %v2051_v7 = vsel %vm398_vm4, %v2047_v6, 0.0 }
0x105b   :  { %2052 = vadd.xlane.f32.xlu0 %v2051_v7 }
0x105c   :  { %v2038_v8 = vpop.xlane.xlu1 %2037 }
0x105d   :  { %v2042_v9 = vmul.f32 0.020833334, %v2038_v8 }
0x105e   :  { %v2035_v12 = vpop.xlane.xlu0 %2034 }
0x105f   :  { %v5606_v13 = vsub.f32 %v5588_v57, %v2042_v9  ;;  %v2041_v14 = vmul.f32 0.020833334, %v2035_v12 }
0x1061   :  { %v5609_v15 = vsub.f32 %v5591_v58, %v2041_v14  ;;  %v2050_v16 = vmul.f32 %v5606_v13, %v5606_v13 }
0x1063   :  { %v2060_v17 = vsel %vm398_vm4, %v2050_v16, 0.0  ;;  %v2049_v18 = vmul.f32 %v5609_v15, %v5609_v15 }
0x1064   :  { %2061 = vadd.xlane.f32.xlu1 %v2060_v17 }
0x1065   :  { %v2057_v19 = vsel %vm398_vm4, %v2049_v18, 0.0 }
0x1066   :  { %2058 = vadd.xlane.f32.xlu0 %v2057_v19 }
0x10e2   :  { %v2056_v35 = vpop.xlane.xlu1 %2055 }
0x10e3   :  { %v2064_v44 = vmul.f32 0.020833334, %v2056_v35 }
0x10e4   :  { %v2053_v36 = vpop.xlane.xlu0 %2052 }
0x10e5   :  { %v2068_v40 = vadd.f32 1e-05, %v2064_v44  ;;  %v2063_v37 = vmul.f32 0.020833334, %v2053_v36  ;;  %v5745_v36 = vld [vmem:[%s6114_s3 + $0x18] sm:$0xff] }
0x10e7   :  { %4705 = vrsqrt.f32 %v2068_v40  ;;  %v2067_v30 = vadd.f32 1e-05, %v2063_v37 }
0x10e9   :  { %4707 = vrsqrt.f32 %v2067_v30 }
0x10ed   :  { %v2062_v11 = vpop.xlane.xlu1 %2061 }
0x10ee   :  { %v2066_v38 = vmul.f32 0.020833334, %v2062_v11  ;;  %v5752_v11 = vld [vmem:[%s6114_s3 + $0x10] sm:$0xff]  ;;  %s6116_s3 = smov 16  }
0x10ef   :  { %v2059_v39 = vpop.xlane.xlu0 %2058 }
0x10f0   :  { %v2070_v2 = vadd.f32 1e-05, %v2066_v38  ;;  %v2065_v31 = vmul.f32 0.020833334, %v2059_v39 }
0x10f2   :  { %4709 = vrsqrt.f32 %v2070_v2  ;;  %v2069_v42 = vadd.f32 1e-05, %v2065_v31 }
0x10f4   :  { %v4706_v41 = vpop.eup %4705  ;;  %4711 = vrsqrt.f32 %v2069_v42 }
0x10f5   :  { %v2076_v46 = vmul.f32 %v4706_v41, %v5598_v1 }
0x10f6   :  { %v4708_v43 = vpop.eup %4707 }
0x10f7   :  { %v2075_v45 = vmul.f32 %v4708_v43, %v2043_v4  ;;  %v2086_v53 = vmul.f32 %v4010_v47, %v2076_v46 }
0x10f9   :  { %v2085_v48 = vmul.f32 %v4010_v47, %v2075_v45  ;;  %v2096_v55 = vadd.f32 %v4011_v50, %v2086_v53 }
0x10fb   :  { %v2095_v52 = vadd.f32 %v4011_v50, %v2085_v48 }
0x10fd   :  { %4024 = vmatmul.mubr.msk.f32.vlgmr.msra.gmra.mxu0 %vm398_vm4, %v2095_v52 }
0x10fe   :  { %2194 = vmatprep.mubr.f32.mxu0 %v4963_v3 }
0x10ff   :  { %v4710_v54 = vpop.eup %4709 }
0x1100   :  { %v2078_v22 = vmul.f32 %v4710_v54, %v5606_v13 }
0x1101   :  { %v4712_v56 = vpop.eup %4711  ;;  %4025 = vmatmul.mubr.msk.f32.gmra.mxu0 %vm398_vm4, %v2096_v55 }
0x1102   :  { %2200 = vmatprep.mubr.f32.mxu0 %v4963_v3  ;;  %v2077_v20 = vmul.f32 %v4712_v56, %v5609_v15  ;;  %v2088_v63 = vmul.f32 %v4010_v47, %v2078_v22 }
0x1104   :  { %v2087_v60 = vmul.f32 %v4010_v47, %v2077_v20  ;;  %v2098_v0 = vadd.f32 %v4011_v50, %v2088_v63 }
0x1106   :  { %v2097_v61 = vadd.f32 %v4011_v50, %v2087_v60 }
0x1108   :  { %4026 = vmatmul.mubr.msk.f32.gmra.mxu0 %vm398_vm4, %v2097_v61 }
0x1109   :  { %2206 = vmatprep.mubr.f32.mxu0 %v4963_v3 }
0x110c   :  { %4027 = vmatmul.mubr.msk.f32.gmra.mxu0 %vm398_vm4, %v2098_v0 }
0x11bd   :  { %v5669_v1 = vpop.f32.mrf.mxu0 }
0x11be   :  { %4456 = vmatprep.mubr.msk.f32.mxu1 %vm597_vm5, %v5669_v1 }
0x11bf   :  { %v2192_v34 = vpop.f32.mrf.mxu0 }
0x11c1   :  { %v5673_v4 = vpop.f32.mrf.mxu0 }
0x11c3   :  { %v2198_v27 = vpop.f32.mrf.mxu0 }
0x11c8   :  { %v5675_v5 = vpop.f32.mrf.mxu0 }
0x11c9   :  { %2221 = vrot.lane.b32.xlu1 %v5675_v5, %s4964_s19 }
0x11ca   :  { %v2204_v6 = vpop.f32.mrf.mxu0 }
0x11cc   :  { %v5679_v7 = vpop.f32.mrf.mxu0 }
0x11cd   :  { %2219 = vrot.lane.b32.xlu1 %v5673_v4, %s4964_s19  ;;  %2223 = vrot.lane.b32.xlu0 %v5679_v7, %s4964_s19 }
0x11ce   :  { %v2210_v18 = vpop.f32.mrf.mxu0 }
0x11d1   :  { %2217 = vrot.lane.b32.xlu1 %v5669_v1, %s4964_s19  ;;  %2505 = vrot.lane.b32.xlu0 %v5679_v7, %s4965_s30 }
0x11d5   :  { %2503 = vrot.lane.b32.xlu1 %v5675_v5, %s4965_s30  ;;  %2501 = vrot.lane.b32.xlu0 %v5673_v4, %s4965_s30 }
0x11d9   :  { %2499 = vrot.lane.b32.xlu1 %v5669_v1, %s4965_s30  ;;  %2491 = vrot.lane.b32.xlu0 %v5669_v1, %s4966_s24 }
0x11dd   :  { %2493 = vrot.lane.b32.xlu1 %v5673_v4, %s4966_s24  ;;  %2495 = vrot.lane.b32.xlu0 %v5675_v5, %s4966_s24 }
0x11e1   :  { %2497 = vrot.lane.b32.xlu1 %v5679_v7, %s4966_s24 }
0x123b   :  { %v2222_v3 = vpop.permute.xlu1 %2221 }
0x123f   :  { %v2224_v8 = vpop.permute.xlu0 %2223  ;;  %v2220_v9 = vpop.permute.xlu1 %2219 }
0x1240   :  { %4448 = vmatprep.subr.msk.mxu1 %vm597_vm5, %v2224_v8 }
0x1241   :  { %4449 = vmatpush3.xpose.msk.msra.mxu1 %vm597_vm5, %v2224_v8 }
0x1242   :  { %4450 = vmatprep.subr.msk.mxu1 %vm597_vm5, %v2222_v3 }
0x1243   :  { %v2506_v12 = vpop.permute.xlu0 %2505  ;;  %v2218_v13 = vpop.permute.xlu1 %2217 }
0x1245   :  { %4451 = vmatpush3.xpose.msk.msra.mxu1 %vm597_vm5, %v2222_v3 }
0x1246   :  { %4452 = vmatprep.subr.msk.mxu1 %vm597_vm5, %v2220_v9 }
0x1247   :  { %v2502_v14 = vpop.permute.xlu0 %2501  ;;  %v2504_v15 = vpop.permute.xlu1 %2503 }
0x1249   :  { %4453 = vmatpush3.xpose.msk.msra.mxu1 %vm597_vm5, %v2220_v9 }
0x124a   :  { %4454 = vmatprep.subr.msk.mxu1 %vm597_vm5, %v2218_v13 }
0x124b   :  { %v2492_v16 = vpop.permute.xlu0 %2491  ;;  %v2500_v17 = vpop.permute.xlu1 %2499 }
0x124d   :  { %4455 = vmatpush3.xpose.msk.msra.mxu1 %vm597_vm5, %v2218_v13 }
0x124e   :  { %4476 = vmatprep.subr.msk.mxu1 %vm597_vm5, %v2506_v12 }
0x124f   :  { %v2494_v19 = vpop.permute.xlu1 %2493  ;;  %v2496_v21 = vpop.permute.xlu0 %2495 }
0x1250   :  { %4457 = vmatmul.mubr.msk.f32.vlgmr.msra.gmra.mxu1 %vm597_vm5, %v5673_v4 }
0x1251   :  { %4459 = vmatprep.mubr.msk.f32.mxu1 %vm597_vm5, %v5675_v5  ;;  %4477 = vmatpush3.xpose.msk.msra.mxu1 %vm597_vm5, %v2506_v12 }
0x1252   :  { %4478 = vmatprep.subr.msk.mxu1 %vm597_vm5, %v2504_v15 }
0x1253   :  { %v2498_v10 = vpop.permute.xlu1 %2497 }
0x1254   :  { %4460 = vmatmul.mubr.msk.f32.gmra.mxu1 %vm597_vm5, %v5679_v7 }
0x1255   :  { %4479 = vmatpush3.xpose.msk.msra.mxu1 %vm597_vm5, %v2504_v15  ;;  %4484 = vmatprep.mubr.msk.f32.mxu1 %vm597_vm5, %v2492_v16 }
0x1256   :  { %4480 = vmatprep.subr.msk.mxu1 %vm597_vm5, %v2502_v14 }
0x1259   :  { %4481 = vmatpush3.xpose.msk.msra.mxu1 %vm597_vm5, %v2502_v14 }
0x125a   :  { %4482 = vmatprep.subr.msk.mxu1 %vm597_vm5, %v2500_v17 }
0x125d   :  { %4483 = vmatpush3.xpose.msk.msra.mxu1 %vm597_vm5, %v2500_v17 }
0x125e   :  { %4518 = vmatprep.subr.mxu1 %v2210_v18 }
0x1260   :  { %4485 = vmatmul.mubr.msk.f32.vlgmr.msra.gmra.mxu1 %vm597_vm5, %v2494_v19 }
0x1261   :  { %4487 = vmatprep.mubr.msk.f32.mxu1 %vm597_vm5, %v2496_v21  ;;  %4519 = vmatpush3.msra.mxu1 %v2210_v18 }
0x1262   :  { %4520 = vmatprep.subr.mxu1 %v2204_v6 }
0x1263   :  { %4521 = vmatpush3.msra.mxu1 %v2204_v6 }
0x1264   :  { %4488 = vmatmul.mubr.msk.f32.gmra.mxu1 %vm597_vm5, %v2498_v10  ;;  %4522 = vmatprep.subr.mxu1 %v2198_v27 }
0x1265   :  { %4523 = vmatpush3.msra.mxu1 %v2198_v27 }
0x1266   :  { %4524 = vmatprep.subr.mxu1 %v2192_v34 }
0x1267   :  { %4525 = vmatpush3.msra.mxu1 %v2192_v34 }
0x1310   :  { %v4458_v23 = vpop.f32.mrf.mxu1 }
0x1311   :  { %v2327_v24 = vmul.f32 0.25, %v4458_v23 }
0x1312   :  { %v2307_v26 = vpop.f32.mrf.mxu1 }
0x1313   :  { %v2331_v29 = vadd.f32 %v5732_v28, %v2327_v24  ;;  %v2326_v59 = vmul.f32 0.25, %v2307_v26 }
0x1314   :  { %v4461_v32 = vpop.f32.mrf.mxu1 }
0x1315   :  { %v2330_v62 = vadd.f32 %v5738_v33, %v2326_v59  ;;  %v2329_v25 = vmul.f32 0.25, %v4461_v32  ;;  %v2337_v35 = vsel %vm707_vm6, %v2331_v29, -inf }
0x1316   :  { %2338 = vmax.xlane.f32.xlu1 %v2337_v35  ;;  %v2317_v44 = vpop.f32.mrf.mxu1 }
0x1317   :  { %v2333_v40 = vadd.f32 %v5745_v36, %v2329_v25  ;;  %v2328_v37 = vmul.f32 0.25, %v2317_v44  ;;  %v2334_v30 = vsel %vm707_vm6, %v2330_v62, -inf }
0x1318   :  { %2335 = vmax.xlane.f32.xlu0 %v2334_v30 }
0x1319   :  { %v2332_v38 = vadd.f32 %v5752_v11, %v2328_v37  ;;  %v2343_v39 = vsel %vm707_vm6, %v2333_v40, -inf }
0x131b   :  { %v2340_v2 = vsel %vm707_vm6, %v2332_v38, -inf }
0x131c   :  { %2344 = vmax.xlane.f32.xlu0 %v2343_v39 }
0x1320   :  { %2341 = vmax.xlane.f32.xlu0 %v2340_v2  ;;  %v4486_v31 = vpop.f32.mrf.mxu1 }
0x1321   :  { %v2609_v42 = vmul.f32 0.25, %v4486_v31 }
0x1322   :  { %v2589_v41 = vpop.f32.mrf.mxu1 }
0x1323   :  { %v2613_v43 = vadd.f32 %v5732_v28, %v2609_v42  ;;  %v2608_v45 = vmul.f32 0.25, %v2589_v41 }
0x1324   :  { %v4489_v46 = vpop.f32.mrf.mxu1 }
0x1325   :  { %v2612_v47 = vadd.f32 %v5738_v33, %v2608_v45  ;;  %v2611_v48 = vmul.f32 0.25, %v4489_v46  ;;  %v2619_v50 = vsel %vm707_vm6, %v2613_v43, -inf }
0x1326   :  { %2620 = vmax.xlane.f32.xlu1 %v2619_v50  ;;  %v2599_v52 = vpop.f32.mrf.mxu1 }
0x1327   :  { %v2615_v53 = vadd.f32 %v5745_v36, %v2611_v48  ;;  %v2610_v54 = vmul.f32 0.25, %v2599_v52  ;;  %v2616_v55 = vsel %vm707_vm6, %v2612_v47, -inf }
0x1328   :  { %2617 = vmax.xlane.f32.xlu0 %v2616_v55 }
0x1329   :  { %v2614_v56 = vadd.f32 %v5752_v11, %v2610_v54  ;;  %v2625_v20 = vsel %vm707_vm6, %v2615_v53, -inf }
0x132a   :  { %2626 = vmax.xlane.f32.xlu1 %v2625_v20 }
0x132b   :  { %v2622_v22 = vsel %vm707_vm6, %v2614_v56, -inf }
0x132c   :  { %2623 = vmax.xlane.f32.xlu0 %v2622_v22 }
0x133b   :  { %2384 = vrot.lane.b32.xlu1 %v5679_v7, %s4967_s2 }
0x133f   :  { %2380 = vrot.lane.b32.xlu1 %v5673_v4, %s4967_s2 }
0x1342   :  { %2382 = vrot.lane.b32.xlu0 %v5675_v5, %s4967_s2 }
0x1343   :  { %2378 = vrot.lane.b32.xlu1 %v5669_v1, %s4967_s2 }
0x1346   :  { %2662 = vrot.lane.b32.xlu0 %v5673_v4, %s6116_s3 }
0x1347   :  { %2666 = vrot.lane.b32.xlu1 %v5679_v7, %s6116_s3 }
0x134a   :  { %2803 = vrot.lane.b32.xlu0 %v5679_v7, %s6117_s0 }
0x134b   :  { %2664 = vrot.lane.b32.xlu1 %v5675_v5, %s6116_s3 }
0x134f   :  { %2660 = vrot.lane.b32.xlu1 %v5669_v1, %s6116_s3 }
0x139f   :  { %v2339_v60 = vpop.xlane.xlu1 %2338 }
0x13a0   :  { %v2347_v61 = vsub.f32 %v2331_v29, %v2339_v60 }
0x13a1   :  { %v2336_v63 = vpop.xlane.xlu0 %2335 }
0x13a2   :  { %v2352_v0 = vmul.f32 1.442695, %v2347_v61  ;;  %v2346_v34 = vsub.f32 %v2330_v62, %v2336_v63 }
0x13a4   :  { %4713 = vpow2.f32 %v2352_v0  ;;  %v2350_v27 = vmul.f32 1.442695, %v2346_v34 }
0x13a5   :  { %v2345_v6 = vpop.xlane.xlu0 %2344 }
0x13a6   :  { %4715 = vpow2.f32 %v2350_v27  ;;  %v2349_v3 = vsub.f32 %v2333_v40, %v2345_v6 }
0x13a8   :  { %v2356_v8 = vmul.f32 1.442695, %v2349_v3 }
0x13a9   :  { %v2342_v9 = vpop.xlane.xlu0 %2341 }
0x13aa   :  { %4717 = vpow2.f32 %v2356_v8  ;;  %v2348_v12 = vsub.f32 %v2332_v38, %v2342_v9 }
0x13ac   :  { %v2354_v13 = vmul.f32 1.442695, %v2348_v12 }
0x13ae   :  { %4719 = vpow2.f32 %v2354_v13 }
0x13af   :  { %v2621_v14 = vpop.xlane.xlu1 %2620 }
0x13b0   :  { %v2629_v15 = vsub.f32 %v2613_v43, %v2621_v14 }
0x13b1   :  { %v5783_v16 = vpop.eup %4713  ;;  %v2618_v17 = vpop.xlane.xlu0 %2617 }
0x13b2   :  { %v2634_v18 = vmul.f32 1.442695, %v2629_v15  ;;  %v2628_v19 = vsub.f32 %v2612_v47, %v2618_v17  ;;  %v2361_v21 = vsel %vm707_vm6, %v5783_v16, 0.0 }
0x13b3   :  { %v5787_v10 = vpop.eup %4715  ;;  %2362 = vadd.xlane.f32.xlu1 %v2361_v21  ;;  %v2627_v23 = vpop.xlane.xlu1 %2626 }
0x13b4   :  { %4721 = vpow2.f32 %v2634_v18  ;;  %v2632_v24 = vmul.f32 1.442695, %v2628_v19  ;;  %v2631_v26 = vsub.f32 %v2615_v53, %v2627_v23  ;;  %v2358_v29 = vsel %vm707_vm6, %v5787_v10, 0.0 }
0x13b5   :  { %2359 = vadd.xlane.f32.xlu0 %v2358_v29  ;;  %v2624_v59 = vpop.xlane.xlu0 %2623 }
0x13b6   :  { %4723 = vpow2.f32 %v2632_v24  ;;  %v2638_v32 = vmul.f32 1.442695, %v2631_v26  ;;  %v2630_v62 = vsub.f32 %v2614_v56, %v2624_v59 }
0x13b7   :  { %v5791_v25 = vpop.eup %4717  ;;  %v2385_v35 = vpop.permute.xlu1 %2384 }
0x13b8   :  { %4725 = vpow2.f32 %v2638_v32  ;;  %v2636_v44 = vmul.f32 1.442695, %v2630_v62  ;;  %4462 = vmatprep.subr.mxu0 %v2385_v35  ;;  %v2367_v40 = vsel %vm707_vm6, %v5791_v25, 0.0 }
0x13b9   :  { %4463 = vmatpush3.msra.mxu0 %v2385_v35  ;;  %2368 = vadd.xlane.f32.xlu1 %v2367_v40  ;;  %v2383_v37 = vpop.permute.xlu0 %2382 }
0x13ba   :  { %4464 = vmatprep.subr.mxu0 %v2383_v37  ;;  %4727 = vpow2.f32 %v2636_v44 }
0x13bb   :  { %v4720_v30 = vpop.eup %4719  ;;  %v2381_v38 = vpop.permute.xlu1 %2380  ;;  %4465 = vmatpush3.msra.mxu0 %v2383_v37 }
0x13bc   :  { %4466 = vmatprep.subr.mxu0 %v2381_v38  ;;  %v2364_v39 = vsel %vm707_vm6, %v4720_v30, 0.0 }
0x13bd   :  { %2365 = vadd.xlane.f32.xlu0 %v2364_v39  ;;  %4467 = vmatpush3.msra.mxu0 %v2381_v38  ;;  %v2663_v53 = vpop.permute.xlu0 %2662 }
0x13bf   :  { %v2379_v2 = vpop.permute.xlu1 %2378 }
0x13c0   :  { %4468 = vmatprep.subr.mxu0 %v2379_v2 }
0x13c1   :  { %v5796_v31 = vpop.eup %4721  ;;  %4469 = vmatpush3.msra.mxu0 %v2379_v2  ;;  %v2804_v55 = vpop.permute.xlu0 %2803 }
0x13c2   :  { %v2643_v42 = vsel %vm707_vm6, %v5796_v31, 0.0 }
0x13c3   :  { %v4724_v41 = vpop.eup %4723  ;;  %v2667_v43 = vpop.permute.xlu1 %2666  ;;  %2644 = vadd.xlane.f32.xlu1 %v2643_v42 }
0x13c4   :  { %4490 = vmatprep.subr.mxu0 %v2667_v43  ;;  %v2640_v45 = vsel %vm707_vm6, %v4724_v41, 0.0 }
0x13c5   :  { %v5801_v46 = vpop.eup %4725  ;;  %2641 = vadd.xlane.f32.xlu0 %v2640_v45 }
0x13c6   :  { %v2649_v47 = vsel %vm707_vm6, %v5801_v46, 0.0 }
0x13c7   :  { %v5805_v48 = vpop.eup %4727  ;;  %v2665_v52 = vpop.permute.xlu1 %2664 }
0x13c8   :  { %v2646_v50 = vsel %vm707_vm6, %v5805_v48, 0.0 }
0x13c9   :  { %2650 = vadd.xlane.f32.xlu0 %v2649_v47 }
0x13cb   :  { %v2661_v54 = vpop.permute.xlu1 %2660 }
0x13cd   :  { %2647 = vadd.xlane.f32.xlu0 %v2646_v50 }
0x13d4   :  { %2801 = vrot.lane.b32.xlu1 %v5675_v5, %s6117_s0 }
0x13d8   :  { %2797 = vrot.lane.b32.xlu1 %v5669_v1, %s6117_s0 }
0x13dc   :  { %2791 = vrot.lane.b32.xlu1 %v5673_v4, %s6118_s23 }
0x13e0   :  { %2795 = vrot.lane.b32.xlu1 %v5679_v7, %s6118_s23 }
0x13e3   :  { %2799 = vrot.lane.b32.xlu0 %v5673_v4, %s6117_s0 }
0x13e7   :  { %2789 = vrot.lane.b32.xlu0 %v5669_v1, %s6118_s23 }
0x13eb   :  { %2793 = vrot.lane.b32.xlu0 %v5675_v5, %s6118_s23 }
0x143c   :  { %v2363_v56 = vpop.xlane.xlu1 %2362 }
0x143d   :  { %4729 = vrcp.f32 %v2363_v56 }
0x143e   :  { %v2360_v20 = vpop.xlane.xlu0 %2359 }
0x143f   :  { %4731 = vrcp.f32 %v2360_v20 }
0x1442   :  { %v2369_v22 = vpop.xlane.xlu1 %2368 }
0x1443   :  { %4733 = vrcp.f32 %v2369_v22 }
0x1446   :  { %v2366_v7 = vpop.xlane.xlu0 %2365 }
0x1447   :  { %4735 = vrcp.f32 %v2366_v7 }
0x144a   :  { %v4730_v60 = vpop.eup %4729 }
0x144b   :  { %v2373_v63 = vmul.f32 %v4730_v60, %v5783_v16 }
0x144c   :  { %v4732_v4 = vpop.eup %4731  ;;  %v2645_v61 = vpop.xlane.xlu1 %2644 }
0x144d   :  { %v2371_v1 = vmul.f32 %v4732_v4, %v5787_v10  ;;  %4737 = vrcp.f32 %v2645_v61 }
0x144e   :  { %v2642_v5 = vpop.xlane.xlu0 %2641 }
0x144f   :  { %4739 = vrcp.f32 %v2642_v5  ;;  %4470 = vmatprep.mubr.msk.f32.mxu0 %vm707_vm6, %v2371_v1 }
0x1450   :  { %4471 = vmatmul.mubr.msk.f32.vlgmr.msra.gmra.mxu0 %vm707_vm6, %v2373_v63  ;;  %v4734_v34 = vpop.eup %4733  ;;  %v2802_v15 = vpop.permute.xlu1 %2801 }
0x1451   :  { %4491 = vmatpush3.msra.mxu0 %v2667_v43  ;;  %v2377_v8 = vmul.f32 %v4734_v34, %v5791_v25 }
0x1452   :  { %4492 = vmatprep.subr.mxu0 %v2665_v52  ;;  %v2651_v0 = vpop.xlane.xlu0 %2650 }
0x1453   :  { %4493 = vmatpush3.msra.mxu0 %v2665_v52  ;;  %4741 = vrcp.f32 %v2651_v0 }
0x1454   :  { %v4736_v27 = vpop.eup %4735  ;;  %4494 = vmatprep.subr.mxu0 %v2663_v53  ;;  %v2798_v10 = vpop.permute.xlu1 %2797 }
0x1455   :  { %4495 = vmatpush3.msra.mxu0 %v2663_v53  ;;  %v2375_v6 = vmul.f32 %v4736_v27, %v4720_v30 }
0x1456   :  { %4496 = vmatprep.subr.mxu0 %v2661_v54  ;;  %v2648_v3 = vpop.xlane.xlu0 %2647 }
0x1457   :  { %4497 = vmatpush3.msra.mxu0 %v2661_v54  ;;  %4743 = vrcp.f32 %v2648_v3  ;;  %4473 = vmatprep.mubr.msk.f32.mxu0 %vm707_vm6, %v2375_v6 }
0x1458   :  { %4504 = vmatprep.subr.msk.mxu0 %vm597_vm5, %v2804_v55  ;;  %4474 = vmatmul.mubr.msk.f32.gmra.mxu0 %vm707_vm6, %v2377_v8  ;;  %v2792_v24 = vpop.permute.xlu1 %2791 }
0x145a   :  { %v4738_v9 = vpop.eup %4737  ;;  %v2800_v16 = vpop.permute.xlu0 %2799 }
0x145b   :  { %v2655_v14 = vmul.f32 %v4738_v9, %v5796_v31 }
0x145c   :  { %v4740_v12 = vpop.eup %4739  ;;  %v2796_v29 = vpop.permute.xlu1 %2795 }
0x145d   :  { %v2653_v13 = vmul.f32 %v4740_v12, %v4724_v41 }
0x145e   :  { %v2790_v23 = vpop.permute.xlu0 %2789 }
0x145f   :  { %4498 = vmatprep.mubr.msk.f32.mxu0 %vm707_vm6, %v2653_v13 }
0x1460   :  { %4499 = vmatmul.mubr.msk.f32.vlgmr.msra.gmra.mxu0 %vm707_vm6, %v2655_v14  ;;  %v4742_v17 = vpop.eup %4741 }
0x1461   :  { %4505 = vmatpush3.xpose.msk.msra.mxu0 %vm597_vm5, %v2804_v55  ;;  %v2659_v21 = vmul.f32 %v4742_v17, %v5801_v46 }
0x1462   :  { %4506 = vmatprep.subr.msk.mxu0 %vm597_vm5, %v2802_v15  ;;  %v2794_v26 = vpop.permute.xlu0 %2793 }
0x1464   :  { %v4744_v18 = vpop.eup %4743 }
0x1465   :  { %4507 = vmatpush3.xpose.msk.msra.mxu0 %vm597_vm5, %v2802_v15  ;;  %v2657_v19 = vmul.f32 %v4744_v18, %v5805_v48 }
0x1466   :  { %4508 = vmatprep.subr.msk.mxu0 %vm597_vm5, %v2800_v16 }
0x1467   :  { %4501 = vmatprep.mubr.msk.f32.mxu0 %vm707_vm6, %v2657_v19 }
0x1468   :  { %4502 = vmatmul.mubr.msk.f32.gmra.mxu0 %vm707_vm6, %v2659_v21 }
0x1469   :  { %4509 = vmatpush3.xpose.msk.msra.mxu0 %vm597_vm5, %v2800_v16  ;;  %4512 = vmatprep.mubr.msk.f32.mxu0 %vm597_vm5, %v2790_v23 }
0x146a   :  { %4510 = vmatprep.subr.msk.mxu0 %vm597_vm5, %v2798_v10 }
0x146d   :  { %4511 = vmatpush3.xpose.msk.msra.mxu0 %vm597_vm5, %v2798_v10 }
0x1470   :  { %4513 = vmatmul.mubr.msk.f32.vlgmr.msra.gmra.mxu0 %vm597_vm5, %v2792_v24 }
0x1471   :  { %4515 = vmatprep.mubr.msk.f32.mxu0 %vm597_vm5, %v2794_v26 }
0x1474   :  { %4516 = vmatmul.mubr.msk.f32.gmra.mxu0 %vm597_vm5, %v2796_v29  ;;  %v3085_v29 = vld [vmem:[#allocation6 + $0x58] sm:$0xff] }
0x1475   :  { %4532 = vmatprep.subr.mxu1 %v3085_v29 }
0x1510   :  { %v4472_v59 = vpop.f32.mrf.mxu0 }
0x1511   :  { %2488 = vst.msk [vmem:[#allocation2 + $0x8] sm:$0xff] %vm597_vm5, %v4472_v59  ;;  %v3084_v59 = vld [vmem:[#allocation6 + $0x50] sm:$0xff] }
0x1512   :  { %v2468_v32 = vpop.f32.mrf.mxu0 }
0x1513   :  { %2487 = vst.msk [vmem:[#allocation2] sm:$0xff] %vm597_vm5, %v2468_v32  ;;  %v3083_v32 = vld [vmem:[#allocation6 + $0x48] sm:$0xff] }
0x1518   :  { %v4475_v62 = vpop.f32.mrf.mxu0 }
0x1519   :  { %2490 = vst.msk [vmem:[#allocation2 + $0x18] sm:$0xff] %vm597_vm5, %v4475_v62  ;;  %v3082_v62 = vld [vmem:[#allocation6 + $0x40] sm:$0xff] }
0x151a   :  { %v2478_v25 = vpop.f32.mrf.mxu0 }
0x151b   :  { %2489 = vst.msk [vmem:[#allocation2 + $0x10] sm:$0xff] %vm597_vm5, %v2478_v25  ;;  %v3081_v25 = vld [vmem:[#allocation6 + $0x38] sm:$0xff] }
0x1520   :  { %v4500_v35 = vpop.f32.mrf.mxu0 }
0x1522   :  { %v2750_v44 = vpop.f32.mrf.mxu0 }
0x1528   :  { %v5853_v40 = vpop.f32.mrf.mxu0 }
0x152a   :  { %v2760_v37 = vpop.f32.mrf.mxu0 }
0x1530   :  { %v4514_v30 = vpop.f32.mrf.mxu0 }
0x1531   :  { %v2907_v38 = vmul.f32 0.25, %v4514_v30 }
0x1532   :  { %v2887_v39 = vpop.f32.mrf.mxu0 }
0x1533   :  { %v2911_v2 = vadd.f32 %v5732_v28, %v2907_v38  ;;  %v2906_v31 = vmul.f32 0.25, %v2887_v39 }
0x1534   :  { %v4517_v42 = vpop.f32.mrf.mxu0 }
0x1535   :  { %v2910_v41 = vadd.f32 %v5738_v33, %v2906_v31  ;;  %v2917_v43 = vsel %vm707_vm6, %v2911_v2, -inf  ;;  %v2909_v46 = vmul.f32 0.25, %v4517_v42 }
0x1536   :  { %2918 = vmax.xlane.f32.xlu1 %v2917_v43  ;;  %v2897_v45 = vpop.f32.mrf.mxu0 }
0x1537   :  { %v2908_v47 = vmul.f32 0.25, %v2897_v45  ;;  %v2914_v48 = vsel %vm707_vm6, %v2910_v41, -inf  ;;  %v2913_v52 = vadd.f32 %v5745_v36, %v2909_v46 }
0x1538   :  { %2915 = vmax.xlane.f32.xlu0 %v2914_v48 }
0x1539   :  { %v2912_v50 = vadd.f32 %v5752_v11, %v2908_v47  ;;  %v2923_v28 = vsel %vm707_vm6, %v2913_v52, -inf  ;;  %v4065_v47 = vld [vmem:[%s6115_s15 + $0x1] ss:$0 sm:$0xff] }
0x153b   :  { %v2920_v53 = vsel %vm707_vm6, %v2912_v50, -inf }
0x153c   :  { %2921 = vmax.xlane.f32.xlu0 %v2920_v53 }
0x1540   :  { %2924 = vmax.xlane.f32.xlu0 %v2923_v28 }
0x15bf   :  { %v2919_v33 = vpop.xlane.xlu1 %2918 }
0x15c0   :  { %v2927_v54 = vsub.f32 %v2911_v2, %v2919_v33 }
0x15c1   :  { %v2916_v55 = vpop.xlane.xlu0 %2915 }
0x15c2   :  { %v2932_v56 = vmul.f32 1.442695, %v2927_v54  ;;  %v2926_v20 = vsub.f32 %v2910_v41, %v2916_v55 }
0x15c4   :  { %4745 = vpow2.f32 %v2932_v56  ;;  %v2930_v22 = vmul.f32 1.442695, %v2926_v20 }
0x15c5   :  { %v2922_v7 = vpop.xlane.xlu0 %2921 }
0x15c6   :  { %4747 = vpow2.f32 %v2930_v22  ;;  %v2928_v60 = vsub.f32 %v2912_v50, %v2922_v7 }
0x15c8   :  { %v2934_v4 = vmul.f32 1.442695, %v2928_v60 }
0x15c9   :  { %v2925_v11 = vpop.xlane.xlu0 %2924 }
0x15ca   :  { %4749 = vpow2.f32 %v2934_v4  ;;  %v2929_v36 = vsub.f32 %v2913_v52, %v2925_v11 }
0x15cc   :  { %v2936_v61 = vmul.f32 1.442695, %v2929_v36 }
0x15ce   :  { %4751 = vpow2.f32 %v2936_v61 }
0x15d1   :  { %v4746_v1 = vpop.eup %4745 }
0x15d2   :  { %v2941_v63 = vsel %vm707_vm6, %v4746_v1, 0.0 }
0x15d3   :  { %v4748_v5 = vpop.eup %4747  ;;  %2942 = vadd.xlane.f32.xlu1 %v2941_v63 }
0x15d4   :  { %v2938_v0 = vsel %vm707_vm6, %v4748_v5, 0.0 }
0x15d5   :  { %2939 = vadd.xlane.f32.xlu0 %v2938_v0 }
0x15d7   :  { %v4750_v34 = vpop.eup %4749 }
0x15d8   :  { %v2944_v27 = vsel %vm707_vm6, %v4750_v34, 0.0 }
0x15d9   :  { %2945 = vadd.xlane.f32.xlu0 %v2944_v27 }
0x15db   :  { %v4752_v6 = vpop.eup %4751 }
0x15dc   :  { %v2947_v3 = vsel %vm707_vm6, %v4752_v6, 0.0 }
0x15dd   :  { %2948 = vadd.xlane.f32.xlu1 %v2947_v3 }
0x15ee   :  { %2775 = vrot.lane.b32.xlu1 %v4500_v35, %s6116_s3  ;;  %v3080_v35 = vld [vmem:[#allocation6 + $0x30] sm:$0xff] }
0x15ef   :  { %2773 = vrot.lane.b32.xlu0 %v2750_v44, %s6116_s3 }
0x15f3   :  { %2777 = vrot.lane.b32.xlu0 %v2760_v37, %s6116_s3 }
0x165c   :  { %v2943_v8 = vpop.xlane.xlu1 %2942 }
0x165d   :  { %4753 = vrcp.f32 %v2943_v8 }
0x165e   :  { %v2940_v9 = vpop.xlane.xlu0 %2939 }
0x165f   :  { %4755 = vrcp.f32 %v2940_v9 }
0x1662   :  { %v2946_v12 = vpop.xlane.xlu0 %2945 }
0x1663   :  { %4757 = vrcp.f32 %v2946_v12 }
0x1666   :  { %v2949_v13 = vpop.xlane.xlu1 %2948  ;;  %v2774_v14 = vpop.permute.xlu0 %2773 }
0x1667   :  { %4759 = vrcp.f32 %v2949_v13  ;;  %2785 = vst.msk [vmem:[#allocation2] sm:$0xff] %vm1159_vm7, %v2774_v14 }
0x166a   :  { %v2776_v15 = vpop.permute.xlu1 %2775  ;;  %v2778_v16 = vpop.permute.xlu0 %2777 }
0x166b   :  { %v4754_v17 = vpop.eup %4753  ;;  %2786 = vst.msk [vmem:[#allocation2 + $0x8] sm:$0xff] %vm1159_vm7, %v2776_v15  ;;  %2787 = vst.msk [vmem:[#allocation2 + $0x10] sm:$0xff] %vm1159_vm7, %v2778_v16 }
0x166c   :  { %v4756_v18 = vpop.eup %4755  ;;  %v2953_v21 = vmul.f32 %v4754_v17, %v4746_v1 }
0x166d   :  { %v2951_v19 = vmul.f32 %v4756_v18, %v4748_v5 }
0x166f   :  { %4526 = vmatprep.mubr.msk.f32.mxu1 %vm707_vm6, %v2951_v19 }
0x1670   :  { %v4758_v10 = vpop.eup %4757  ;;  %4527 = vmatmul.mubr.msk.f32.vlgmr.msra.gmra.mxu1 %vm707_vm6, %v2953_v21 }
0x1671   :  { %v2955_v23 = vmul.f32 %v4758_v10, %v4750_v34  ;;  %4533 = vmatpush3.msra.mxu1 %v3085_v29 }
0x1672   :  { %4534 = vmatprep.subr.mxu1 %v3084_v59 }
0x1673   :  { %4529 = vmatprep.mubr.msk.f32.mxu1 %vm707_vm6, %v2955_v23  ;;  %4535 = vmatpush3.msra.mxu1 %v3084_v59 }
0x1674   :  { %v4760_v24 = vpop.eup %4759  ;;  %4536 = vmatprep.subr.mxu1 %v3083_v32 }
0x1675   :  { %v2957_v26 = vmul.f32 %v4760_v24, %v4752_v6  ;;  %4537 = vmatpush3.msra.mxu1 %v3083_v32 }
0x1676   :  { %4538 = vmatprep.subr.mxu1 %v3082_v62 }
0x1677   :  { %4530 = vmatmul.mubr.msk.f32.gmra.mxu1 %vm707_vm6, %v2957_v26 }
0x1678   :  { %4539 = vmatpush3.msra.mxu1 %v3082_v62 }
0x1679   :  { %4540 = vmatprep.subr.mxu1 %v3081_v25 }
0x167a   :  { %4541 = vmatpush3.msra.mxu1 %v3081_v25 }
0x167b   :  { %4542 = vmatprep.subr.mxu1 %v3080_v35 }
0x167c   :  { %4543 = vmatpush3.msra.mxu1 %v3080_v35  ;;  %v4072_v35 = vld [vmem:[%s6063_s11 + $0x1] ss:$0 sm:$0xff] }
0x1730   :  { %v4528_v44 = vpop.f32.mrf.mxu1 }
0x1731   :  { %3061 = vrot.lane.b32.xlu1 %v4528_v44, %s4967_s2 }
0x1732   :  { %v3036_v37 = vpop.f32.mrf.mxu1 }
0x1735   :  { %3059 = vrot.lane.b32.xlu1 %v3036_v37, %s4967_s2 }
0x1737   :  { %v4531_v30 = vpop.f32.mrf.mxu1 }
0x1739   :  { %2779 = vrot.lane.b32.xlu1 %v5853_v40, %s6116_s3  ;;  %v3046_v38 = vpop.f32.mrf.mxu1 }
0x173a   :  { %3063 = vrot.lane.b32.xlu0 %v3046_v38, %s4967_s2 }
0x173d   :  { %3065 = vrot.lane.b32.xlu1 %v4531_v30, %s4967_s2  ;;  %v4073_v30 = vld [vmem:[%s6064_s12 + $0x1] ss:$0 sm:$0xff] }
0x17a3   :  { %v3062_v39 = vpop.permute.xlu1 %3061 }
0x17a4   :  { %3072 = vst.msk [vmem:[#allocation2 + $0x8] sm:$0xff] %vm1446_vm8, %v3062_v39 }
0x17a7   :  { %v3060_v2 = vpop.permute.xlu1 %3059 }
0x17a8   :  { %3071 = vst.msk [vmem:[#allocation2] sm:$0xff] %vm1446_vm8, %v3060_v2 }
0x17ab   :  { %v2780_v31 = vpop.permute.xlu1 %2779  ;;  %v3076_v40 = vld [vmem:[#allocation2 + $0x8] sm:$0xff] }
0x17ac   :  { %2788 = vst.msk [vmem:[#allocation2 + $0x18] sm:$0xff] %vm1159_vm7, %v2780_v31  ;;  %v3064_v42 = vpop.permute.xlu0 %3063 }
0x17ad   :  { %3073 = vst.msk [vmem:[#allocation2 + $0x10] sm:$0xff] %vm1446_vm8, %v3064_v42 }
0x17af   :  { %v3066_v41 = vpop.permute.xlu1 %3065  ;;  %v3075_v43 = vld [vmem:[#allocation2] sm:$0xff] }
0x17b0   :  { %3074 = vst.msk [vmem:[#allocation2 + $0x18] sm:$0xff] %vm1446_vm8, %v3066_v41  ;;  %4544 = vmatprep.mubr.msk.f32.mxu1 %vm398_vm4, %v3075_v43 }
0x17b1   :  { %4545 = vmatmul.mubr.msk.f32.vlgmr.msra.gmra.mxu1 %vm398_vm4, %v3076_v40 }
0x17b4   :  { %v3077_v45 = vld [vmem:[#allocation2 + $0x10] sm:$0xff] }
0x17b5   :  { %4547 = vmatprep.mubr.msk.f32.mxu1 %vm398_vm4, %v3077_v45 }
0x17b7   :  { %v3078_v46 = vld [vmem:[#allocation2 + $0x18] sm:$0xff] }
0x17b8   :  { %4548 = vmatmul.mubr.msk.f32.gmra.mxu1 %vm398_vm4, %v3078_v46 }
0x1871   :  { %v4546_v48 = vpop.f32.mrf.mxu1 }
0x1872   :  { %v3178_v50 = vadd.f32 %v4546_v48, %v4065_v47 }
0x1873   :  { %v3172_v52 = vpop.f32.mrf.mxu1 }
0x1874   :  { %v3173_v53 = vadd.f32 %v4065_v47, %v3172_v52  ;;  %v3198_v28 = vsel %vm398_vm4, %v3178_v50, 0.0 }
0x1875   :  { %3199 = vadd.xlane.f32.xlu1 %v3198_v28 }
0x1876   :  { %v3195_v33 = vsel %vm398_vm4, %v3173_v53, 0.0 }
0x1877   :  { %3196 = vadd.xlane.f32.xlu0 %v3195_v33 }
0x1878   :  { %v4549_v54 = vpop.f32.mrf.mxu1 }
0x1879   :  { %v3188_v20 = vadd.f32 %v4549_v54, %v4065_v47 }
0x187a   :  { %v3182_v55 = vpop.f32.mrf.mxu1 }
0x187b   :  { %v3183_v56 = vadd.f32 %v4065_v47, %v3182_v55  ;;  %v3204_v7 = vsel %vm398_vm4, %v3188_v20, 0.0 }
0x187d   :  { %v3201_v22 = vsel %vm398_vm4, %v3183_v56, 0.0 }
0x187e   :  { %3202 = vadd.xlane.f32.xlu0 %v3201_v22 }
0x1882   :  { %3205 = vadd.xlane.f32.xlu0 %v3204_v7 }
0x18fe   :  { %v3200_v60 = vpop.xlane.xlu1 %3199 }
0x18ff   :  { %v3208_v4 = vmul.f32 0.020833334, %v3200_v60 }
0x1900   :  { %v3197_v11 = vpop.xlane.xlu0 %3196 }
0x1901   :  { %v3212_v36 = vsub.f32 %v3178_v50, %v3208_v4  ;;  %v3207_v61 = vmul.f32 0.020833334, %v3197_v11 }
0x1903   :  { %v3211_v1 = vsub.f32 %v3173_v53, %v3207_v61  ;;  %v3216_v63 = vmul.f32 %v3212_v36, %v3212_v36 }
0x1905   :  { %v3222_v5 = vsel %vm398_vm4, %v3216_v63, 0.0  ;;  %v3215_v0 = vmul.f32 %v3211_v1, %v3211_v1 }
0x1906   :  { %3223 = vadd.xlane.f32.xlu1 %v3222_v5 }
0x1907   :  { %v3203_v34 = vpop.xlane.xlu0 %3202  ;;  %v3219_v27 = vsel %vm398_vm4, %v3215_v0, 0.0 }
0x1908   :  { %v3209_v6 = vmul.f32 0.020833334, %v3203_v34  ;;  %3220 = vadd.xlane.f32.xlu0 %v3219_v27 }
0x190a   :  { %v3213_v3 = vsub.f32 %v3183_v56, %v3209_v6 }
0x190b   :  { %v3206_v8 = vpop.xlane.xlu0 %3205 }
0x190c   :  { %v3210_v9 = vmul.f32 0.020833334, %v3206_v8  ;;  %v3217_v12 = vmul.f32 %v3213_v3, %v3213_v3 }
0x190e   :  { %v3214_v13 = vsub.f32 %v3188_v20, %v3210_v9  ;;  %v3225_v14 = vsel %vm398_vm4, %v3217_v12, 0.0  ;;  %v3353_v9 = vld [vmem:[#allocation8 + $0x58] sm:$0xff]  ;;  %v3352_v12 = vld [vmem:[#allocation8 + $0x50] sm:$0xff] }
0x190f   :  { %3226 = vadd.xlane.f32.xlu0 %v3225_v14  ;;  %4550 = vmatprep.subr.mxu0 %v3353_v9  ;;  %v3350_v14 = vld [vmem:[#allocation8 + $0x40] sm:$0xff] }
0x1910   :  { %v3218_v15 = vmul.f32 %v3214_v13, %v3214_v13  ;;  %4551 = vmatpush3.msra.mxu0 %v3353_v9 }
0x1911   :  { %4552 = vmatprep.subr.mxu0 %v3352_v12 }
0x1912   :  { %v3228_v16 = vsel %vm398_vm4, %v3218_v15, 0.0  ;;  %4553 = vmatpush3.msra.mxu0 %v3352_v12  ;;  %v3349_v15 = vld [vmem:[#allocation8 + $0x38] sm:$0xff] }
0x1913   :  { %3229 = vadd.xlane.f32.xlu1 %v3228_v16  ;;  %v3348_v16 = vld [vmem:[#allocation8 + $0x30] sm:$0xff] }
0x198f   :  { %v3224_v17 = vpop.xlane.xlu1 %3223 }
0x1990   :  { %v3232_v18 = vmul.f32 0.020833334, %v3224_v17 }
0x1991   :  { %v3221_v19 = vpop.xlane.xlu0 %3220 }
0x1992   :  { %v3236_v21 = vadd.f32 1e-05, %v3232_v18  ;;  %v3231_v10 = vmul.f32 0.020833334, %v3221_v19 }
0x1994   :  { %4761 = vrsqrt.f32 %v3236_v21  ;;  %v3235_v23 = vadd.f32 1e-05, %v3231_v10 }
0x1996   :  { %4763 = vrsqrt.f32 %v3235_v23 }
0x1998   :  { %v3227_v24 = vpop.xlane.xlu0 %3226 }
0x1999   :  { %v3233_v26 = vmul.f32 0.020833334, %v3227_v24 }
0x199b   :  { %v3237_v29 = vadd.f32 1e-05, %v3233_v26 }
0x199c   :  { %v3230_v59 = vpop.xlane.xlu1 %3229 }
0x199d   :  { %4765 = vrsqrt.f32 %v3237_v29  ;;  %v3234_v32 = vmul.f32 0.020833334, %v3230_v59 }
0x199f   :  { %v3238_v62 = vadd.f32 1e-05, %v3234_v32 }
0x19a1   :  { %v4762_v25 = vpop.eup %4761  ;;  %4767 = vrsqrt.f32 %v3238_v62 }
0x19a2   :  { %v3244_v44 = vmul.f32 %v4762_v25, %v3212_v36 }
0x19a3   :  { %v4764_v37 = vpop.eup %4763 }
0x19a4   :  { %v3254_v38 = vmul.f32 %v4072_v35, %v3244_v44  ;;  %v3243_v39 = vmul.f32 %v4764_v37, %v3211_v1  ;;  %v4076_v44 = vld [vmem:[%s6065_s13 + $0x1] ss:$0 sm:$0xff] }
0x19a6   :  { %v3264_v2 = vadd.f32 %v4073_v30, %v3254_v38  ;;  %v3253_v31 = vmul.f32 %v4072_v35, %v3243_v39  ;;  %v4077_v39 = vld [vmem:[%s6066_s14 + $0x1] ss:$0 sm:$0xff] }
0x19a8   :  { %v5910_v42 = vadd.f32 %v3264_v2, %v5578_v49  ;;  %v3263_v41 = vadd.f32 %v4073_v30, %v3253_v31 }
0x19aa   :  { %v4766_v43 = vpop.eup %4765  ;;  %v3278_v40 = vsel %vm398_vm4, %v5910_v42, 0.0  ;;  %v5915_v45 = vadd.f32 %v3263_v41, %v5581_v51 }
0x19ab   :  { %3279 = vadd.xlane.f32.xlu1 %v3278_v40  ;;  %v3245_v46 = vmul.f32 %v4766_v43, %v3213_v3 }
0x19ac   :  { %v3275_v47 = vsel %vm398_vm4, %v5915_v45, 0.0 }
0x19ad   :  { %3276 = vadd.xlane.f32.xlu0 %v3275_v47  ;;  %v3255_v48 = vmul.f32 %v4072_v35, %v3245_v46 }
0x19ae   :  { %v4768_v50 = vpop.eup %4767 }
0x19af   :  { %v3265_v52 = vadd.f32 %v4073_v30, %v3255_v48  ;;  %v3246_v53 = vmul.f32 %v4768_v50, %v3214_v13  ;;  %v3351_v13 = vld [vmem:[#allocation8 + $0x48] sm:$0xff] }
0x19b0   :  { %4554 = vmatprep.subr.mxu0 %v3351_v13 }
0x19b1   :  { %v5920_v49 = vadd.f32 %v3265_v52, %v5591_v58  ;;  %v3256_v28 = vmul.f32 %v4072_v35, %v3246_v53  ;;  %4555 = vmatpush3.msra.mxu0 %v3351_v13 }
0x19b2   :  { %4556 = vmatprep.subr.mxu0 %v3350_v14 }
0x19b3   :  { %v3281_v33 = vsel %vm398_vm4, %v5920_v49, 0.0  ;;  %v3266_v54 = vadd.f32 %v4073_v30, %v3256_v28  ;;  %4557 = vmatpush3.msra.mxu0 %v3350_v14  ;;  %v4079_v28 = vld [vmem:[%s6068_s16 + $0x1] ss:$0 sm:$0xff] }
0x19b4   :  { %3282 = vadd.xlane.f32.xlu0 %v3281_v33  ;;  %4558 = vmatprep.subr.mxu0 %v3349_v15 }
0x19b5   :  { %v5925_v51 = vadd.f32 %v3266_v54, %v5588_v57  ;;  %4559 = vmatpush3.msra.mxu0 %v3349_v15 }
0x19b6   :  { %4560 = vmatprep.subr.mxu0 %v3348_v16 }
0x19b7   :  { %v3284_v55 = vsel %vm398_vm4, %v5925_v51, 0.0  ;;  %4561 = vmatpush3.msra.mxu0 %v3348_v16 }
0x19b8   :  { %3285 = vadd.xlane.f32.xlu1 %v3284_v55 }
0x1a34   :  { %v3280_v56 = vpop.xlane.xlu1 %3279 }
0x1a35   :  { %v3288_v20 = vmul.f32 0.020833334, %v3280_v56 }
0x1a36   :  { %v3277_v22 = vpop.xlane.xlu0 %3276 }
0x1a37   :  { %v3292_v7 = vsub.f32 %v5910_v42, %v3288_v20  ;;  %v3287_v58 = vmul.f32 0.020833334, %v3277_v22 }
0x1a39   :  { %v3291_v60 = vsub.f32 %v5915_v45, %v3287_v58  ;;  %v3296_v4 = vmul.f32 %v3292_v7, %v3292_v7 }
0x1a3b   :  { %v3302_v11 = vsel %vm398_vm4, %v3296_v4, 0.0  ;;  %v3295_v36 = vmul.f32 %v3291_v60, %v3291_v60 }
0x1a3c   :  { %3303 = vadd.xlane.f32.xlu1 %v3302_v11 }
0x1a3d   :  { %v3283_v61 = vpop.xlane.xlu0 %3282  ;;  %v3299_v57 = vsel %vm398_vm4, %v3295_v36, 0.0 }
0x1a3e   :  { %v3289_v1 = vmul.f32 0.020833334, %v3283_v61  ;;  %3300 = vadd.xlane.f32.xlu0 %v3299_v57 }
0x1a40   :  { %v3293_v63 = vsub.f32 %v5920_v49, %v3289_v1 }
0x1a41   :  { %v3286_v5 = vpop.xlane.xlu1 %3285 }
0x1a42   :  { %v3290_v0 = vmul.f32 0.020833334, %v3286_v5  ;;  %v3297_v34 = vmul.f32 %v3293_v63, %v3293_v63 }
0x1a44   :  { %v3294_v27 = vsub.f32 %v5925_v51, %v3290_v0  ;;  %v3305_v6 = vsel %vm398_vm4, %v3297_v34, 0.0 }
0x1a45   :  { %3306 = vadd.xlane.f32.xlu0 %v3305_v6 }
0x1a46   :  { %v3298_v3 = vmul.f32 %v3294_v27, %v3294_v27 }
0x1a48   :  { %v3308_v8 = vsel %vm398_vm4, %v3298_v3, 0.0 }
0x1a49   :  { %3309 = vadd.xlane.f32.xlu1 %v3308_v8 }
0x1ac5   :  { %v3304_v17 = vpop.xlane.xlu1 %3303 }
0x1ac6   :  { %v3312_v18 = vmul.f32 0.020833334, %v3304_v17 }
0x1ac7   :  { %v3301_v19 = vpop.xlane.xlu0 %3300 }
0x1ac8   :  { %v3316_v21 = vadd.f32 1e-05, %v3312_v18  ;;  %v3311_v10 = vmul.f32 0.020833334, %v3301_v19 }
0x1aca   :  { %4769 = vrsqrt.f32 %v3316_v21  ;;  %v3315_v23 = vadd.f32 1e-05, %v3311_v10 }
0x1acc   :  { %4771 = vrsqrt.f32 %v3315_v23 }
0x1ace   :  { %v3307_v24 = vpop.xlane.xlu0 %3306 }
0x1acf   :  { %v3313_v26 = vmul.f32 0.020833334, %v3307_v24 }
0x1ad1   :  { %v3317_v29 = vadd.f32 1e-05, %v3313_v26  ;;  %v3547_v26 = vld [vmem:[#allocation9 + $0x78] sm:$0xff] }
0x1ad2   :  { %v3310_v59 = vpop.xlane.xlu1 %3309  ;;  %4568 = vmatprep.subr.mxu1 %v3547_v26 }
0x1ad3   :  { %4773 = vrsqrt.f32 %v3317_v29  ;;  %v3314_v32 = vmul.f32 0.020833334, %v3310_v59  ;;  %4569 = vmatpush3.msra.mxu1 %v3547_v26  ;;  %v3546_v29 = vld [vmem:[#allocation9 + $0x70] sm:$0xff]  ;;  %v3545_v59 = vld [vmem:[#allocation9 + $0x68] sm:$0xff] }
0x1ad4   :  { %4570 = vmatprep.subr.mxu1 %v3546_v29 }
0x1ad5   :  { %v3318_v62 = vadd.f32 1e-05, %v3314_v32  ;;  %4571 = vmatpush3.msra.mxu1 %v3546_v29  ;;  %v3544_v32 = vld [vmem:[#allocation9 + $0x60] sm:$0xff] }
0x1ad6   :  { %4572 = vmatprep.subr.mxu1 %v3545_v59 }
0x1ad7   :  { %v4770_v25 = vpop.eup %4769  ;;  %4775 = vrsqrt.f32 %v3318_v62  ;;  %4573 = vmatpush3.msra.mxu1 %v3545_v59  ;;  %v3543_v62 = vld [vmem:[#allocation9 + $0x58] sm:$0xff] }
0x1ad8   :  { %v3324_v35 = vmul.f32 %v4770_v25, %v3292_v7  ;;  %4574 = vmatprep.subr.mxu1 %v3544_v32  ;;  %v3542_v25 = vld [vmem:[#allocation9 + $0x50] sm:$0xff] }
0x1ad9   :  { %v4772_v37 = vpop.eup %4771  ;;  %4575 = vmatpush3.msra.mxu1 %v3544_v32 }
0x1ada   :  { %v3323_v30 = vmul.f32 %v4772_v37, %v3291_v60  ;;  %v3334_v38 = vmul.f32 %v4076_v44, %v3324_v35  ;;  %4576 = vmatprep.subr.mxu1 %v3543_v62  ;;  %v3541_v35 = vld [vmem:[#allocation9 + $0x48] sm:$0xff] }
0x1adb   :  { %4577 = vmatpush3.msra.mxu1 %v3543_v62 }
0x1adc   :  { %v3333_v2 = vmul.f32 %v4076_v44, %v3323_v30  ;;  %v3344_v41 = vadd.f32 %v4077_v39, %v3334_v38  ;;  %4578 = vmatprep.subr.mxu1 %v3542_v25 }
0x1add   :  { %4579 = vmatpush3.msra.mxu1 %v3542_v25 }
0x1ade   :  { %v3343_v31 = vadd.f32 %v4077_v39, %v3333_v2  ;;  %4580 = vmatprep.subr.mxu1 %v3541_v35 }
0x1adf   :  { %4581 = vmatpush3.msra.mxu1 %v3541_v35 }
0x1ae0   :  { %v4774_v43 = vpop.eup %4773  ;;  %4562 = vmatprep.mubr.msk.f32.mxu0 %vm398_vm4, %v3343_v31 }
0x1ae1   :  { %4563 = vmatmul.mubr.msk.f32.vlgmr.msra.gmra.mxu0 %vm398_vm4, %v3344_v41  ;;  %v3325_v40 = vmul.f32 %v4774_v43, %v3293_v63 }
0x1ae3   :  { %v3335_v46 = vmul.f32 %v4076_v44, %v3325_v40 }
0x1ae4   :  { %v4776_v47 = vpop.eup %4775 }
0x1ae5   :  { %v3345_v48 = vadd.f32 %v4077_v39, %v3335_v46  ;;  %v3326_v50 = vmul.f32 %v4776_v47, %v3294_v27 }
0x1ae7   :  { %4565 = vmatprep.mubr.msk.f32.mxu0 %vm398_vm4, %v3345_v48  ;;  %v3336_v52 = vmul.f32 %v4076_v44, %v3326_v50  ;;  %v3540_v44 = vld [vmem:[#allocation9 + $0x40] sm:$0xff] }
0x1ae8   :  { %4582 = vmatprep.subr.mxu1 %v3540_v44 }
0x1ae9   :  { %v3346_v53 = vadd.f32 %v4077_v39, %v3336_v52  ;;  %4583 = vmatpush3.msra.mxu1 %v3540_v44 }
0x1aeb   :  { %4566 = vmatmul.mubr.msk.f32.gmra.mxu0 %vm398_vm4, %v3346_v53  ;;  %v4086_v53 = vld [vmem:[%s6069_s17 + $0x1] ss:$0 sm:$0xff] }
0x1ba1   :  { %v4564_v33 = vpop.f32.mrf.mxu0 }
0x1ba2   :  { %v3446_v54 = vadd.f32 %v4564_v33, %v4079_v28 }
0x1ba3   :  { %v3440_v55 = vpop.f32.mrf.mxu0 }
0x1ba4   :  { %v3460_v56 = vmax.f32 %v3446_v54, 0.0  ;;  %v3441_v20 = vadd.f32 %v4079_v28, %v3440_v55  ;;  %v4087_v55 = vld [vmem:[%s6070_s18 + $0x1] ss:$0 sm:$0xff] }
0x1ba6   :  { %v3459_v22 = vmax.f32 %v3441_v20, 0.0  ;;  %v3470_v7 = vsel %vm1833_vm9, %v3460_v56, 0.0 }
0x1ba7   :  { %3471 = vadd.xlane.f32.xlu1 %v3470_v7 }
0x1ba8   :  { %v3467_v58 = vsel %vm1833_vm9, %v3459_v22, 0.0 }
0x1ba9   :  { %3468 = vadd.xlane.f32.xlu0 %v3467_v58 }
0x1bab   :  { %v4567_v60 = vpop.f32.mrf.mxu0 }
0x1bac   :  { %v3456_v4 = vadd.f32 %v4567_v60, %v4079_v28 }
0x1bad   :  { %v3450_v11 = vpop.f32.mrf.mxu0 }
0x1bae   :  { %v3462_v36 = vmax.f32 %v3456_v4, 0.0  ;;  %v3451_v61 = vadd.f32 %v4079_v28, %v3450_v11 }
0x1bb0   :  { %v3461_v57 = vmax.f32 %v3451_v61, 0.0  ;;  %v3476_v1 = vsel %vm1833_vm9, %v3462_v36, 0.0 }
0x1bb1   :  { %3477 = vadd.xlane.f32.xlu1 %v3476_v1  ;;  %v4089_v1 = vld [vmem:[%s6072_s20 + $0x1] ss:$0 sm:$0xff] }
0x1bb2   :  { %v3473_v63 = vsel %vm1833_vm9, %v3461_v57, 0.0 }
0x1bb3   :  { %3474 = vadd.xlane.f32.xlu0 %v3473_v63 }
0x1c30   :  { %v3472_v5 = vpop.xlane.xlu1 %3471 }
0x1c31   :  { %v3480_v0 = vmul.f32 0.015625, %v3472_v5 }
0x1c32   :  { %v3469_v34 = vpop.xlane.xlu0 %3468 }
0x1c33   :  { %v3484_v27 = vsub.f32 %v3460_v56, %v3480_v0  ;;  %v3479_v6 = vmul.f32 0.015625, %v3469_v34 }
0x1c35   :  { %v5954_v3 = vsub.f32 %v3459_v22, %v3479_v6  ;;  %v3488_v8 = vmul.f32 %v3484_v27, %v3484_v27 }
0x1c37   :  { %v3494_v9 = vsel %vm1833_vm9, %v3488_v8, 0.0  ;;  %v3487_v12 = vmul.f32 %v5954_v3, %v5954_v3 }
0x1c38   :  { %3495 = vadd.xlane.f32.xlu1 %v3494_v9 }
0x1c39   :  { %v3491_v13 = vsel %vm1833_vm9, %v3487_v12, 0.0 }
0x1c3a   :  { %v3478_v14 = vpop.xlane.xlu1 %3477  ;;  %3492 = vadd.xlane.f32.xlu0 %v3491_v13 }
0x1c3b   :  { %v3482_v15 = vmul.f32 0.015625, %v3478_v14 }
0x1c3c   :  { %v3475_v16 = vpop.xlane.xlu0 %3474 }
0x1c3d   :  { %v3486_v17 = vsub.f32 %v3462_v36, %v3482_v15  ;;  %v3481_v18 = vmul.f32 0.015625, %v3475_v16 }
0x1c3f   :  { %v3485_v19 = vsub.f32 %v3461_v57, %v3481_v18  ;;  %v3490_v21 = vmul.f32 %v3486_v17, %v3486_v17 }
0x1c41   :  { %v3500_v10 = vsel %vm1833_vm9, %v3490_v21, 0.0  ;;  %v3489_v23 = vmul.f32 %v3485_v19, %v3485_v19 }
0x1c42   :  { %3501 = vadd.xlane.f32.xlu1 %v3500_v10 }
0x1c43   :  { %v3497_v24 = vsel %vm1833_vm9, %v3489_v23, 0.0 }
0x1c44   :  { %3498 = vadd.xlane.f32.xlu0 %v3497_v24 }
0x1cc1   :  { %v3496_v37 = vpop.xlane.xlu1 %3495 }
0x1cc2   :  { %v3504_v30 = vmul.f32 0.015625, %v3496_v37 }
0x1cc3   :  { %v3493_v38 = vpop.xlane.xlu0 %3492 }
0x1cc4   :  { %v3508_v39 = vadd.f32 1e-05, %v3504_v30  ;;  %v3503_v2 = vmul.f32 0.015625, %v3493_v38 }
0x1cc6   :  { %4777 = vrsqrt.f32 %v3508_v39  ;;  %v3507_v31 = vadd.f32 1e-05, %v3503_v2 }
0x1cc8   :  { %4779 = vrsqrt.f32 %v3507_v31 }
0x1ccb   :  { %v3502_v41 = vpop.xlane.xlu1 %3501 }
0x1ccc   :  { %v3506_v43 = vmul.f32 0.015625, %v3502_v41 }
0x1ccd   :  { %v3499_v40 = vpop.xlane.xlu0 %3498 }
0x1cce   :  { %v3510_v46 = vadd.f32 1e-05, %v3506_v43  ;;  %v3505_v47 = vmul.f32 0.015625, %v3499_v40 }
0x1cd0   :  { %4781 = vrsqrt.f32 %v3510_v46  ;;  %v3509_v48 = vadd.f32 1e-05, %v3505_v47 }
0x1cd2   :  { %4783 = vrsqrt.f32 %v3509_v48 }
0x1cd3   :  { %v4778_v50 = vpop.eup %4777 }
0x1cd4   :  { %v3516_v52 = vmul.f32 %v4778_v50, %v3484_v27 }
0x1cd5   :  { %v4780_v28 = vpop.eup %4779 }
0x1cd6   :  { %v3515_v33 = vmul.f32 %v4780_v28, %v5954_v3  ;;  %v3526_v54 = vmul.f32 %v4086_v53, %v3516_v52 }
0x1cd8   :  { %v3525_v56 = vmul.f32 %v4086_v53, %v3515_v33  ;;  %v3536_v22 = vadd.f32 %v4087_v55, %v3526_v54  ;;  %v5991_v33 = vld [vmem:[%s6073_s21] ss:$0 sm:$0xff]  ;;  %s4971_s21 = smov [#allocation14]  }
0x1cda   :  { %v3535_v20 = vadd.f32 %v4087_v55, %v3525_v56  ;;  %v5996_v56 = vld [vmem:[%s6074_s22] ss:$0 sm:$0xff]  ;;  %s3914_s22 = sshll.u32 %s4971_s21, 4  ;;  %s3915_s22 = int_to_ptr.vmem [resolvable:$true] %s3914_s22 }
0x1cdb   :  { %s4925_s10 = scalar_lea.vmem %s3915_s22, 512  ;;  %p4930_p3 = scmp.lt.s32.totalorder %s3915_s22, %s3915_s22 }
0x1cdc   :  { %4584 = vmatprep.mubr.msk.f32.mxu1 %vm1833_vm9, %v3535_v20  ;;  %p4926_p2 = scmp.ne.s32.totalorder %s3915_s22, %s4925_s10  ;;  %p4931_p4 = scmp.lt.s32.totalorder %s4925_s10, %s4925_s10 }
0x1cdd   :  { %v4782_v7 = vpop.eup %4781  ;;  %4585 = vmatmul.mubr.msk.f32.vlgmr.msra.gmra.mxu1 %vm1833_vm9, %v3536_v22 }
0x1cde   :  { %v3518_v58 = vmul.f32 %v4782_v7, %v3486_v17  ;;  %p4932_p5 = por %p4931_p4, %p4930_p3 }
0x1cdf   :  { %v4784_v60 = vpop.eup %4783 }
0x1ce0   :  { %v3517_v4 = vmul.f32 %v4784_v60, %v3485_v19  ;;  %v3528_v11 = vmul.f32 %v4086_v53, %v3518_v58  ;;  %p4933_p6 = pnand %p4932_p5, %p4926_p2 }
0x1ce2   :  { %v3527_v36 = vmul.f32 %v4086_v53, %v3517_v4  ;;  %v3538_v57 = vadd.f32 %v4087_v55, %v3528_v11 }
0x1ce4   :  { %v3537_v61 = vadd.f32 %v4087_v55, %v3527_v36 }
0x1ce6   :  { %4587 = vmatprep.mubr.msk.f32.mxu1 %vm1833_vm9, %v3537_v61 }
0x1ce7   :  { %4588 = vmatmul.mubr.msk.f32.gmra.mxu1 %vm1833_vm9, %v3538_v57 }
0x1d9d   :  { %v4586_v63 = vpop.f32.mrf.mxu1 }
0x1d9e   :  { %v3640_v5 = vadd.f32 %v4586_v63, %v4089_v1 }
0x1d9f   :  { %v3634_v0 = vpop.f32.mrf.mxu1 }
0x1da0   :  { %v3654_v34 = vadd.f32 %v3640_v5, %v5910_v42  ;;  %v3635_v27 = vadd.f32 %v4089_v1, %v3634_v0 }
0x1da2   :  { %v3653_v6 = vadd.f32 %v3635_v27, %v5915_v45  ;;  %v3662_v3 = vsel %vm398_vm4, %v3654_v34, 0.0 }
0x1da3   :  { %3663 = vadd.xlane.f32.xlu1 %v3662_v3 }
0x1da4   :  { %v3659_v8 = vsel %vm398_vm4, %v3653_v6, 0.0 }
0x1da5   :  { %3660 = vadd.xlane.f32.xlu0 %v3659_v8 }
0x1da7   :  { %v4589_v9 = vpop.f32.mrf.mxu1 }
0x1da8   :  { %v3650_v12 = vadd.f32 %v4589_v9, %v4089_v1 }
0x1da9   :  { %v3644_v13 = vpop.f32.mrf.mxu1 }
0x1daa   :  { %v3656_v14 = vadd.f32 %v3650_v12, %v5925_v51  ;;  %v3645_v15 = vadd.f32 %v4089_v1, %v3644_v13 }
0x1dac   :  { %v3655_v16 = vadd.f32 %v3645_v15, %v5920_v49  ;;  %v3668_v17 = vsel %vm398_vm4, %v3656_v14, 0.0 }
0x1dad   :  { %3669 = vadd.xlane.f32.xlu1 %v3668_v17 }
0x1dae   :  { %v3665_v42 = vsel %vm398_vm4, %v3655_v16, 0.0 }
0x1daf   :  { %3666 = vadd.xlane.f32.xlu0 %v3665_v42 }
0x1e2c   :  { %v3664_v45 = vpop.xlane.xlu1 %3663 }
0x1e2d   :  { %v3672_v18 = vmul.f32 0.020833334, %v3664_v45 }
0x1e2e   :  { %v3661_v19 = vpop.xlane.xlu0 %3660 }
0x1e2f   :  { %v3676_v21 = vsub.f32 %v3654_v34, %v3672_v18  ;;  %v3671_v10 = vmul.f32 0.020833334, %v3661_v19 }
0x1e31   :  { %v3675_v23 = vsub.f32 %v3653_v6, %v3671_v10  ;;  %v3680_v24 = vmul.f32 %v3676_v21, %v3676_v21 }
0x1e33   :  { %v3686_v26 = vsel %vm398_vm4, %v3680_v24, 0.0  ;;  %v3679_v29 = vmul.f32 %v3675_v23, %v3675_v23 }
0x1e34   :  { %3687 = vadd.xlane.f32.xlu1 %v3686_v26 }
0x1e35   :  { %v3683_v51 = vsel %vm398_vm4, %v3679_v29, 0.0 }
0x1e36   :  { %v3670_v49 = vpop.xlane.xlu1 %3669  ;;  %3684 = vadd.xlane.f32.xlu0 %v3683_v51 }
0x1e37   :  { %v3674_v59 = vmul.f32 0.020833334, %v3670_v49  ;;  %v3800_v49 = vld [vmem:[#allocation11 + $0x28] sm:$0xff] }
0x1e38   :  { %v3667_v32 = vpop.xlane.xlu0 %3666  ;;  %4590 = vmatprep.subr.mxu0 %v3800_v49 }
0x1e39   :  { %v3678_v62 = vsub.f32 %v3656_v14, %v3674_v59  ;;  %v3673_v25 = vmul.f32 0.020833334, %v3667_v32  ;;  %4591 = vmatpush3.msra.mxu0 %v3800_v49  ;;  %v3799_v59 = vld [vmem:[#allocation11 + $0x20] sm:$0xff]  ;;  %v3798_v32 = vld [vmem:[#allocation11 + $0x18] sm:$0xff] }
0x1e3a   :  { %4592 = vmatprep.subr.mxu0 %v3799_v59 }
0x1e3b   :  { %v3677_v35 = vsub.f32 %v3655_v16, %v3673_v25  ;;  %v3682_v44 = vmul.f32 %v3678_v62, %v3678_v62  ;;  %4593 = vmatpush3.msra.mxu0 %v3799_v59  ;;  %v3796_v25 = vld [vmem:[#allocation11 + $0x8] sm:$0xff] }
0x1e3c   :  { %4594 = vmatprep.subr.mxu0 %v3798_v32 }
0x1e3d   :  { %v3692_v37 = vsel %vm398_vm4, %v3682_v44, 0.0  ;;  %v3681_v30 = vmul.f32 %v3677_v35, %v3677_v35  ;;  %4595 = vmatpush3.msra.mxu0 %v3798_v32 }
0x1e3e   :  { %3693 = vadd.xlane.f32.xlu1 %v3692_v37 }
0x1e3f   :  { %v3689_v38 = vsel %vm398_vm4, %v3681_v30, 0.0 }
0x1e40   :  { %3690 = vadd.xlane.f32.xlu0 %v3689_v38 }
0x1ebd   :  { %v3688_v39 = vpop.xlane.xlu1 %3687 }
0x1ebe   :  { %v3696_v2 = vmul.f32 0.020833334, %v3688_v39 }
0x1ebf   :  { %v3685_v31 = vpop.xlane.xlu0 %3684 }
0x1ec0   :  { %v3700_v41 = vadd.f32 1e-05, %v3696_v2  ;;  %v3695_v43 = vmul.f32 0.020833334, %v3685_v31 }
0x1ec2   :  { %4785 = vrsqrt.f32 %v3700_v41  ;;  %v3699_v40 = vadd.f32 1e-05, %v3695_v43 }
0x1ec4   :  { %4787 = vrsqrt.f32 %v3699_v40 }
0x1ec7   :  { %v3694_v46 = vpop.xlane.xlu1 %3693 }
0x1ec8   :  { %v3698_v47 = vmul.f32 0.020833334, %v3694_v46 }
0x1ec9   :  { %v3691_v48 = vpop.xlane.xlu0 %3690 }
0x1eca   :  { %v3702_v50 = vadd.f32 1e-05, %v3698_v47  ;;  %v3697_v52 = vmul.f32 0.020833334, %v3691_v48 }
0x1ecc   :  { %4789 = vrsqrt.f32 %v3702_v50  ;;  %v3701_v53 = vadd.f32 1e-05, %v3697_v52 }
0x1ece   :  { %4791 = vrsqrt.f32 %v3701_v53 }
0x1ecf   :  { %v4786_v28 = vpop.eup %4785 }
0x1ed0   :  { %v3708_v54 = vmul.f32 %v4786_v28, %v3676_v21 }
0x1ed1   :  { %v4788_v55 = vpop.eup %4787 }
0x1ed2   :  { %v3718_v20 = vmul.f32 %v5991_v33, %v3708_v54  ;;  %v3707_v22 = vmul.f32 %v4788_v55, %v3675_v23 }
0x1ed4   :  { %v3728_v7 = vadd.f32 %v5996_v56, %v3718_v20  ;;  %v3717_v58 = vmul.f32 %v5991_v33, %v3707_v22 }
0x1ed6   :  { %v3734_v60 = vsel %vm398_vm4, %v3728_v7, 0.0  ;;  %v3727_v4 = vadd.f32 %v5996_v56, %v3717_v58 }
0x1ed7   :  { %3735 = vadd.xlane.f32.xlu1 %v3734_v60 }
0x1ed8   :  { %v3731_v11 = vsel %vm398_vm4, %v3727_v4, 0.0 }
0x1ed9   :  { %v4790_v36 = vpop.eup %4789  ;;  %3732 = vadd.xlane.f32.xlu0 %v3731_v11 }
0x1eda   :  { %v3710_v61 = vmul.f32 %v4790_v36, %v3678_v62  ;;  %v3797_v62 = vld [vmem:[#allocation11 + $0x10] sm:$0xff] }
0x1edb   :  { %v4792_v57 = vpop.eup %4791  ;;  %4596 = vmatprep.subr.mxu0 %v3797_v62 }
0x1edc   :  { %v3720_v1 = vmul.f32 %v5991_v33, %v3710_v61  ;;  %v3709_v63 = vmul.f32 %v4792_v57, %v3677_v35  ;;  %4597 = vmatpush3.msra.mxu0 %v3797_v62  ;;  %v3795_v35 = vld [vmem:[#allocation11] sm:$0xff] }
0x1edd   :  { %4598 = vmatprep.subr.mxu0 %v3796_v25 }
0x1ede   :  { %v3730_v5 = vadd.f32 %v5996_v56, %v3720_v1  ;;  %v3719_v0 = vmul.f32 %v5991_v33, %v3709_v63  ;;  %4599 = vmatpush3.msra.mxu0 %v3796_v25 }
0x1edf   :  { %4600 = vmatprep.subr.mxu0 %v3795_v35 }
0x1ee0   :  { %v3740_v34 = vsel %vm398_vm4, %v3730_v5, 0.0  ;;  %v3729_v27 = vadd.f32 %v5996_v56, %v3719_v0  ;;  %4601 = vmatpush3.msra.mxu0 %v3795_v35 }
0x1ee1   :  { %3741 = vadd.xlane.f32.xlu1 %v3740_v34 }
0x1ee2   :  { %v3737_v6 = vsel %vm398_vm4, %v3729_v27, 0.0 }
0x1ee3   :  { %3738 = vadd.xlane.f32.xlu0 %v3737_v6 }
0x1f60   :  { %v3736_v3 = vpop.xlane.xlu1 %3735 }
0x1f61   :  { %v3744_v8 = vmul.f32 0.020833334, %v3736_v3 }
0x1f62   :  { %v3733_v9 = vpop.xlane.xlu0 %3732 }
0x1f63   :  { %v3748_v12 = vsub.f32 %v3728_v7, %v3744_v8  ;;  %v3743_v13 = vmul.f32 0.020833334, %v3733_v9 }
0x1f65   :  { %v3747_v14 = vsub.f32 %v3727_v4, %v3743_v13  ;;  %v3752_v15 = vmul.f32 %v3748_v12, %v3748_v12 }
0x1f67   :  { %v3758_v16 = vsel %vm398_vm4, %v3752_v15, 0.0  ;;  %v3751_v17 = vmul.f32 %v3747_v14, %v3747_v14 }
0x1f68   :  { %3759 = vadd.xlane.f32.xlu1 %v3758_v16 }
0x1f69   :  { %v3755_v42 = vsel %vm398_vm4, %v3751_v17, 0.0 }
0x1f6a   :  { %v3742_v45 = vpop.xlane.xlu1 %3741  ;;  %3756 = vadd.xlane.f32.xlu0 %v3755_v42 }
0x1f6b   :  { %v3746_v18 = vmul.f32 0.020833334, %v3742_v45 }
0x1f6c   :  { %v3739_v19 = vpop.xlane.xlu0 %3738 }
0x1f6d   :  { %v3750_v21 = vsub.f32 %v3730_v5, %v3746_v18  ;;  %v3745_v10 = vmul.f32 0.020833334, %v3739_v19 }
0x1f6f   :  { %v3749_v23 = vsub.f32 %v3729_v27, %v3745_v10  ;;  %v3754_v24 = vmul.f32 %v3750_v21, %v3750_v21 }
0x1f71   :  { %v3764_v26 = vsel %vm398_vm4, %v3754_v24, 0.0  ;;  %v3753_v29 = vmul.f32 %v3749_v23, %v3749_v23 }
0x1f72   :  { %3765 = vadd.xlane.f32.xlu1 %v3764_v26 }
0x1f73   :  { %v3761_v51 = vsel %vm398_vm4, %v3753_v29, 0.0 }
0x1f74   :  { %3762 = vadd.xlane.f32.xlu0 %v3761_v51 }
0x1ff1   :  { %v3760_v44 = vpop.xlane.xlu1 %3759 }
0x1ff2   :  { %v3768_v37 = vmul.f32 0.020833334, %v3760_v44 }
0x1ff3   :  { %v3757_v30 = vpop.xlane.xlu0 %3756 }
0x1ff4   :  { %v3772_v38 = vadd.f32 1e-05, %v3768_v37  ;;  %v3767_v39 = vmul.f32 0.020833334, %v3757_v30 }
0x1ff6   :  { %4793 = vrsqrt.f32 %v3772_v38  ;;  %v3771_v2 = vadd.f32 1e-05, %v3767_v39 }
0x1ff8   :  { %4795 = vrsqrt.f32 %v3771_v2 }
0x1ffb   :  { %v3766_v31 = vpop.xlane.xlu1 %3765 }
0x1ffc   :  { %v3770_v41 = vmul.f32 0.020833334, %v3766_v31 }
0x1ffd   :  { %v3763_v43 = vpop.xlane.xlu0 %3762 }
0x1ffe   :  { %v3774_v40 = vadd.f32 1e-05, %v3770_v41  ;;  %v3769_v46 = vmul.f32 0.020833334, %v3763_v43 }
0x2000   :  { %4797 = vrsqrt.f32 %v3774_v40  ;;  %v3773_v47 = vadd.f32 1e-05, %v3769_v46 }
0x2002   :  { %4799 = vrsqrt.f32 %v3773_v47 }
0x2003   :  { %v4794_v48 = vpop.eup %4793 }
0x2004   :  { %v3780_v50 = vmul.f32 %v4794_v48, %v3748_v12 }
0x2005   :  { %v4796_v52 = vpop.eup %4795 }
0x2006   :  { %v3784_v53 = vmul.f32 %v5991_v33, %v3780_v50  ;;  %v3779_v28 = vmul.f32 %v4796_v52, %v3747_v14 }
0x2008   :  { %v3783_v54 = vmul.f32 %v5991_v33, %v3779_v28  ;;  %v3788_v55 = vadd.f32 %v5996_v56, %v3784_v53 }
0x200a   :  { %v3787_v20 = vadd.f32 %v5996_v56, %v3783_v54  ;;  %3792 = vst.msk [vmem:[#allocation14 + $0x8] sm:$0xff] %vm398_vm4, %v3788_v55 }
0x200c   :  { %4602 = vmatprep.mubr.msk.f32.mxu0 %vm398_vm4, %v3787_v20  ;;  %3791 = vst.msk [vmem:[#allocation14] sm:$0xff] %vm398_vm4, %v3787_v20 }
0x200d   :  { %v4798_v22 = vpop.eup %4797  ;;  %4603 = vmatmul.mubr.msk.f32.vlgmr.msra.gmra.mxu0 %vm398_vm4, %v3788_v55 }
0x200e   :  { %v3782_v7 = vmul.f32 %v4798_v22, %v3750_v21 }
0x200f   :  { %v4800_v58 = vpop.eup %4799 }
0x2010   :  { %v3781_v60 = vmul.f32 %v4800_v58, %v3749_v23  ;;  %v3786_v4 = vmul.f32 %v5991_v33, %v3782_v7 }
0x2012   :  { %v3785_v11 = vmul.f32 %v5991_v33, %v3781_v60  ;;  %v3790_v36 = vadd.f32 %v5996_v56, %v3786_v4 }
0x2014   :  { %v3789_v61 = vadd.f32 %v5996_v56, %v3785_v11  ;;  %3794 = vst.msk [vmem:[#allocation14 + $0x18] sm:$0xff] %vm398_vm4, %v3790_v36 }
0x2016   :  { %4605 = vmatprep.mubr.msk.f32.mxu0 %vm398_vm4, %v3789_v61  ;;  %3793 = vst.msk [vmem:[#allocation14 + $0x10] sm:$0xff] %vm398_vm4, %v3789_v61 }
0x2017   :  { %4606 = vmatmul.mubr.msk.f32.gmra.mxu0 %vm398_vm4, %v3790_v36 }
0x2018   :  { %4936 = shalt.err (!%p4933_p6)
}
0x2019   :  { %s6119_s5 = smov 8   ;;  %s6120_s3 = smov 128   ;;  %v4096_v33 = vld [vmem:[#allocation12] ss:$0 sm:$0xff] }
0x201a   :  { %3920 = dma.vmem_to_hbm [thread:$0]  %s3915_s22, 512, %s6077_s25, [#allocation5], %s6120_s3, %s6120_s3, %s6119_s5  }
0x20cd   :  { %v4604_v56 = vpop.f32.mrf.mxu0 }
0x20ce   :  { %v3892_v57 = vadd.f32 %v4604_v56, %v4096_v33 }
0x20cf   :  { %v3886_v1 = vpop.f32.mrf.mxu0 }
0x20d0   :  { %3906 = vst.msk [vmem:[%s6078_s26 + $0x8] sm:$0xff] %vm597_vm5, %v3892_v57  ;;  %v3887_v63 = vadd.f32 %v4096_v33, %v3886_v1 }
0x20d2   :  { %3905 = vst.msk [vmem:[%s6078_s26] sm:$0xff] %vm597_vm5, %v3887_v63 }
0x20d7   :  { %v4607_v5 = vpop.f32.mrf.mxu0 }
0x20d8   :  { %v3902_v0 = vadd.f32 %v4607_v5, %v4096_v33 }
0x20d9   :  { %v3896_v34 = vpop.f32.mrf.mxu0 }
0x20da   :  { %3908 = vst.msk [vmem:[%s6078_s26 + $0x18] sm:$0xff] %vm597_vm5, %v3902_v0  ;;  %v3897_v27 = vadd.f32 %v4096_v33, %v3896_v34 }
0x20dc   :  { %3907 = vst.msk [vmem:[%s6078_s26 + $0x10] sm:$0xff] %vm597_vm5, %v3897_v27 }
0x20dd   :  { %4953 = dma.done.wait [#allocation5], 512  }
0x20de   :  { %4954 = vsyncadd [#allocation5], 4294966784 }
0x20df   :  { %3928 = vsyncpa [#allocation4], 1 }
0x20e0   :  { %3929 = vsyncpa [#allocation7], 1 }
0x20e1   :  { %3930 = vsyncpa [#allocation10], 1 }
0x20e2   :  { %3931 = vsyncpa [#allocation13], 1 }
0x20e3   :  { %3932 = vsyncpa [#allocation5], 1 }

</bundles_post_ra>
